<compile_context>
chip_gen: v7x
topology: tpu7x:2x2x1
jax: 0.10.0
libtpu: 0.0.40
codegen_flags: <defaults>
</compile_context>

<pallas_src>
import jax
import jax.numpy as jnp
from jax.experimental import pallas as pl
from jax.experimental.pallas import tpu as pltpu  # noqa: F401  (kept for TPU-specific tuning hooks)

# ----------------------------- model config (small) -----------------------------
STATE_DIM = 32      # GGNN state dim (>= 13 annotation dim)
ANNOT = 13          # fixed annotation dim in the reference GGNN
N_NODE = 8
N_EDGE = 4
N_STEPS = 2
ENC_HID = 32
DEC_HID = 64
NUM_LAYERS = 2
VOCAB = 16
LANE = 128          # lane width used for the logits slab
SLAB_W = 256        # lane width of the packed weight slab (widest fused weight = 2*E*D)


def _align8(n):
    return -(-n // 8) * 8


# ================================ Pallas kernel =================================

def _build_kernel(offs, ids_off, dims):
    """Returns the fused kernel. `offs` / `ids_off` / `dims` are static Python ints."""
    B, n_node, T_src, T_dec = dims
    D, E, V, He, Hd = STATE_DIM, N_EDGE, VOCAB, ENC_HID, DEC_HID
    BN = B * n_node
    SRC_OFF, DEC_OFF, GS_OFF, LEN_OFF = ids_off

    def kernel(nodes_ref, ahat_ref, ids_ref, wslab_ref, logits_ref, hdec_ref, h2_ref):
        f32 = jnp.float32

        def W(name):
            r0, nr, nc = offs[name]
            return wslab_ref[r0:r0 + nr, :nc]

        def gru_cell(gi, h, whh, bhh):
            """One GRU step. gi already includes W_ih x + b_ih; whh is fused (H, 3H)."""
            Hh = h.shape[-1]
            gh = jnp.dot(h, whh, preferred_element_type=f32) + bhh
            r = jax.nn.sigmoid(gi[:, :Hh] + gh[:, :Hh])
            z = jax.nn.sigmoid(gi[:, Hh:2 * Hh] + gh[:, Hh:2 * Hh])
            n = jnp.tanh(gi[:, 2 * Hh:3 * Hh] + r * gh[:, 2 * Hh:3 * Hh])
            return (1.0 - z) * n + z * h

        nodes = nodes_ref[...]                                   # (BN, D)

        # --------------- GGNN: N_STEPS fused propagation steps + tanh head ---------------
        w_io, b_io = W("w_io"), W("b_io")                        # (D, 2ED), (1, 2ED)
        w_rz, b_rz = W("w_rz"), W("b_rz")                        # (3D, 2D), (1, 2D)
        w_n, b_n = W("w_n"), W("b_n")                            # (3D, D),  (1, D)
        a_mats = [ahat_ref[e] for e in range(2 * E)]             # 2E x (BN, BN), loaded once

        s = nodes
        for _ in range(N_STEPS):
            # one 256-lane dot covers all 2*E edge-type linears (in + out directions)
            m = jnp.dot(s, w_io, preferred_element_type=f32) + b_io      # (BN, 2*E*D)
            a_in = jnp.dot(a_mats[0], m[:, 0:D], preferred_element_type=f32)
            a_out = jnp.dot(a_mats[E], m[:, E * D:E * D + D], preferred_element_type=f32)
            for e in range(1, E):
                a_in = a_in + jnp.dot(a_mats[e], m[:, e * D:(e + 1) * D],
                                      preferred_element_type=f32)
                a_out = a_out + jnp.dot(a_mats[E + e], m[:, (E + e) * D:(E + e + 1) * D],
                                        preferred_element_type=f32)

            # fused r/z gate dot + fused transform-gate dot (instead of 9 per-gate dots)
            x_a = jnp.concatenate([a_in, a_out], axis=1)                 # (BN, 2D)
            rz = jnp.dot(jnp.concatenate([x_a, s], axis=1), w_rz,
                         preferred_element_type=f32) + b_rz              # (BN, 2D)
            r = jax.nn.sigmoid(rz[:, :D])
            z = jax.nn.sigmoid(rz[:, D:2 * D])
            h_hat = jnp.tanh(jnp.dot(jnp.concatenate([x_a, r * s], axis=1), w_n,
                                     preferred_element_type=f32) + b_n)
            s = (1.0 - z) * s + z * h_hat

        emb_node = jnp.tanh(
            jnp.dot(jnp.concatenate([s, nodes], axis=1), W("fout_w"),
                    preferred_element_type=f32) + W("fout_b"))           # (BN, D)

        # growing-site gather as a one-hot matmul (stays on the MXU, no gather)
        gs = ids_ref[GS_OFF:GS_OFF + B]                                  # (B, 1) int32
        col = jax.lax.broadcasted_iota(jnp.int32, (B, BN), 1)
        base = jax.lax.broadcasted_iota(jnp.int32, (B, BN), 0) * n_node
        sel = (col == gs + base).astype(f32)                             # (B, BN)
        hidden1 = jnp.dot(sel, emb_node, preferred_element_type=f32)     # (B, D)

        # --------------- encoder GRU (full length, zero initial hidden) ---------------
        src_ids = ids_ref[SRC_OFF:SRC_OFF + T_src * B]                   # (T_src*B, 1)
        src_oh = (jax.lax.broadcasted_iota(jnp.int32, (T_src * B, V), 1)
                  == src_ids).astype(f32)
        egi = jnp.dot(src_oh, W("enc_tab"), preferred_element_type=f32)  # (T_src*B, 3He)
        enc_whh, enc_bhh = W("enc_whh"), W("enc_bhh")
        h = jnp.zeros((B, He), f32)
        for t in range(T_src):
            h = gru_cell(egi[t * B:(t + 1) * B], h, enc_whh, enc_bhh)
        hidden2 = h
        h2_ref[...] = hidden2

        # --------------- linear1 + relu (decoder initial hidden) ---------------
        hid0 = jnp.maximum(
            jnp.dot(jnp.concatenate([hidden1, hidden2], axis=1), W("w1"),
                    preferred_element_type=f32) + W("b1"), 0.0)          # (B, Hd)

        # --------------- decoder GRU layer 0 (packed-sequence masking) ---------------
        lens = ids_ref[LEN_OFF:LEN_OFF + B]                              # (B, 1) int32
        dec_ids = ids_ref[DEC_OFF:DEC_OFF + T_dec * B]
        dec_oh = (jax.lax.broadcasted_iota(jnp.int32, (T_dec * B, V), 1)
                  == dec_ids).astype(f32)
        g0x = jnp.dot(dec_oh, W("d0_xtab"), preferred_element_type=f32)  # (T_dec*B, 3Hd)
        g0h = jnp.dot(hidden2, W("d0_h2w"), preferred_element_type=f32)  # (B, 3Hd)
        d0_whh, d0_bhh = W("d0_whh"), W("d0_bhh")

        h0 = hid0
        outs0 = []
        for t in range(T_dec):
            h_new = gru_cell(g0x[t * B:(t + 1) * B] + g0h, h0, d0_whh, d0_bhh)
            valid = lens > t                                             # emulate packing
            h0 = jnp.where(valid, h_new, h0)
            outs0.append(jnp.where(valid, h_new, 0.0))

        # --------------- decoder GRU layer 1 (input projection hoisted) ---------------
        # TODO(synk): inter-layer GRU dropout (train mode only) omitted; eval semantics used.
        outs0_cat = jnp.concatenate(outs0, axis=0)                       # (T_dec*B, Hd)
        g1 = jnp.dot(outs0_cat, W("d1_wih"),
                     preferred_element_type=f32) + W("d1_bih")           # (T_dec*B, 3Hd)
        d1_whh, d1_bhh = W("d1_whh"), W("d1_bhh")

        h1 = hid0
        outs1 = []
        for t in range(T_dec):
            h_new = gru_cell(g1[t * B:(t + 1) * B], h1, d1_whh, d1_bhh)
            valid = lens > t
            h1 = jnp.where(valid, h_new, h1)
            outs1.append(jnp.where(valid, h_new, 0.0))

        # --------------- fused linear2: ONE dot + ONE lane+sublane-dense store ---------
        outs1_cat = jnp.concatenate(outs1, axis=0)                       # (T_dec*B, Hd)
        logits_ref[...] = (jnp.dot(outs1_cat, W("w2"), preferred_element_type=f32)
                           + W("b2"))                                    # (T_dec*B, 128)

        hdec_ref[0] = h0
        hdec_ref[1] = h1

    return kernel


# =============================== model (JAX glue) ===============================

def _pack_slab(entries):
    """Pack (name, 2D array) into one lane-dense (R, SLAB_W) slab; 8-row-aligned offsets."""
    parts, offs, r = [], {}, 0
    for name, a in entries:
        a = jnp.asarray(a, jnp.float32)
        if a.ndim == 1:
            a = a.reshape(1, -1)
        nr, nc = a.shape
        nr_pad = _align8(nr)
        parts.append(jnp.pad(a, ((0, nr_pad - nr), (0, SLAB_W - nc))))
        offs[name] = (r, nr, nc)
        r += nr_pad
    return jnp.concatenate(parts, axis=0), offs


def _pad_rows(a, to):
    return jnp.pad(a, ((0, to - a.shape[0]), (0, 0)))


@jax.jit
def molopt_forward(params, core_fragment_data, growing_site, source_fragment_data,
                   x_input, lengths):
    """hidden=None branch of MolOpt.forward. Returns (out, hidden, hidden2)."""
    nodes = core_fragment_data["node"].astype(jnp.float32)   # (B, n, 13)
    A = core_fragment_data["adj"].astype(jnp.float32)        # (B, n, 2*n*E)
    B, n, _ = nodes.shape
    D, E, V = STATE_DIM, N_EDGE, VOCAB
    He, Hd = ENC_HID, DEC_HID
    BN = B * n

    g = params["ggnn"]

    # ---- GGNN operand prep (wrapper-side layout plumbing; all tiny) ----
    nodes_pad = jnp.pad(nodes, ((0, 0), (0, 0), (0, D - ANNOT))).reshape(BN, D)
    eyeB = jnp.eye(B, dtype=jnp.float32)
    # edge-major column blocks, matching PyTorch's edge-major stacking of in/out states.
    # NOTE: block-diagonal slabs are O((B*n)^2); fine at B=2, switch to a batch grid if B grows.
    A_in = A[:, :, :n * E].reshape(B, n, E, n)
    A_out = A[:, :, n * E:].reshape(B, n, E, n)
    ahat_in = jnp.einsum('buev,bc->ebucv', A_in, eyeB).reshape(E, BN, BN)
    ahat_out = jnp.einsum('buev,bc->ebucv', A_out, eyeB).reshape(E, BN, BN)
    ahat = jnp.concatenate([ahat_in, ahat_out], axis=0)       # (2E, BN, BN)

    # fuse the 2E per-edge linears along lanes: (D, 2*E*D)
    w_in_cat = jnp.transpose(g["in_w"], (2, 0, 1)).reshape(D, E * D)
    w_out_cat = jnp.transpose(g["out_w"], (2, 0, 1)).reshape(D, E * D)
    w_io = jnp.concatenate([w_in_cat, w_out_cat], axis=1)
    b_io = jnp.concatenate([g["in_b"].reshape(1, E * D), g["out_b"].reshape(1, E * D)], axis=1)

    # fused r/z gate weight (3D, 2D), transform gate weight (3D, D)
    w_rz = jnp.concatenate([g["reset_w"].T, g["update_w"].T], axis=1)
    b_rz = jnp.concatenate([g["reset_b"], g["update_b"]]).reshape(1, 2 * D)
    w_n = g["transform_w"].T
    b_n = g["transform_b"].reshape(1, D)

    # fout: (state | annotation) weight, annotation rows zero-padded to D
    wf = g["fout_w"].T                                                    # (D+13, D)
    fout_w = jnp.concatenate([wf[:D], jnp.pad(wf[D:], ((0, D - ANNOT), (0, 0)))], axis=0)
    fout_b = g["fout_b"].reshape(1, D)

    # ---- encoder GRU: embedding + b_ih folded into one (V, 3He) table; whh fused ----
    emb = params["embedding"]                                             # (V, V)
    enc_tab = emb @ params["enc_wih"].T + params["enc_bih"].reshape(1, 3 * He)
    enc_whh = params["enc_whh"].T                                         # (He, 3He)
    enc_bhh = params["enc_bhh"].reshape(1, 3 * He)

    # ---- linear1 ----
    w1 = params["lin1_w"].T                                               # (D+He, Hd)
    b1 = params["lin1_b"].reshape(1, Hd)

    # ---- decoder layer 0: fused token table + hidden2 part + fused whh ----
    d0 = params["decoder"][0]
    d0_wihT = d0["wih"].T                                                 # (V+He, 3Hd)
    d0_xtab = emb @ d0_wihT[:V] + d0["bih"].reshape(1, 3 * Hd)            # (V, 3Hd)
    d0_h2w = d0_wihT[V:]                                                  # (He, 3Hd)
    d0_whh = d0["whh"].T
    d0_bhh = d0["bhh"].reshape(1, 3 * Hd)

    # ---- decoder layer 1: fused wih / whh ----
    d1 = params["decoder"][1]
    d1_wih = d1["wih"].T                                                  # (Hd, 3Hd)
    d1_bih = d1["bih"].reshape(1, 3 * Hd)
    d1_whh = d1["whh"].T
    d1_bhh = d1["bhh"].reshape(1, 3 * Hd)

    # ---- linear2, padded to a lane-dense 128-wide output slab ----
    w2 = jnp.pad(params["lin2_w"].T, ((0, 0), (0, LANE - V)))             # (Hd, 128)
    b2 = jnp.pad(params["lin2_b"], (0, LANE - V)).reshape(1, LANE)

    # ---- pack ALL weights into ONE lane-dense slab (single DMA) ----
    wslab, offs = _pack_slab([
        ("w_io", w_io), ("b_io", b_io),
        ("w_rz", w_rz), ("b_rz", b_rz),
        ("w_n", w_n), ("b_n", b_n),
        ("fout_w", fout_w), ("fout_b", fout_b),
        ("enc_tab", enc_tab), ("enc_whh", enc_whh), ("enc_bhh", enc_bhh),
        ("w1", w1), ("b1", b1),
        ("d0_xtab", d0_xtab), ("d0_h2w", d0_h2w), ("d0_whh", d0_whh), ("d0_bhh", d0_bhh),
        ("d1_wih", d1_wih), ("d1_bih", d1_bih), ("d1_whh", d1_whh), ("d1_bhh", d1_bhh),
        ("w2", w2), ("b2", b2),
    ])

    # ---- pack ALL integer side inputs into one small int32 operand ----
    T_src = source_fragment_data.shape[1]
    T_dec = x_input.shape[1]
    src_ids = jnp.transpose(source_fragment_data.astype(jnp.int32)).reshape(T_src * B, 1)
    dec_ids = jnp.transpose(x_input.astype(jnp.int32)).reshape(T_dec * B, 1)
    gs_idx = growing_site.astype(jnp.int32).reshape(B, 1)
    lens = jnp.asarray(lengths, jnp.int32).reshape(B, 1)

    SRC_OFF = 0
    DEC_OFF = SRC_OFF + _align8(T_src * B)
    GS_OFF = DEC_OFF + _align8(T_dec * B)
    LEN_OFF = GS_OFF + _align8(B)
    ids = jnp.concatenate([
        _pad_rows(src_ids, _align8(T_src * B)),
        _pad_rows(dec_ids, _align8(T_dec * B)),
        _pad_rows(gs_idx, _align8(B)),
        _pad_rows(lens, _align8(B)),
    ], axis=0)                                                            # (N, 1) int32

    kernel = _build_kernel(offs, (SRC_OFF, DEC_OFF, GS_OFF, LEN_OFF), (B, n, T_src, T_dec))

    logits_flat, hidden_dec, hidden2 = pl.pallas_call(
        kernel,
        out_shape=(jax.ShapeDtypeStruct((T_dec * B, LANE), jnp.float32),
                   jax.ShapeDtypeStruct((NUM_LAYERS, B, Hd), jnp.float32),
                   jax.ShapeDtypeStruct((B, He), jnp.float32)),
    )(nodes_pad, ahat, ids, wslab)

    out = jnp.transpose(logits_flat.reshape(T_dec, B, LANE)[:, :, :V], (1, 0, 2))  # (B,T,V)
    hidden2_rep = jnp.broadcast_to(hidden2[:, None, :], (B, T_dec, He))
    return out, hidden_dec, hidden2_rep


# ============================= deterministic params =============================

def init_params(key):
    keys = iter(jax.random.split(key, 64))

    def nrm(shape, scale):
        return scale * jax.random.normal(next(keys), shape, dtype=jnp.float32)

    D, E = STATE_DIM, N_EDGE
    g = {
        "in_w": nrm((E, D, D), 0.02), "in_b": jnp.zeros((E, D), jnp.float32),
        "out_w": nrm((E, D, D), 0.02), "out_b": jnp.zeros((E, D), jnp.float32),
        "reset_w": nrm((D, 3 * D), 0.02), "reset_b": jnp.zeros((D,), jnp.float32),
        "update_w": nrm((D, 3 * D), 0.02), "update_b": jnp.zeros((D,), jnp.float32),
        "transform_w": nrm((D, 3 * D), 0.02), "transform_b": jnp.zeros((D,), jnp.float32),
        "fout_w": nrm((D, D + ANNOT), 0.02), "fout_b": jnp.zeros((D,), jnp.float32),
    }

    emb = nrm((VOCAB, VOCAB), 0.1).at[0].set(0.0)   # padding_idx=0

    p = {
        "ggnn": g,
        "embedding": emb,
        "enc_wih": nrm((3 * ENC_HID, VOCAB), 0.1),
        "enc_whh": nrm((3 * ENC_HID, ENC_HID), 0.1),
        "enc_bih": nrm((3 * ENC_HID,), 0.1),
        "enc_bhh": nrm((3 * ENC_HID,), 0.1),
        "lin1_w": nrm((DEC_HID, STATE_DIM + ENC_HID), 0.1),
        "lin1_b": nrm((DEC_HID,), 0.1),
        "lin2_w": nrm((VOCAB, DEC_HID), 0.1),
        "lin2_b": nrm((VOCAB,), 0.1),
    }
    dec = []
    in_size = VOCAB + ENC_HID
    for _ in range(NUM_LAYERS):
        dec.append({
            "wih": nrm((3 * DEC_HID, in_size), 0.1),
            "whh": nrm((3 * DEC_HID, DEC_HID), 0.1),
            "bih": nrm((3 * DEC_HID,), 0.1),
            "bhh": nrm((3 * DEC_HID,), 0.1),
        })
        in_size = DEC_HID
    p["decoder"] = dec
    return p


# ===================================== main =====================================

if __name__ == "__main__":
    B, T_SRC, T_DEC = 2, 6, 8
    key = jax.random.PRNGKey(0)
    k1, k2, k3, k4, k5 = jax.random.split(key, 5)

    nodes = jax.random.bernoulli(k1, 0.3, (B, N_NODE, ANNOT)).astype(jnp.float32)
    adj = jax.random.bernoulli(k2, 0.2, (B, N_NODE, 2 * N_NODE * N_EDGE)).astype(jnp.float32)
    core_fragment_data = {"node": nodes, "adj": adj}
    growing_site = jax.random.randint(k3, (B,), 0, N_NODE)
    source_fragment_data = jax.random.randint(k4, (B, T_SRC), 1, VOCAB)
    x_input = jax.random.randint(k5, (B, T_DEC), 1, VOCAB)
    lengths = jnp.array([T_DEC, T_DEC - 3], jnp.int32)   # max(lengths) == T_DEC

    params = init_params(jax.random.PRNGKey(42))

    out, hidden, hidden2 = molopt_forward(params, core_fragment_data, growing_site,
                                          source_fragment_data, x_input, lengths)
    jax.block_until_ready((out, hidden, hidden2))

    assert out.shape == (B, T_DEC, VOCAB)
    assert hidden.shape == (NUM_LAYERS, B, DEC_HID)
    assert hidden2.shape == (B, T_DEC, ENC_HID)
    assert bool(jnp.all(jnp.isfinite(out)))
    assert bool(jnp.all(jnp.isfinite(hidden)))
    print("KERNEL_OK")
</pallas_src>

<mosaic_0001>
module attributes {stable_mosaic.version = 11 : i64} {
  func.func @kernel(%arg0: memref<16x32xf32, #tpu.memory_space<vmem>>, %arg1: memref<8x16x16xf32, #tpu.memory_space<vmem>>, %arg2: memref<48x1xi32, #tpu.memory_space<vmem>>, %arg3: memref<784x256xf32, #tpu.memory_space<vmem>>, %arg4: memref<16x128xf32, #tpu.memory_space<vmem>>, %arg5: memref<2x2x64xf32, #tpu.memory_space<vmem>>, %arg6: memref<2x32xf32, #tpu.memory_space<vmem>>) attributes {dimension_semantics = [], scalar_prefetch = 0 : i64, scratch_operands = 0 : i64, tpu.core_type = #tpu.core_type<tc>} {
    %c0 = arith.constant 0 : index
    %c0_0 = arith.constant 0 : index
    %0 = vector.load %arg0[%c0, %c0_0] : memref<16x32xf32, #tpu.memory_space<vmem>>, vector<16x32xf32>
    %c0_1 = arith.constant 0 : index
    %c0_2 = arith.constant 0 : index
    %1 = vector.load %arg3[%c0_1, %c0_2] : memref<784x256xf32, #tpu.memory_space<vmem>>, vector<32x256xf32>
    %c32 = arith.constant 32 : index
    %c0_3 = arith.constant 0 : index
    %2 = vector.load %arg3[%c32, %c0_3] : memref<784x256xf32, #tpu.memory_space<vmem>>, vector<1x256xf32>
    %c40 = arith.constant 40 : index
    %c0_4 = arith.constant 0 : index
    %3 = vector.load %arg3[%c40, %c0_4] : memref<784x256xf32, #tpu.memory_space<vmem>>, vector<96x64xf32>
    %c136 = arith.constant 136 : index
    %c0_5 = arith.constant 0 : index
    %4 = vector.load %arg3[%c136, %c0_5] : memref<784x256xf32, #tpu.memory_space<vmem>>, vector<1x64xf32>
    %c144 = arith.constant 144 : index
    %c0_6 = arith.constant 0 : index
    %5 = vector.load %arg3[%c144, %c0_6] : memref<784x256xf32, #tpu.memory_space<vmem>>, vector<96x32xf32>
    %c240 = arith.constant 240 : index
    %c0_7 = arith.constant 0 : index
    %6 = vector.load %arg3[%c240, %c0_7] : memref<784x256xf32, #tpu.memory_space<vmem>>, vector<1x32xf32>
    %c0_8 = arith.constant 0 : index
    %c0_9 = arith.constant 0 : index
    %c0_10 = arith.constant 0 : index
    %7 = vector.load %arg1[%c0_8, %c0_9, %c0_10] : memref<8x16x16xf32, #tpu.memory_space<vmem>>, vector<1x16x16xf32>
    %8 = vector.shape_cast %7 : vector<1x16x16xf32> to vector<16x16xf32>
    %c1 = arith.constant 1 : index
    %c0_11 = arith.constant 0 : index
    %c0_12 = arith.constant 0 : index
    %9 = vector.load %arg1[%c1, %c0_11, %c0_12] : memref<8x16x16xf32, #tpu.memory_space<vmem>>, vector<1x16x16xf32>
    %10 = vector.shape_cast %9 : vector<1x16x16xf32> to vector<16x16xf32>
    %c2 = arith.constant 2 : index
    %c0_13 = arith.constant 0 : index
    %c0_14 = arith.constant 0 : index
    %11 = vector.load %arg1[%c2, %c0_13, %c0_14] : memref<8x16x16xf32, #tpu.memory_space<vmem>>, vector<1x16x16xf32>
    %12 = vector.shape_cast %11 : vector<1x16x16xf32> to vector<16x16xf32>
    %c3 = arith.constant 3 : index
    %c0_15 = arith.constant 0 : index
    %c0_16 = arith.constant 0 : index
    %13 = vector.load %arg1[%c3, %c0_15, %c0_16] : memref<8x16x16xf32, #tpu.memory_space<vmem>>, vector<1x16x16xf32>
    %14 = vector.shape_cast %13 : vector<1x16x16xf32> to vector<16x16xf32>
    %c4 = arith.constant 4 : index
    %c0_17 = arith.constant 0 : index
    %c0_18 = arith.constant 0 : index
    %15 = vector.load %arg1[%c4, %c0_17, %c0_18] : memref<8x16x16xf32, #tpu.memory_space<vmem>>, vector<1x16x16xf32>
    %16 = vector.shape_cast %15 : vector<1x16x16xf32> to vector<16x16xf32>
    %c5 = arith.constant 5 : index
    %c0_19 = arith.constant 0 : index
    %c0_20 = arith.constant 0 : index
    %17 = vector.load %arg1[%c5, %c0_19, %c0_20] : memref<8x16x16xf32, #tpu.memory_space<vmem>>, vector<1x16x16xf32>
    %18 = vector.shape_cast %17 : vector<1x16x16xf32> to vector<16x16xf32>
    %c6 = arith.constant 6 : index
    %c0_21 = arith.constant 0 : index
    %c0_22 = arith.constant 0 : index
    %19 = vector.load %arg1[%c6, %c0_21, %c0_22] : memref<8x16x16xf32, #tpu.memory_space<vmem>>, vector<1x16x16xf32>
    %20 = vector.shape_cast %19 : vector<1x16x16xf32> to vector<16x16xf32>
    %c7 = arith.constant 7 : index
    %c0_23 = arith.constant 0 : index
    %c0_24 = arith.constant 0 : index
    %21 = vector.load %arg1[%c7, %c0_23, %c0_24] : memref<8x16x16xf32, #tpu.memory_space<vmem>>, vector<1x16x16xf32>
    %22 = vector.shape_cast %21 : vector<1x16x16xf32> to vector<16x16xf32>
    %cst = arith.constant dense<0.000000e+00> : vector<16x256xf32>
    %23 = tpu.matmul %0, %1, %cst {dimension_numbers = #tpu.dot_dimension_numbers<[1], [0], [0], [1], [0, 0, 1, 1], [], []>} : vector<16x32xf32>, vector<32x256xf32>, vector<16x256xf32> -> vector<16x256xf32>
    %24 = vector.broadcast %2 : vector<1x256xf32> to vector<16x256xf32>
    %25 = arith.addf %23, %24 : vector<16x256xf32>
    %26 = vector.extract_strided_slice %25 {offsets = [0, 0], sizes = [16, 32], strides = [1, 1]} : vector<16x256xf32> to vector<16x32xf32>
    %cst_25 = arith.constant dense<0.000000e+00> : vector<16x32xf32>
    %27 = tpu.matmul %8, %26, %cst_25 {dimension_numbers = #tpu.dot_dimension_numbers<[1], [0], [0], [1], [0, 0, 1, 1], [], []>} : vector<16x16xf32>, vector<16x32xf32>, vector<16x32xf32> -> vector<16x32xf32>
    %28 = vector.extract_strided_slice %25 {offsets = [0, 128], sizes = [16, 32], strides = [1, 1]} : vector<16x256xf32> to vector<16x32xf32>
    %cst_26 = arith.constant dense<0.000000e+00> : vector<16x32xf32>
    %29 = tpu.matmul %16, %28, %cst_26 {dimension_numbers = #tpu.dot_dimension_numbers<[1], [0], [0], [1], [0, 0, 1, 1], [], []>} : vector<16x16xf32>, vector<16x32xf32>, vector<16x32xf32> -> vector<16x32xf32>
    %30 = vector.extract_strided_slice %25 {offsets = [0, 32], sizes = [16, 32], strides = [1, 1]} : vector<16x256xf32> to vector<16x32xf32>
    %cst_27 = arith.constant dense<0.000000e+00> : vector<16x32xf32>
    %31 = tpu.matmul %10, %30, %cst_27 {dimension_numbers = #tpu.dot_dimension_numbers<[1], [0], [0], [1], [0, 0, 1, 1], [], []>} : vector<16x16xf32>, vector<16x32xf32>, vector<16x32xf32> -> vector<16x32xf32>
    %32 = arith.addf %27, %31 : vector<16x32xf32>
    %33 = vector.extract_strided_slice %25 {offsets = [0, 160], sizes = [16, 32], strides = [1, 1]} : vector<16x256xf32> to vector<16x32xf32>
    %cst_28 = arith.constant dense<0.000000e+00> : vector<16x32xf32>
    %34 = tpu.matmul %18, %33, %cst_28 {dimension_numbers = #tpu.dot_dimension_numbers<[1], [0], [0], [1], [0, 0, 1, 1], [], []>} : vector<16x16xf32>, vector<16x32xf32>, vector<16x32xf32> -> vector<16x32xf32>
    %35 = arith.addf %29, %34 : vector<16x32xf32>
    %36 = vector.extract_strided_slice %25 {offsets = [0, 64], sizes = [16, 32], strides = [1, 1]} : vector<16x256xf32> to vector<16x32xf32>
    %cst_29 = arith.constant dense<0.000000e+00> : vector<16x32xf32>
    %37 = tpu.matmul %12, %36, %cst_29 {dimension_numbers = #tpu.dot_dimension_numbers<[1], [0], [0], [1], [0, 0, 1, 1], [], []>} : vector<16x16xf32>, vector<16x32xf32>, vector<16x32xf32> -> vector<16x32xf32>
    %38 = arith.addf %32, %37 : vector<16x32xf32>
    %39 = vector.extract_strided_slice %25 {offsets = [0, 192], sizes = [16, 32], strides = [1, 1]} : vector<16x256xf32> to vector<16x32xf32>
    %cst_30 = arith.constant dense<0.000000e+00> : vector<16x32xf32>
    %40 = tpu.matmul %20, %39, %cst_30 {dimension_numbers = #tpu.dot_dimension_numbers<[1], [0], [0], [1], [0, 0, 1, 1], [], []>} : vector<16x16xf32>, vector<16x32xf32>, vector<16x32xf32> -> vector<16x32xf32>
    %41 = arith.addf %35, %40 : vector<16x32xf32>
    %42 = vector.extract_strided_slice %25 {offsets = [0, 96], sizes = [16, 32], strides = [1, 1]} : vector<16x256xf32> to vector<16x32xf32>
    %cst_31 = arith.constant dense<0.000000e+00> : vector<16x32xf32>
    %43 = tpu.matmul %14, %42, %cst_31 {dimension_numbers = #tpu.dot_dimension_numbers<[1], [0], [0], [1], [0, 0, 1, 1], [], []>} : vector<16x16xf32>, vector<16x32xf32>, vector<16x32xf32> -> vector<16x32xf32>
    %44 = arith.addf %38, %43 : vector<16x32xf32>
    %45 = vector.extract_strided_slice %25 {offsets = [0, 224], sizes = [16, 32], strides = [1, 1]} : vector<16x256xf32> to vector<16x32xf32>
    %cst_32 = arith.constant dense<0.000000e+00> : vector<16x32xf32>
    %46 = tpu.matmul %22, %45, %cst_32 {dimension_numbers = #tpu.dot_dimension_numbers<[1], [0], [0], [1], [0, 0, 1, 1], [], []>} : vector<16x16xf32>, vector<16x32xf32>, vector<16x32xf32> -> vector<16x32xf32>
    %47 = arith.addf %41, %46 : vector<16x32xf32>
    %48 = tpu.concatenate %44, %47 in 1 : vector<16x32xf32>, vector<16x32xf32> -> vector<16x64xf32>
    %49 = tpu.concatenate %48, %0 in 1 : vector<16x64xf32>, vector<16x32xf32> -> vector<16x96xf32>
    %cst_33 = arith.constant dense<0.000000e+00> : vector<16x64xf32>
    %50 = tpu.matmul %49, %3, %cst_33 {dimension_numbers = #tpu.dot_dimension_numbers<[1], [0], [0], [1], [0, 0, 1, 1], [], []>} : vector<16x96xf32>, vector<96x64xf32>, vector<16x64xf32> -> vector<16x64xf32>
    %51 = vector.broadcast %4 : vector<1x64xf32> to vector<16x64xf32>
    %52 = arith.addf %50, %51 : vector<16x64xf32>
    %53 = vector.extract_strided_slice %52 {offsets = [0, 0], sizes = [16, 32], strides = [1, 1]} : vector<16x64xf32> to vector<16x32xf32>
    %54 = arith.negf %53 : vector<16x32xf32>
    %55 = math.exp %54 : vector<16x32xf32>
    %cst_34 = arith.constant 1.000000e+00 : f32
    %56 = vector.broadcast %cst_34 : f32 to vector<16x32xf32>
    %57 = arith.addf %56, %55 : vector<16x32xf32>
    %58 = arith.divf %56, %57 : vector<16x32xf32>
    %59 = vector.extract_strided_slice %52 {offsets = [0, 32], sizes = [16, 32], strides = [1, 1]} : vector<16x64xf32> to vector<16x32xf32>
    %60 = arith.negf %59 : vector<16x32xf32>
    %61 = math.exp %60 : vector<16x32xf32>
    %cst_35 = arith.constant 1.000000e+00 : f32
    %62 = vector.broadcast %cst_35 : f32 to vector<16x32xf32>
    %63 = arith.addf %62, %61 : vector<16x32xf32>
    %64 = arith.divf %62, %63 : vector<16x32xf32>
    %65 = arith.mulf %58, %0 : vector<16x32xf32>
    %66 = tpu.concatenate %48, %65 in 1 : vector<16x64xf32>, vector<16x32xf32> -> vector<16x96xf32>
    %cst_36 = arith.constant dense<0.000000e+00> : vector<16x32xf32>
    %67 = tpu.matmul %66, %5, %cst_36 {dimension_numbers = #tpu.dot_dimension_numbers<[1], [0], [0], [1], [0, 0, 1, 1], [], []>} : vector<16x96xf32>, vector<96x32xf32>, vector<16x32xf32> -> vector<16x32xf32>
    %68 = vector.broadcast %6 : vector<1x32xf32> to vector<16x32xf32>
    %69 = arith.addf %67, %68 : vector<16x32xf32>
    %70 = math.tanh %69 : vector<16x32xf32>
    %cst_37 = arith.constant 1.000000e+00 : f32
    %71 = vector.broadcast %cst_37 : f32 to vector<16x32xf32>
    %72 = arith.subf %71, %64 : vector<16x32xf32>
    %73 = arith.mulf %72, %0 : vector<16x32xf32>
    %74 = arith.mulf %64, %70 : vector<16x32xf32>
    %75 = arith.addf %73, %74 : vector<16x32xf32>
    %cst_38 = arith.constant dense<0.000000e+00> : vector<16x256xf32>
    %76 = tpu.matmul %75, %1, %cst_38 {dimension_numbers = #tpu.dot_dimension_numbers<[1], [0], [0], [1], [0, 0, 1, 1], [], []>} : vector<16x32xf32>, vector<32x256xf32>, vector<16x256xf32> -> vector<16x256xf32>
    %77 = vector.broadcast %2 : vector<1x256xf32> to vector<16x256xf32>
    %78 = arith.addf %76, %77 : vector<16x256xf32>
    %79 = vector.extract_strided_slice %78 {offsets = [0, 0], sizes = [16, 32], strides = [1, 1]} : vector<16x256xf32> to vector<16x32xf32>
    %cst_39 = arith.constant dense<0.000000e+00> : vector<16x32xf32>
    %80 = tpu.matmul %8, %79, %cst_39 {dimension_numbers = #tpu.dot_dimension_numbers<[1], [0], [0], [1], [0, 0, 1, 1], [], []>} : vector<16x16xf32>, vector<16x32xf32>, vector<16x32xf32> -> vector<16x32xf32>
    %81 = vector.extract_strided_slice %78 {offsets = [0, 128], sizes = [16, 32], strides = [1, 1]} : vector<16x256xf32> to vector<16x32xf32>
    %cst_40 = arith.constant dense<0.000000e+00> : vector<16x32xf32>
    %82 = tpu.matmul %16, %81, %cst_40 {dimension_numbers = #tpu.dot_dimension_numbers<[1], [0], [0], [1], [0, 0, 1, 1], [], []>} : vector<16x16xf32>, vector<16x32xf32>, vector<16x32xf32> -> vector<16x32xf32>
    %83 = vector.extract_strided_slice %78 {offsets = [0, 32], sizes = [16, 32], strides = [1, 1]} : vector<16x256xf32> to vector<16x32xf32>
    %cst_41 = arith.constant dense<0.000000e+00> : vector<16x32xf32>
    %84 = tpu.matmul %10, %83, %cst_41 {dimension_numbers = #tpu.dot_dimension_numbers<[1], [0], [0], [1], [0, 0, 1, 1], [], []>} : vector<16x16xf32>, vector<16x32xf32>, vector<16x32xf32> -> vector<16x32xf32>
    %85 = arith.addf %80, %84 : vector<16x32xf32>
    %86 = vector.extract_strided_slice %78 {offsets = [0, 160], sizes = [16, 32], strides = [1, 1]} : vector<16x256xf32> to vector<16x32xf32>
    %cst_42 = arith.constant dense<0.000000e+00> : vector<16x32xf32>
    %87 = tpu.matmul %18, %86, %cst_42 {dimension_numbers = #tpu.dot_dimension_numbers<[1], [0], [0], [1], [0, 0, 1, 1], [], []>} : vector<16x16xf32>, vector<16x32xf32>, vector<16x32xf32> -> vector<16x32xf32>
    %88 = arith.addf %82, %87 : vector<16x32xf32>
    %89 = vector.extract_strided_slice %78 {offsets = [0, 64], sizes = [16, 32], strides = [1, 1]} : vector<16x256xf32> to vector<16x32xf32>
    %cst_43 = arith.constant dense<0.000000e+00> : vector<16x32xf32>
    %90 = tpu.matmul %12, %89, %cst_43 {dimension_numbers = #tpu.dot_dimension_numbers<[1], [0], [0], [1], [0, 0, 1, 1], [], []>} : vector<16x16xf32>, vector<16x32xf32>, vector<16x32xf32> -> vector<16x32xf32>
    %91 = arith.addf %85, %90 : vector<16x32xf32>
    %92 = vector.extract_strided_slice %78 {offsets = [0, 192], sizes = [16, 32], strides = [1, 1]} : vector<16x256xf32> to vector<16x32xf32>
    %cst_44 = arith.constant dense<0.000000e+00> : vector<16x32xf32>
    %93 = tpu.matmul %20, %92, %cst_44 {dimension_numbers = #tpu.dot_dimension_numbers<[1], [0], [0], [1], [0, 0, 1, 1], [], []>} : vector<16x16xf32>, vector<16x32xf32>, vector<16x32xf32> -> vector<16x32xf32>
    %94 = arith.addf %88, %93 : vector<16x32xf32>
    %95 = vector.extract_strided_slice %78 {offsets = [0, 96], sizes = [16, 32], strides = [1, 1]} : vector<16x256xf32> to vector<16x32xf32>
    %cst_45 = arith.constant dense<0.000000e+00> : vector<16x32xf32>
    %96 = tpu.matmul %14, %95, %cst_45 {dimension_numbers = #tpu.dot_dimension_numbers<[1], [0], [0], [1], [0, 0, 1, 1], [], []>} : vector<16x16xf32>, vector<16x32xf32>, vector<16x32xf32> -> vector<16x32xf32>
    %97 = arith.addf %91, %96 : vector<16x32xf32>
    %98 = vector.extract_strided_slice %78 {offsets = [0, 224], sizes = [16, 32], strides = [1, 1]} : vector<16x256xf32> to vector<16x32xf32>
    %cst_46 = arith.constant dense<0.000000e+00> : vector<16x32xf32>
    %99 = tpu.matmul %22, %98, %cst_46 {dimension_numbers = #tpu.dot_dimension_numbers<[1], [0], [0], [1], [0, 0, 1, 1], [], []>} : vector<16x16xf32>, vector<16x32xf32>, vector<16x32xf32> -> vector<16x32xf32>
    %100 = arith.addf %94, %99 : vector<16x32xf32>
    %101 = tpu.concatenate %97, %100 in 1 : vector<16x32xf32>, vector<16x32xf32> -> vector<16x64xf32>
    %102 = tpu.concatenate %101, %75 in 1 : vector<16x64xf32>, vector<16x32xf32> -> vector<16x96xf32>
    %cst_47 = arith.constant dense<0.000000e+00> : vector<16x64xf32>
    %103 = tpu.matmul %102, %3, %cst_47 {dimension_numbers = #tpu.dot_dimension_numbers<[1], [0], [0], [1], [0, 0, 1, 1], [], []>} : vector<16x96xf32>, vector<96x64xf32>, vector<16x64xf32> -> vector<16x64xf32>
    %104 = vector.broadcast %4 : vector<1x64xf32> to vector<16x64xf32>
    %105 = arith.addf %103, %104 : vector<16x64xf32>
    %106 = vector.extract_strided_slice %105 {offsets = [0, 0], sizes = [16, 32], strides = [1, 1]} : vector<16x64xf32> to vector<16x32xf32>
    %107 = arith.negf %106 : vector<16x32xf32>
    %108 = math.exp %107 : vector<16x32xf32>
    %cst_48 = arith.constant 1.000000e+00 : f32
    %109 = vector.broadcast %cst_48 : f32 to vector<16x32xf32>
    %110 = arith.addf %109, %108 : vector<16x32xf32>
    %111 = arith.divf %109, %110 : vector<16x32xf32>
    %112 = vector.extract_strided_slice %105 {offsets = [0, 32], sizes = [16, 32], strides = [1, 1]} : vector<16x64xf32> to vector<16x32xf32>
    %113 = arith.negf %112 : vector<16x32xf32>
    %114 = math.exp %113 : vector<16x32xf32>
    %cst_49 = arith.constant 1.000000e+00 : f32
    %115 = vector.broadcast %cst_49 : f32 to vector<16x32xf32>
    %116 = arith.addf %115, %114 : vector<16x32xf32>
    %117 = arith.divf %115, %116 : vector<16x32xf32>
    %118 = arith.mulf %111, %75 : vector<16x32xf32>
    %119 = tpu.concatenate %101, %118 in 1 : vector<16x64xf32>, vector<16x32xf32> -> vector<16x96xf32>
    %cst_50 = arith.constant dense<0.000000e+00> : vector<16x32xf32>
    %120 = tpu.matmul %119, %5, %cst_50 {dimension_numbers = #tpu.dot_dimension_numbers<[1], [0], [0], [1], [0, 0, 1, 1], [], []>} : vector<16x96xf32>, vector<96x32xf32>, vector<16x32xf32> -> vector<16x32xf32>
    %121 = vector.broadcast %6 : vector<1x32xf32> to vector<16x32xf32>
    %122 = arith.addf %120, %121 : vector<16x32xf32>
    %123 = math.tanh %122 : vector<16x32xf32>
    %cst_51 = arith.constant 1.000000e+00 : f32
    %124 = vector.broadcast %cst_51 : f32 to vector<16x32xf32>
    %125 = arith.subf %124, %117 : vector<16x32xf32>
    %126 = arith.mulf %125, %75 : vector<16x32xf32>
    %127 = arith.mulf %117, %123 : vector<16x32xf32>
    %128 = arith.addf %126, %127 : vector<16x32xf32>
    %129 = tpu.concatenate %128, %0 in 1 : vector<16x32xf32>, vector<16x32xf32> -> vector<16x64xf32>
    %c248 = arith.constant 248 : index
    %c0_52 = arith.constant 0 : index
    %130 = vector.load %arg3[%c248, %c0_52] : memref<784x256xf32, #tpu.memory_space<vmem>>, vector<64x32xf32>
    %cst_53 = arith.constant dense<0.000000e+00> : vector<16x32xf32>
    %131 = tpu.matmul %129, %130, %cst_53 {dimension_numbers = #tpu.dot_dimension_numbers<[1], [0], [0], [1], [0, 0, 1, 1], [], []>} : vector<16x64xf32>, vector<64x32xf32>, vector<16x32xf32> -> vector<16x32xf32>
    %c312 = arith.constant 312 : index
    %c0_54 = arith.constant 0 : index
    %132 = vector.load %arg3[%c312, %c0_54] : memref<784x256xf32, #tpu.memory_space<vmem>>, vector<1x32xf32>
    %133 = vector.broadcast %132 : vector<1x32xf32> to vector<16x32xf32>
    %134 = arith.addf %131, %133 : vector<16x32xf32>
    %135 = math.tanh %134 : vector<16x32xf32>
    %c32_55 = arith.constant 32 : index
    %c0_56 = arith.constant 0 : index
    %136 = vector.load %arg2[%c32_55, %c0_56] : memref<48x1xi32, #tpu.memory_space<vmem>>, vector<2x1xi32>
    %137 = tpu.iota {dimensions = array<i32: 1>} : vector<2x16xi32>
    %138 = tpu.iota {dimensions = array<i32: 0>} : vector<2x16xi32>
    %c8_i32 = arith.constant 8 : i32
    %139 = vector.broadcast %c8_i32 : i32 to vector<2x16xi32>
    %140 = arith.muli %138, %139 : vector<2x16xi32>
    %141 = vector.broadcast %136 : vector<2x1xi32> to vector<2x16xi32>
    %142 = arith.addi %141, %140 : vector<2x16xi32>
    %143 = arith.cmpi eq, %137, %142 : vector<2x16xi32>
    %144 = arith.extui %143 : vector<2x16xi1> to vector<2x16xi32>
    %145 = arith.sitofp %144 : vector<2x16xi32> to vector<2x16xf32>
    %cst_57 = arith.constant dense<0.000000e+00> : vector<2x32xf32>
    %146 = tpu.matmul %145, %135, %cst_57 {dimension_numbers = #tpu.dot_dimension_numbers<[1], [0], [0], [1], [0, 0, 1, 1], [], []>} : vector<2x16xf32>, vector<16x32xf32>, vector<2x32xf32> -> vector<2x32xf32>
    %c0_58 = arith.constant 0 : index
    %c0_59 = arith.constant 0 : index
    %147 = vector.load %arg2[%c0_58, %c0_59] : memref<48x1xi32, #tpu.memory_space<vmem>>, vector<12x1xi32>
    %148 = tpu.iota {dimensions = array<i32: 1>} : vector<12x16xi32>
    %149 = vector.broadcast %147 : vector<12x1xi32> to vector<12x16xi32>
    %150 = arith.cmpi eq, %148, %149 : vector<12x16xi32>
    %151 = arith.extui %150 : vector<12x16xi1> to vector<12x16xi32>
    %152 = arith.sitofp %151 : vector<12x16xi32> to vector<12x16xf32>
    %c320 = arith.constant 320 : index
    %c0_60 = arith.constant 0 : index
    %153 = vector.load %arg3[%c320, %c0_60] : memref<784x256xf32, #tpu.memory_space<vmem>>, vector<16x96xf32>
    %cst_61 = arith.constant dense<0.000000e+00> : vector<12x96xf32>
    %154 = tpu.matmul %152, %153, %cst_61 {dimension_numbers = #tpu.dot_dimension_numbers<[1], [0], [0], [1], [0, 0, 1, 1], [], []>} : vector<12x16xf32>, vector<16x96xf32>, vector<12x96xf32> -> vector<12x96xf32>
    %c336 = arith.constant 336 : index
    %c0_62 = arith.constant 0 : index
    %155 = vector.load %arg3[%c336, %c0_62] : memref<784x256xf32, #tpu.memory_space<vmem>>, vector<32x96xf32>
    %c368 = arith.constant 368 : index
    %c0_63 = arith.constant 0 : index
    %156 = vector.load %arg3[%c368, %c0_63] : memref<784x256xf32, #tpu.memory_space<vmem>>, vector<1x96xf32>
    %cst_64 = arith.constant 0.000000e+00 : f32
    %157 = vector.broadcast %cst_64 : f32 to vector<2x32xf32>
    %158 = vector.extract_strided_slice %154 {offsets = [0, 0], sizes = [2, 96], strides = [1, 1]} : vector<12x96xf32> to vector<2x96xf32>
    %cst_65 = arith.constant dense<0.000000e+00> : vector<2x96xf32>
    %159 = tpu.matmul %157, %155, %cst_65 {dimension_numbers = #tpu.dot_dimension_numbers<[1], [0], [0], [1], [0, 0, 1, 1], [], []>} : vector<2x32xf32>, vector<32x96xf32>, vector<2x96xf32> -> vector<2x96xf32>
    %160 = vector.broadcast %156 : vector<1x96xf32> to vector<2x96xf32>
    %161 = arith.addf %159, %160 : vector<2x96xf32>
    %162 = vector.extract_strided_slice %158 {offsets = [0, 0], sizes = [2, 32], strides = [1, 1]} : vector<2x96xf32> to vector<2x32xf32>
    %163 = vector.extract_strided_slice %161 {offsets = [0, 0], sizes = [2, 32], strides = [1, 1]} : vector<2x96xf32> to vector<2x32xf32>
    %164 = arith.addf %162, %163 : vector<2x32xf32>
    %165 = arith.negf %164 : vector<2x32xf32>
    %166 = math.exp %165 : vector<2x32xf32>
    %cst_66 = arith.constant 1.000000e+00 : f32
    %167 = vector.broadcast %cst_66 : f32 to vector<2x32xf32>
    %168 = arith.addf %167, %166 : vector<2x32xf32>
    %169 = arith.divf %167, %168 : vector<2x32xf32>
    %170 = vector.extract_strided_slice %158 {offsets = [0, 32], sizes = [2, 32], strides = [1, 1]} : vector<2x96xf32> to vector<2x32xf32>
    %171 = vector.extract_strided_slice %161 {offsets = [0, 32], sizes = [2, 32], strides = [1, 1]} : vector<2x96xf32> to vector<2x32xf32>
    %172 = arith.addf %170, %171 : vector<2x32xf32>
    %173 = arith.negf %172 : vector<2x32xf32>
    %174 = math.exp %173 : vector<2x32xf32>
    %cst_67 = arith.constant 1.000000e+00 : f32
    %175 = vector.broadcast %cst_67 : f32 to vector<2x32xf32>
    %176 = arith.addf %175, %174 : vector<2x32xf32>
    %177 = arith.divf %175, %176 : vector<2x32xf32>
    %178 = vector.extract_strided_slice %158 {offsets = [0, 64], sizes = [2, 32], strides = [1, 1]} : vector<2x96xf32> to vector<2x32xf32>
    %179 = vector.extract_strided_slice %161 {offsets = [0, 64], sizes = [2, 32], strides = [1, 1]} : vector<2x96xf32> to vector<2x32xf32>
    %180 = arith.mulf %169, %179 : vector<2x32xf32>
    %181 = arith.addf %178, %180 : vector<2x32xf32>
    %182 = math.tanh %181 : vector<2x32xf32>
    %cst_68 = arith.constant 1.000000e+00 : f32
    %183 = vector.broadcast %cst_68 : f32 to vector<2x32xf32>
    %184 = arith.subf %183, %177 : vector<2x32xf32>
    %185 = arith.mulf %184, %182 : vector<2x32xf32>
    %186 = arith.mulf %177, %157 : vector<2x32xf32>
    %187 = arith.addf %185, %186 : vector<2x32xf32>
    %188 = vector.extract_strided_slice %154 {offsets = [2, 0], sizes = [2, 96], strides = [1, 1]} : vector<12x96xf32> to vector<2x96xf32>
    %cst_69 = arith.constant dense<0.000000e+00> : vector<2x96xf32>
    %189 = tpu.matmul %187, %155, %cst_69 {dimension_numbers = #tpu.dot_dimension_numbers<[1], [0], [0], [1], [0, 0, 1, 1], [], []>} : vector<2x32xf32>, vector<32x96xf32>, vector<2x96xf32> -> vector<2x96xf32>
    %190 = vector.broadcast %156 : vector<1x96xf32> to vector<2x96xf32>
    %191 = arith.addf %189, %190 : vector<2x96xf32>
    %192 = vector.extract_strided_slice %188 {offsets = [0, 0], sizes = [2, 32], strides = [1, 1]} : vector<2x96xf32> to vector<2x32xf32>
    %193 = vector.extract_strided_slice %191 {offsets = [0, 0], sizes = [2, 32], strides = [1, 1]} : vector<2x96xf32> to vector<2x32xf32>
    %194 = arith.addf %192, %193 : vector<2x32xf32>
    %195 = arith.negf %194 : vector<2x32xf32>
    %196 = math.exp %195 : vector<2x32xf32>
    %cst_70 = arith.constant 1.000000e+00 : f32
    %197 = vector.broadcast %cst_70 : f32 to vector<2x32xf32>
    %198 = arith.addf %197, %196 : vector<2x32xf32>
    %199 = arith.divf %197, %198 : vector<2x32xf32>
    %200 = vector.extract_strided_slice %188 {offsets = [0, 32], sizes = [2, 32], strides = [1, 1]} : vector<2x96xf32> to vector<2x32xf32>
    %201 = vector.extract_strided_slice %191 {offsets = [0, 32], sizes = [2, 32], strides = [1, 1]} : vector<2x96xf32> to vector<2x32xf32>
    %202 = arith.addf %200, %201 : vector<2x32xf32>
    %203 = arith.negf %202 : vector<2x32xf32>
    %204 = math.exp %203 : vector<2x32xf32>
    %cst_71 = arith.constant 1.000000e+00 : f32
    %205 = vector.broadcast %cst_71 : f32 to vector<2x32xf32>
    %206 = arith.addf %205, %204 : vector<2x32xf32>
    %207 = arith.divf %205, %206 : vector<2x32xf32>
    %208 = vector.extract_strided_slice %188 {offsets = [0, 64], sizes = [2, 32], strides = [1, 1]} : vector<2x96xf32> to vector<2x32xf32>
    %209 = vector.extract_strided_slice %191 {offsets = [0, 64], sizes = [2, 32], strides = [1, 1]} : vector<2x96xf32> to vector<2x32xf32>
    %210 = arith.mulf %199, %209 : vector<2x32xf32>
    %211 = arith.addf %208, %210 : vector<2x32xf32>
    %212 = math.tanh %211 : vector<2x32xf32>
    %cst_72 = arith.constant 1.000000e+00 : f32
    %213 = vector.broadcast %cst_72 : f32 to vector<2x32xf32>
    %214 = arith.subf %213, %207 : vector<2x32xf32>
    %215 = arith.mulf %214, %212 : vector<2x32xf32>
    %216 = arith.mulf %207, %187 : vector<2x32xf32>
    %217 = arith.addf %215, %216 : vector<2x32xf32>
    %218 = vector.extract_strided_slice %154 {offsets = [4, 0], sizes = [2, 96], strides = [1, 1]} : vector<12x96xf32> to vector<2x96xf32>
    %cst_73 = arith.constant dense<0.000000e+00> : vector<2x96xf32>
    %219 = tpu.matmul %217, %155, %cst_73 {dimension_numbers = #tpu.dot_dimension_numbers<[1], [0], [0], [1], [0, 0, 1, 1], [], []>} : vector<2x32xf32>, vector<32x96xf32>, vector<2x96xf32> -> vector<2x96xf32>
    %220 = vector.broadcast %156 : vector<1x96xf32> to vector<2x96xf32>
    %221 = arith.addf %219, %220 : vector<2x96xf32>
    %222 = vector.extract_strided_slice %218 {offsets = [0, 0], sizes = [2, 32], strides = [1, 1]} : vector<2x96xf32> to vector<2x32xf32>
    %223 = vector.extract_strided_slice %221 {offsets = [0, 0], sizes = [2, 32], strides = [1, 1]} : vector<2x96xf32> to vector<2x32xf32>
    %224 = arith.addf %222, %223 : vector<2x32xf32>
    %225 = arith.negf %224 : vector<2x32xf32>
    %226 = math.exp %225 : vector<2x32xf32>
    %cst_74 = arith.constant 1.000000e+00 : f32
    %227 = vector.broadcast %cst_74 : f32 to vector<2x32xf32>
    %228 = arith.addf %227, %226 : vector<2x32xf32>
    %229 = arith.divf %227, %228 : vector<2x32xf32>
    %230 = vector.extract_strided_slice %218 {offsets = [0, 32], sizes = [2, 32], strides = [1, 1]} : vector<2x96xf32> to vector<2x32xf32>
    %231 = vector.extract_strided_slice %221 {offsets = [0, 32], sizes = [2, 32], strides = [1, 1]} : vector<2x96xf32> to vector<2x32xf32>
    %232 = arith.addf %230, %231 : vector<2x32xf32>
    %233 = arith.negf %232 : vector<2x32xf32>
    %234 = math.exp %233 : vector<2x32xf32>
    %cst_75 = arith.constant 1.000000e+00 : f32
    %235 = vector.broadcast %cst_75 : f32 to vector<2x32xf32>
    %236 = arith.addf %235, %234 : vector<2x32xf32>
    %237 = arith.divf %235, %236 : vector<2x32xf32>
    %238 = vector.extract_strided_slice %218 {offsets = [0, 64], sizes = [2, 32], strides = [1, 1]} : vector<2x96xf32> to vector<2x32xf32>
    %239 = vector.extract_strided_slice %221 {offsets = [0, 64], sizes = [2, 32], strides = [1, 1]} : vector<2x96xf32> to vector<2x32xf32>
    %240 = arith.mulf %229, %239 : vector<2x32xf32>
    %241 = arith.addf %238, %240 : vector<2x32xf32>
    %242 = math.tanh %241 : vector<2x32xf32>
    %cst_76 = arith.constant 1.000000e+00 : f32
    %243 = vector.broadcast %cst_76 : f32 to vector<2x32xf32>
    %244 = arith.subf %243, %237 : vector<2x32xf32>
    %245 = arith.mulf %244, %242 : vector<2x32xf32>
    %246 = arith.mulf %237, %217 : vector<2x32xf32>
    %247 = arith.addf %245, %246 : vector<2x32xf32>
    %248 = vector.extract_strided_slice %154 {offsets = [6, 0], sizes = [2, 96], strides = [1, 1]} : vector<12x96xf32> to vector<2x96xf32>
    %cst_77 = arith.constant dense<0.000000e+00> : vector<2x96xf32>
    %249 = tpu.matmul %247, %155, %cst_77 {dimension_numbers = #tpu.dot_dimension_numbers<[1], [0], [0], [1], [0, 0, 1, 1], [], []>} : vector<2x32xf32>, vector<32x96xf32>, vector<2x96xf32> -> vector<2x96xf32>
    %250 = vector.broadcast %156 : vector<1x96xf32> to vector<2x96xf32>
    %251 = arith.addf %249, %250 : vector<2x96xf32>
    %252 = vector.extract_strided_slice %248 {offsets = [0, 0], sizes = [2, 32], strides = [1, 1]} : vector<2x96xf32> to vector<2x32xf32>
    %253 = vector.extract_strided_slice %251 {offsets = [0, 0], sizes = [2, 32], strides = [1, 1]} : vector<2x96xf32> to vector<2x32xf32>
    %254 = arith.addf %252, %253 : vector<2x32xf32>
    %255 = arith.negf %254 : vector<2x32xf32>
    %256 = math.exp %255 : vector<2x32xf32>
    %cst_78 = arith.constant 1.000000e+00 : f32
    %257 = vector.broadcast %cst_78 : f32 to vector<2x32xf32>
    %258 = arith.addf %257, %256 : vector<2x32xf32>
    %259 = arith.divf %257, %258 : vector<2x32xf32>
    %260 = vector.extract_strided_slice %248 {offsets = [0, 32], sizes = [2, 32], strides = [1, 1]} : vector<2x96xf32> to vector<2x32xf32>
    %261 = vector.extract_strided_slice %251 {offsets = [0, 32], sizes = [2, 32], strides = [1, 1]} : vector<2x96xf32> to vector<2x32xf32>
    %262 = arith.addf %260, %261 : vector<2x32xf32>
    %263 = arith.negf %262 : vector<2x32xf32>
    %264 = math.exp %263 : vector<2x32xf32>
    %cst_79 = arith.constant 1.000000e+00 : f32
    %265 = vector.broadcast %cst_79 : f32 to vector<2x32xf32>
    %266 = arith.addf %265, %264 : vector<2x32xf32>
    %267 = arith.divf %265, %266 : vector<2x32xf32>
    %268 = vector.extract_strided_slice %248 {offsets = [0, 64], sizes = [2, 32], strides = [1, 1]} : vector<2x96xf32> to vector<2x32xf32>
    %269 = vector.extract_strided_slice %251 {offsets = [0, 64], sizes = [2, 32], strides = [1, 1]} : vector<2x96xf32> to vector<2x32xf32>
    %270 = arith.mulf %259, %269 : vector<2x32xf32>
    %271 = arith.addf %268, %270 : vector<2x32xf32>
    %272 = math.tanh %271 : vector<2x32xf32>
    %cst_80 = arith.constant 1.000000e+00 : f32
    %273 = vector.broadcast %cst_80 : f32 to vector<2x32xf32>
    %274 = arith.subf %273, %267 : vector<2x32xf32>
    %275 = arith.mulf %274, %272 : vector<2x32xf32>
    %276 = arith.mulf %267, %247 : vector<2x32xf32>
    %277 = arith.addf %275, %276 : vector<2x32xf32>
    %278 = vector.extract_strided_slice %154 {offsets = [8, 0], sizes = [2, 96], strides = [1, 1]} : vector<12x96xf32> to vector<2x96xf32>
    %cst_81 = arith.constant dense<0.000000e+00> : vector<2x96xf32>
    %279 = tpu.matmul %277, %155, %cst_81 {dimension_numbers = #tpu.dot_dimension_numbers<[1], [0], [0], [1], [0, 0, 1, 1], [], []>} : vector<2x32xf32>, vector<32x96xf32>, vector<2x96xf32> -> vector<2x96xf32>
    %280 = vector.broadcast %156 : vector<1x96xf32> to vector<2x96xf32>
    %281 = arith.addf %279, %280 : vector<2x96xf32>
    %282 = vector.extract_strided_slice %278 {offsets = [0, 0], sizes = [2, 32], strides = [1, 1]} : vector<2x96xf32> to vector<2x32xf32>
    %283 = vector.extract_strided_slice %281 {offsets = [0, 0], sizes = [2, 32], strides = [1, 1]} : vector<2x96xf32> to vector<2x32xf32>
    %284 = arith.addf %282, %283 : vector<2x32xf32>
    %285 = arith.negf %284 : vector<2x32xf32>
    %286 = math.exp %285 : vector<2x32xf32>
    %cst_82 = arith.constant 1.000000e+00 : f32
    %287 = vector.broadcast %cst_82 : f32 to vector<2x32xf32>
    %288 = arith.addf %287, %286 : vector<2x32xf32>
    %289 = arith.divf %287, %288 : vector<2x32xf32>
    %290 = vector.extract_strided_slice %278 {offsets = [0, 32], sizes = [2, 32], strides = [1, 1]} : vector<2x96xf32> to vector<2x32xf32>
    %291 = vector.extract_strided_slice %281 {offsets = [0, 32], sizes = [2, 32], strides = [1, 1]} : vector<2x96xf32> to vector<2x32xf32>
    %292 = arith.addf %290, %291 : vector<2x32xf32>
    %293 = arith.negf %292 : vector<2x32xf32>
    %294 = math.exp %293 : vector<2x32xf32>
    %cst_83 = arith.constant 1.000000e+00 : f32
    %295 = vector.broadcast %cst_83 : f32 to vector<2x32xf32>
    %296 = arith.addf %295, %294 : vector<2x32xf32>
    %297 = arith.divf %295, %296 : vector<2x32xf32>
    %298 = vector.extract_strided_slice %278 {offsets = [0, 64], sizes = [2, 32], strides = [1, 1]} : vector<2x96xf32> to vector<2x32xf32>
    %299 = vector.extract_strided_slice %281 {offsets = [0, 64], sizes = [2, 32], strides = [1, 1]} : vector<2x96xf32> to vector<2x32xf32>
    %300 = arith.mulf %289, %299 : vector<2x32xf32>
    %301 = arith.addf %298, %300 : vector<2x32xf32>
    %302 = math.tanh %301 : vector<2x32xf32>
    %cst_84 = arith.constant 1.000000e+00 : f32
    %303 = vector.broadcast %cst_84 : f32 to vector<2x32xf32>
    %304 = arith.subf %303, %297 : vector<2x32xf32>
    %305 = arith.mulf %304, %302 : vector<2x32xf32>
    %306 = arith.mulf %297, %277 : vector<2x32xf32>
    %307 = arith.addf %305, %306 : vector<2x32xf32>
    %308 = vector.extract_strided_slice %154 {offsets = [10, 0], sizes = [2, 96], strides = [1, 1]} : vector<12x96xf32> to vector<2x96xf32>
    %cst_85 = arith.constant dense<0.000000e+00> : vector<2x96xf32>
    %309 = tpu.matmul %307, %155, %cst_85 {dimension_numbers = #tpu.dot_dimension_numbers<[1], [0], [0], [1], [0, 0, 1, 1], [], []>} : vector<2x32xf32>, vector<32x96xf32>, vector<2x96xf32> -> vector<2x96xf32>
    %310 = vector.broadcast %156 : vector<1x96xf32> to vector<2x96xf32>
    %311 = arith.addf %309, %310 : vector<2x96xf32>
    %312 = vector.extract_strided_slice %308 {offsets = [0, 0], sizes = [2, 32], strides = [1, 1]} : vector<2x96xf32> to vector<2x32xf32>
    %313 = vector.extract_strided_slice %311 {offsets = [0, 0], sizes = [2, 32], strides = [1, 1]} : vector<2x96xf32> to vector<2x32xf32>
    %314 = arith.addf %312, %313 : vector<2x32xf32>
    %315 = arith.negf %314 : vector<2x32xf32>
    %316 = math.exp %315 : vector<2x32xf32>
    %cst_86 = arith.constant 1.000000e+00 : f32
    %317 = vector.broadcast %cst_86 : f32 to vector<2x32xf32>
    %318 = arith.addf %317, %316 : vector<2x32xf32>
    %319 = arith.divf %317, %318 : vector<2x32xf32>
    %320 = vector.extract_strided_slice %308 {offsets = [0, 32], sizes = [2, 32], strides = [1, 1]} : vector<2x96xf32> to vector<2x32xf32>
    %321 = vector.extract_strided_slice %311 {offsets = [0, 32], sizes = [2, 32], strides = [1, 1]} : vector<2x96xf32> to vector<2x32xf32>
    %322 = arith.addf %320, %321 : vector<2x32xf32>
    %323 = arith.negf %322 : vector<2x32xf32>
    %324 = math.exp %323 : vector<2x32xf32>
    %cst_87 = arith.constant 1.000000e+00 : f32
    %325 = vector.broadcast %cst_87 : f32 to vector<2x32xf32>
    %326 = arith.addf %325, %324 : vector<2x32xf32>
    %327 = arith.divf %325, %326 : vector<2x32xf32>
    %328 = vector.extract_strided_slice %308 {offsets = [0, 64], sizes = [2, 32], strides = [1, 1]} : vector<2x96xf32> to vector<2x32xf32>
    %329 = vector.extract_strided_slice %311 {offsets = [0, 64], sizes = [2, 32], strides = [1, 1]} : vector<2x96xf32> to vector<2x32xf32>
    %330 = arith.mulf %319, %329 : vector<2x32xf32>
    %331 = arith.addf %328, %330 : vector<2x32xf32>
    %332 = math.tanh %331 : vector<2x32xf32>
    %cst_88 = arith.constant 1.000000e+00 : f32
    %333 = vector.broadcast %cst_88 : f32 to vector<2x32xf32>
    %334 = arith.subf %333, %327 : vector<2x32xf32>
    %335 = arith.mulf %334, %332 : vector<2x32xf32>
    %336 = arith.mulf %327, %307 : vector<2x32xf32>
    %337 = arith.addf %335, %336 : vector<2x32xf32>
    %c0_89 = arith.constant 0 : index
    %c0_90 = arith.constant 0 : index
    %338 = vector.load %arg6[%c0_89, %c0_90] : memref<2x32xf32, #tpu.memory_space<vmem>>, vector<2x32xf32>
    tpu.vector_store %arg6[%c0_89, %c0_90], %337 {strides = array<i32>} : memref<2x32xf32, #tpu.memory_space<vmem>>, vector<2x32xf32>,
    %339 = tpu.concatenate %146, %337 in 1 : vector<2x32xf32>, vector<2x32xf32> -> vector<2x64xf32>
    %c376 = arith.constant 376 : index
    %c0_91 = arith.constant 0 : index
    %340 = vector.load %arg3[%c376, %c0_91] : memref<784x256xf32, #tpu.memory_space<vmem>>, vector<64x64xf32>
    %cst_92 = arith.constant dense<0.000000e+00> : vector<2x64xf32>
    %341 = tpu.matmul %339, %340, %cst_92 {dimension_numbers = #tpu.dot_dimension_numbers<[1], [0], [0], [1], [0, 0, 1, 1], [], []>} : vector<2x64xf32>, vector<64x64xf32>, vector<2x64xf32> -> vector<2x64xf32>
    %c440 = arith.constant 440 : index
    %c0_93 = arith.constant 0 : index
    %342 = vector.load %arg3[%c440, %c0_93] : memref<784x256xf32, #tpu.memory_space<vmem>>, vector<1x64xf32>
    %343 = vector.broadcast %342 : vector<1x64xf32> to vector<2x64xf32>
    %344 = arith.addf %341, %343 : vector<2x64xf32>
    %cst_94 = arith.constant 0.000000e+00 : f32
    %345 = vector.broadcast %cst_94 : f32 to vector<2x64xf32>
    %346 = arith.maximumf %344, %345 : vector<2x64xf32>
    %c40_95 = arith.constant 40 : index
    %c0_96 = arith.constant 0 : index
    %347 = vector.load %arg2[%c40_95, %c0_96] : memref<48x1xi32, #tpu.memory_space<vmem>>, vector<2x1xi32>
    %c16 = arith.constant 16 : index
    %c0_97 = arith.constant 0 : index
    %348 = vector.load %arg2[%c16, %c0_97] : memref<48x1xi32, #tpu.memory_space<vmem>>, vector<16x1xi32>
    %349 = tpu.iota {dimensions = array<i32: 1>} : vector<16x16xi32>
    %350 = vector.broadcast %348 : vector<16x1xi32> to vector<16x16xi32>
    %351 = arith.cmpi eq, %349, %350 : vector<16x16xi32>
    %352 = arith.extui %351 : vector<16x16xi1> to vector<16x16xi32>
    %353 = arith.sitofp %352 : vector<16x16xi32> to vector<16x16xf32>
    %c448 = arith.constant 448 : index
    %c0_98 = arith.constant 0 : index
    %354 = vector.load %arg3[%c448, %c0_98] : memref<784x256xf32, #tpu.memory_space<vmem>>, vector<16x192xf32>
    %cst_99 = arith.constant dense<0.000000e+00> : vector<16x192xf32>
    %355 = tpu.matmul %353, %354, %cst_99 {dimension_numbers = #tpu.dot_dimension_numbers<[1], [0], [0], [1], [0, 0, 1, 1], [], []>} : vector<16x16xf32>, vector<16x192xf32>, vector<16x192xf32> -> vector<16x192xf32>
    %c464 = arith.constant 464 : index
    %c0_100 = arith.constant 0 : index
    %356 = vector.load %arg3[%c464, %c0_100] : memref<784x256xf32, #tpu.memory_space<vmem>>, vector<32x192xf32>
    %cst_101 = arith.constant dense<0.000000e+00> : vector<2x192xf32>
    %357 = tpu.matmul %337, %356, %cst_101 {dimension_numbers = #tpu.dot_dimension_numbers<[1], [0], [0], [1], [0, 0, 1, 1], [], []>} : vector<2x32xf32>, vector<32x192xf32>, vector<2x192xf32> -> vector<2x192xf32>
    %c496 = arith.constant 496 : index
    %c0_102 = arith.constant 0 : index
    %358 = vector.load %arg3[%c496, %c0_102] : memref<784x256xf32, #tpu.memory_space<vmem>>, vector<64x192xf32>
    %c560 = arith.constant 560 : index
    %c0_103 = arith.constant 0 : index
    %359 = vector.load %arg3[%c560, %c0_103] : memref<784x256xf32, #tpu.memory_space<vmem>>, vector<1x192xf32>
    %360 = vector.extract_strided_slice %355 {offsets = [0, 0], sizes = [2, 192], strides = [1, 1]} : vector<16x192xf32> to vector<2x192xf32>
    %361 = arith.addf %360, %357 : vector<2x192xf32>
    %cst_104 = arith.constant dense<0.000000e+00> : vector<2x192xf32>
    %362 = tpu.matmul %346, %358, %cst_104 {dimension_numbers = #tpu.dot_dimension_numbers<[1], [0], [0], [1], [0, 0, 1, 1], [], []>} : vector<2x64xf32>, vector<64x192xf32>, vector<2x192xf32> -> vector<2x192xf32>
    %363 = vector.broadcast %359 : vector<1x192xf32> to vector<2x192xf32>
    %364 = arith.addf %362, %363 : vector<2x192xf32>
    %365 = vector.extract_strided_slice %361 {offsets = [0, 0], sizes = [2, 64], strides = [1, 1]} : vector<2x192xf32> to vector<2x64xf32>
    %366 = vector.extract_strided_slice %364 {offsets = [0, 0], sizes = [2, 64], strides = [1, 1]} : vector<2x192xf32> to vector<2x64xf32>
    %367 = arith.addf %365, %366 : vector<2x64xf32>
    %368 = arith.negf %367 : vector<2x64xf32>
    %369 = math.exp %368 : vector<2x64xf32>
    %cst_105 = arith.constant 1.000000e+00 : f32
    %370 = vector.broadcast %cst_105 : f32 to vector<2x64xf32>
    %371 = arith.addf %370, %369 : vector<2x64xf32>
    %372 = arith.divf %370, %371 : vector<2x64xf32>
    %373 = vector.extract_strided_slice %361 {offsets = [0, 64], sizes = [2, 64], strides = [1, 1]} : vector<2x192xf32> to vector<2x64xf32>
    %374 = vector.extract_strided_slice %364 {offsets = [0, 64], sizes = [2, 64], strides = [1, 1]} : vector<2x192xf32> to vector<2x64xf32>
    %375 = arith.addf %373, %374 : vector<2x64xf32>
    %376 = arith.negf %375 : vector<2x64xf32>
    %377 = math.exp %376 : vector<2x64xf32>
    %cst_106 = arith.constant 1.000000e+00 : f32
    %378 = vector.broadcast %cst_106 : f32 to vector<2x64xf32>
    %379 = arith.addf %378, %377 : vector<2x64xf32>
    %380 = arith.divf %378, %379 : vector<2x64xf32>
    %381 = vector.extract_strided_slice %361 {offsets = [0, 128], sizes = [2, 64], strides = [1, 1]} : vector<2x192xf32> to vector<2x64xf32>
    %382 = vector.extract_strided_slice %364 {offsets = [0, 128], sizes = [2, 64], strides = [1, 1]} : vector<2x192xf32> to vector<2x64xf32>
    %383 = arith.mulf %372, %382 : vector<2x64xf32>
    %384 = arith.addf %381, %383 : vector<2x64xf32>
    %385 = math.tanh %384 : vector<2x64xf32>
    %cst_107 = arith.constant 1.000000e+00 : f32
    %386 = vector.broadcast %cst_107 : f32 to vector<2x64xf32>
    %387 = arith.subf %386, %380 : vector<2x64xf32>
    %388 = arith.mulf %387, %385 : vector<2x64xf32>
    %389 = arith.mulf %380, %346 : vector<2x64xf32>
    %390 = arith.addf %388, %389 : vector<2x64xf32>
    %c0_i32 = arith.constant 0 : i32
    %391 = vector.broadcast %c0_i32 : i32 to vector<2x1xi32>
    %392 = arith.cmpi sgt, %347, %391 : vector<2x1xi32>
    %393 = vector.shape_cast %392 : vector<2x1xi1> to vector<2x1xi1>
    %394 = vector.broadcast %393 : vector<2x1xi1> to vector<2x64xi1>
    %395 = arith.select %394, %390, %346 : vector<2x64xi1>, vector<2x64xf32>
    %cst_108 = arith.constant 0.000000e+00 : f32
    %396 = vector.shape_cast %392 : vector<2x1xi1> to vector<2x1xi1>
    %397 = vector.broadcast %396 : vector<2x1xi1> to vector<2x64xi1>
    %398 = vector.broadcast %cst_108 : f32 to vector<2x64xf32>
    %399 = arith.select %397, %390, %398 : vector<2x64xi1>, vector<2x64xf32>
    %400 = vector.extract_strided_slice %355 {offsets = [2, 0], sizes = [2, 192], strides = [1, 1]} : vector<16x192xf32> to vector<2x192xf32>
    %401 = arith.addf %400, %357 : vector<2x192xf32>
    %cst_109 = arith.constant dense<0.000000e+00> : vector<2x192xf32>
    %402 = tpu.matmul %395, %358, %cst_109 {dimension_numbers = #tpu.dot_dimension_numbers<[1], [0], [0], [1], [0, 0, 1, 1], [], []>} : vector<2x64xf32>, vector<64x192xf32>, vector<2x192xf32> -> vector<2x192xf32>
    %403 = vector.broadcast %359 : vector<1x192xf32> to vector<2x192xf32>
    %404 = arith.addf %402, %403 : vector<2x192xf32>
    %405 = vector.extract_strided_slice %401 {offsets = [0, 0], sizes = [2, 64], strides = [1, 1]} : vector<2x192xf32> to vector<2x64xf32>
    %406 = vector.extract_strided_slice %404 {offsets = [0, 0], sizes = [2, 64], strides = [1, 1]} : vector<2x192xf32> to vector<2x64xf32>
    %407 = arith.addf %405, %406 : vector<2x64xf32>
    %408 = arith.negf %407 : vector<2x64xf32>
    %409 = math.exp %408 : vector<2x64xf32>
    %cst_110 = arith.constant 1.000000e+00 : f32
    %410 = vector.broadcast %cst_110 : f32 to vector<2x64xf32>
    %411 = arith.addf %410, %409 : vector<2x64xf32>
    %412 = arith.divf %410, %411 : vector<2x64xf32>
    %413 = vector.extract_strided_slice %401 {offsets = [0, 64], sizes = [2, 64], strides = [1, 1]} : vector<2x192xf32> to vector<2x64xf32>
    %414 = vector.extract_strided_slice %404 {offsets = [0, 64], sizes = [2, 64], strides = [1, 1]} : vector<2x192xf32> to vector<2x64xf32>
    %415 = arith.addf %413, %414 : vector<2x64xf32>
    %416 = arith.negf %415 : vector<2x64xf32>
    %417 = math.exp %416 : vector<2x64xf32>
    %cst_111 = arith.constant 1.000000e+00 : f32
    %418 = vector.broadcast %cst_111 : f32 to vector<2x64xf32>
    %419 = arith.addf %418, %417 : vector<2x64xf32>
    %420 = arith.divf %418, %419 : vector<2x64xf32>
    %421 = vector.extract_strided_slice %401 {offsets = [0, 128], sizes = [2, 64], strides = [1, 1]} : vector<2x192xf32> to vector<2x64xf32>
    %422 = vector.extract_strided_slice %404 {offsets = [0, 128], sizes = [2, 64], strides = [1, 1]} : vector<2x192xf32> to vector<2x64xf32>
    %423 = arith.mulf %412, %422 : vector<2x64xf32>
    %424 = arith.addf %421, %423 : vector<2x64xf32>
    %425 = math.tanh %424 : vector<2x64xf32>
    %cst_112 = arith.constant 1.000000e+00 : f32
    %426 = vector.broadcast %cst_112 : f32 to vector<2x64xf32>
    %427 = arith.subf %426, %420 : vector<2x64xf32>
    %428 = arith.mulf %427, %425 : vector<2x64xf32>
    %429 = arith.mulf %420, %395 : vector<2x64xf32>
    %430 = arith.addf %428, %429 : vector<2x64xf32>
    %c1_i32 = arith.constant 1 : i32
    %431 = vector.broadcast %c1_i32 : i32 to vector<2x1xi32>
    %432 = arith.cmpi sgt, %347, %431 : vector<2x1xi32>
    %433 = vector.shape_cast %432 : vector<2x1xi1> to vector<2x1xi1>
    %434 = vector.broadcast %433 : vector<2x1xi1> to vector<2x64xi1>
    %435 = arith.select %434, %430, %395 : vector<2x64xi1>, vector<2x64xf32>
    %cst_113 = arith.constant 0.000000e+00 : f32
    %436 = vector.shape_cast %432 : vector<2x1xi1> to vector<2x1xi1>
    %437 = vector.broadcast %436 : vector<2x1xi1> to vector<2x64xi1>
    %438 = vector.broadcast %cst_113 : f32 to vector<2x64xf32>
    %439 = arith.select %437, %430, %438 : vector<2x64xi1>, vector<2x64xf32>
    %440 = vector.extract_strided_slice %355 {offsets = [4, 0], sizes = [2, 192], strides = [1, 1]} : vector<16x192xf32> to vector<2x192xf32>
    %441 = arith.addf %440, %357 : vector<2x192xf32>
    %cst_114 = arith.constant dense<0.000000e+00> : vector<2x192xf32>
    %442 = tpu.matmul %435, %358, %cst_114 {dimension_numbers = #tpu.dot_dimension_numbers<[1], [0], [0], [1], [0, 0, 1, 1], [], []>} : vector<2x64xf32>, vector<64x192xf32>, vector<2x192xf32> -> vector<2x192xf32>
    %443 = vector.broadcast %359 : vector<1x192xf32> to vector<2x192xf32>
    %444 = arith.addf %442, %443 : vector<2x192xf32>
    %445 = vector.extract_strided_slice %441 {offsets = [0, 0], sizes = [2, 64], strides = [1, 1]} : vector<2x192xf32> to vector<2x64xf32>
    %446 = vector.extract_strided_slice %444 {offsets = [0, 0], sizes = [2, 64], strides = [1, 1]} : vector<2x192xf32> to vector<2x64xf32>
    %447 = arith.addf %445, %446 : vector<2x64xf32>
    %448 = arith.negf %447 : vector<2x64xf32>
    %449 = math.exp %448 : vector<2x64xf32>
    %cst_115 = arith.constant 1.000000e+00 : f32
    %450 = vector.broadcast %cst_115 : f32 to vector<2x64xf32>
    %451 = arith.addf %450, %449 : vector<2x64xf32>
    %452 = arith.divf %450, %451 : vector<2x64xf32>
    %453 = vector.extract_strided_slice %441 {offsets = [0, 64], sizes = [2, 64], strides = [1, 1]} : vector<2x192xf32> to vector<2x64xf32>
    %454 = vector.extract_strided_slice %444 {offsets = [0, 64], sizes = [2, 64], strides = [1, 1]} : vector<2x192xf32> to vector<2x64xf32>
    %455 = arith.addf %453, %454 : vector<2x64xf32>
    %456 = arith.negf %455 : vector<2x64xf32>
    %457 = math.exp %456 : vector<2x64xf32>
    %cst_116 = arith.constant 1.000000e+00 : f32
    %458 = vector.broadcast %cst_116 : f32 to vector<2x64xf32>
    %459 = arith.addf %458, %457 : vector<2x64xf32>
    %460 = arith.divf %458, %459 : vector<2x64xf32>
    %461 = vector.extract_strided_slice %441 {offsets = [0, 128], sizes = [2, 64], strides = [1, 1]} : vector<2x192xf32> to vector<2x64xf32>
    %462 = vector.extract_strided_slice %444 {offsets = [0, 128], sizes = [2, 64], strides = [1, 1]} : vector<2x192xf32> to vector<2x64xf32>
    %463 = arith.mulf %452, %462 : vector<2x64xf32>
    %464 = arith.addf %461, %463 : vector<2x64xf32>
    %465 = math.tanh %464 : vector<2x64xf32>
    %cst_117 = arith.constant 1.000000e+00 : f32
    %466 = vector.broadcast %cst_117 : f32 to vector<2x64xf32>
    %467 = arith.subf %466, %460 : vector<2x64xf32>
    %468 = arith.mulf %467, %465 : vector<2x64xf32>
    %469 = arith.mulf %460, %435 : vector<2x64xf32>
    %470 = arith.addf %468, %469 : vector<2x64xf32>
    %c2_i32 = arith.constant 2 : i32
    %471 = vector.broadcast %c2_i32 : i32 to vector<2x1xi32>
    %472 = arith.cmpi sgt, %347, %471 : vector<2x1xi32>
    %473 = vector.shape_cast %472 : vector<2x1xi1> to vector<2x1xi1>
    %474 = vector.broadcast %473 : vector<2x1xi1> to vector<2x64xi1>
    %475 = arith.select %474, %470, %435 : vector<2x64xi1>, vector<2x64xf32>
    %cst_118 = arith.constant 0.000000e+00 : f32
    %476 = vector.shape_cast %472 : vector<2x1xi1> to vector<2x1xi1>
    %477 = vector.broadcast %476 : vector<2x1xi1> to vector<2x64xi1>
    %478 = vector.broadcast %cst_118 : f32 to vector<2x64xf32>
    %479 = arith.select %477, %470, %478 : vector<2x64xi1>, vector<2x64xf32>
    %480 = vector.extract_strided_slice %355 {offsets = [6, 0], sizes = [2, 192], strides = [1, 1]} : vector<16x192xf32> to vector<2x192xf32>
    %481 = arith.addf %480, %357 : vector<2x192xf32>
    %cst_119 = arith.constant dense<0.000000e+00> : vector<2x192xf32>
    %482 = tpu.matmul %475, %358, %cst_119 {dimension_numbers = #tpu.dot_dimension_numbers<[1], [0], [0], [1], [0, 0, 1, 1], [], []>} : vector<2x64xf32>, vector<64x192xf32>, vector<2x192xf32> -> vector<2x192xf32>
    %483 = vector.broadcast %359 : vector<1x192xf32> to vector<2x192xf32>
    %484 = arith.addf %482, %483 : vector<2x192xf32>
    %485 = vector.extract_strided_slice %481 {offsets = [0, 0], sizes = [2, 64], strides = [1, 1]} : vector<2x192xf32> to vector<2x64xf32>
    %486 = vector.extract_strided_slice %484 {offsets = [0, 0], sizes = [2, 64], strides = [1, 1]} : vector<2x192xf32> to vector<2x64xf32>
    %487 = arith.addf %485, %486 : vector<2x64xf32>
    %488 = arith.negf %487 : vector<2x64xf32>
    %489 = math.exp %488 : vector<2x64xf32>
    %cst_120 = arith.constant 1.000000e+00 : f32
    %490 = vector.broadcast %cst_120 : f32 to vector<2x64xf32>
    %491 = arith.addf %490, %489 : vector<2x64xf32>
    %492 = arith.divf %490, %491 : vector<2x64xf32>
    %493 = vector.extract_strided_slice %481 {offsets = [0, 64], sizes = [2, 64], strides = [1, 1]} : vector<2x192xf32> to vector<2x64xf32>
    %494 = vector.extract_strided_slice %484 {offsets = [0, 64], sizes = [2, 64], strides = [1, 1]} : vector<2x192xf32> to vector<2x64xf32>
    %495 = arith.addf %493, %494 : vector<2x64xf32>
    %496 = arith.negf %495 : vector<2x64xf32>
    %497 = math.exp %496 : vector<2x64xf32>
    %cst_121 = arith.constant 1.000000e+00 : f32
    %498 = vector.broadcast %cst_121 : f32 to vector<2x64xf32>
    %499 = arith.addf %498, %497 : vector<2x64xf32>
    %500 = arith.divf %498, %499 : vector<2x64xf32>
    %501 = vector.extract_strided_slice %481 {offsets = [0, 128], sizes = [2, 64], strides = [1, 1]} : vector<2x192xf32> to vector<2x64xf32>
    %502 = vector.extract_strided_slice %484 {offsets = [0, 128], sizes = [2, 64], strides = [1, 1]} : vector<2x192xf32> to vector<2x64xf32>
    %503 = arith.mulf %492, %502 : vector<2x64xf32>
    %504 = arith.addf %501, %503 : vector<2x64xf32>
    %505 = math.tanh %504 : vector<2x64xf32>
    %cst_122 = arith.constant 1.000000e+00 : f32
    %506 = vector.broadcast %cst_122 : f32 to vector<2x64xf32>
    %507 = arith.subf %506, %500 : vector<2x64xf32>
    %508 = arith.mulf %507, %505 : vector<2x64xf32>
    %509 = arith.mulf %500, %475 : vector<2x64xf32>
    %510 = arith.addf %508, %509 : vector<2x64xf32>
    %c3_i32 = arith.constant 3 : i32
    %511 = vector.broadcast %c3_i32 : i32 to vector<2x1xi32>
    %512 = arith.cmpi sgt, %347, %511 : vector<2x1xi32>
    %513 = vector.shape_cast %512 : vector<2x1xi1> to vector<2x1xi1>
    %514 = vector.broadcast %513 : vector<2x1xi1> to vector<2x64xi1>
    %515 = arith.select %514, %510, %475 : vector<2x64xi1>, vector<2x64xf32>
    %cst_123 = arith.constant 0.000000e+00 : f32
    %516 = vector.shape_cast %512 : vector<2x1xi1> to vector<2x1xi1>
    %517 = vector.broadcast %516 : vector<2x1xi1> to vector<2x64xi1>
    %518 = vector.broadcast %cst_123 : f32 to vector<2x64xf32>
    %519 = arith.select %517, %510, %518 : vector<2x64xi1>, vector<2x64xf32>
    %520 = vector.extract_strided_slice %355 {offsets = [8, 0], sizes = [2, 192], strides = [1, 1]} : vector<16x192xf32> to vector<2x192xf32>
    %521 = arith.addf %520, %357 : vector<2x192xf32>
    %cst_124 = arith.constant dense<0.000000e+00> : vector<2x192xf32>
    %522 = tpu.matmul %515, %358, %cst_124 {dimension_numbers = #tpu.dot_dimension_numbers<[1], [0], [0], [1], [0, 0, 1, 1], [], []>} : vector<2x64xf32>, vector<64x192xf32>, vector<2x192xf32> -> vector<2x192xf32>
    %523 = vector.broadcast %359 : vector<1x192xf32> to vector<2x192xf32>
    %524 = arith.addf %522, %523 : vector<2x192xf32>
    %525 = vector.extract_strided_slice %521 {offsets = [0, 0], sizes = [2, 64], strides = [1, 1]} : vector<2x192xf32> to vector<2x64xf32>
    %526 = vector.extract_strided_slice %524 {offsets = [0, 0], sizes = [2, 64], strides = [1, 1]} : vector<2x192xf32> to vector<2x64xf32>
    %527 = arith.addf %525, %526 : vector<2x64xf32>
    %528 = arith.negf %527 : vector<2x64xf32>
    %529 = math.exp %528 : vector<2x64xf32>
    %cst_125 = arith.constant 1.000000e+00 : f32
    %530 = vector.broadcast %cst_125 : f32 to vector<2x64xf32>
    %531 = arith.addf %530, %529 : vector<2x64xf32>
    %532 = arith.divf %530, %531 : vector<2x64xf32>
    %533 = vector.extract_strided_slice %521 {offsets = [0, 64], sizes = [2, 64], strides = [1, 1]} : vector<2x192xf32> to vector<2x64xf32>
    %534 = vector.extract_strided_slice %524 {offsets = [0, 64], sizes = [2, 64], strides = [1, 1]} : vector<2x192xf32> to vector<2x64xf32>
    %535 = arith.addf %533, %534 : vector<2x64xf32>
    %536 = arith.negf %535 : vector<2x64xf32>
    %537 = math.exp %536 : vector<2x64xf32>
    %cst_126 = arith.constant 1.000000e+00 : f32
    %538 = vector.broadcast %cst_126 : f32 to vector<2x64xf32>
    %539 = arith.addf %538, %537 : vector<2x64xf32>
    %540 = arith.divf %538, %539 : vector<2x64xf32>
    %541 = vector.extract_strided_slice %521 {offsets = [0, 128], sizes = [2, 64], strides = [1, 1]} : vector<2x192xf32> to vector<2x64xf32>
    %542 = vector.extract_strided_slice %524 {offsets = [0, 128], sizes = [2, 64], strides = [1, 1]} : vector<2x192xf32> to vector<2x64xf32>
    %543 = arith.mulf %532, %542 : vector<2x64xf32>
    %544 = arith.addf %541, %543 : vector<2x64xf32>
    %545 = math.tanh %544 : vector<2x64xf32>
    %cst_127 = arith.constant 1.000000e+00 : f32
    %546 = vector.broadcast %cst_127 : f32 to vector<2x64xf32>
    %547 = arith.subf %546, %540 : vector<2x64xf32>
    %548 = arith.mulf %547, %545 : vector<2x64xf32>
    %549 = arith.mulf %540, %515 : vector<2x64xf32>
    %550 = arith.addf %548, %549 : vector<2x64xf32>
    %c4_i32 = arith.constant 4 : i32
    %551 = vector.broadcast %c4_i32 : i32 to vector<2x1xi32>
    %552 = arith.cmpi sgt, %347, %551 : vector<2x1xi32>
    %553 = vector.shape_cast %552 : vector<2x1xi1> to vector<2x1xi1>
    %554 = vector.broadcast %553 : vector<2x1xi1> to vector<2x64xi1>
    %555 = arith.select %554, %550, %515 : vector<2x64xi1>, vector<2x64xf32>
    %cst_128 = arith.constant 0.000000e+00 : f32
    %556 = vector.shape_cast %552 : vector<2x1xi1> to vector<2x1xi1>
    %557 = vector.broadcast %556 : vector<2x1xi1> to vector<2x64xi1>
    %558 = vector.broadcast %cst_128 : f32 to vector<2x64xf32>
    %559 = arith.select %557, %550, %558 : vector<2x64xi1>, vector<2x64xf32>
    %560 = vector.extract_strided_slice %355 {offsets = [10, 0], sizes = [2, 192], strides = [1, 1]} : vector<16x192xf32> to vector<2x192xf32>
    %561 = arith.addf %560, %357 : vector<2x192xf32>
    %cst_129 = arith.constant dense<0.000000e+00> : vector<2x192xf32>
    %562 = tpu.matmul %555, %358, %cst_129 {dimension_numbers = #tpu.dot_dimension_numbers<[1], [0], [0], [1], [0, 0, 1, 1], [], []>} : vector<2x64xf32>, vector<64x192xf32>, vector<2x192xf32> -> vector<2x192xf32>
    %563 = vector.broadcast %359 : vector<1x192xf32> to vector<2x192xf32>
    %564 = arith.addf %562, %563 : vector<2x192xf32>
    %565 = vector.extract_strided_slice %561 {offsets = [0, 0], sizes = [2, 64], strides = [1, 1]} : vector<2x192xf32> to vector<2x64xf32>
    %566 = vector.extract_strided_slice %564 {offsets = [0, 0], sizes = [2, 64], strides = [1, 1]} : vector<2x192xf32> to vector<2x64xf32>
    %567 = arith.addf %565, %566 : vector<2x64xf32>
    %568 = arith.negf %567 : vector<2x64xf32>
    %569 = math.exp %568 : vector<2x64xf32>
    %cst_130 = arith.constant 1.000000e+00 : f32
    %570 = vector.broadcast %cst_130 : f32 to vector<2x64xf32>
    %571 = arith.addf %570, %569 : vector<2x64xf32>
    %572 = arith.divf %570, %571 : vector<2x64xf32>
    %573 = vector.extract_strided_slice %561 {offsets = [0, 64], sizes = [2, 64], strides = [1, 1]} : vector<2x192xf32> to vector<2x64xf32>
    %574 = vector.extract_strided_slice %564 {offsets = [0, 64], sizes = [2, 64], strides = [1, 1]} : vector<2x192xf32> to vector<2x64xf32>
    %575 = arith.addf %573, %574 : vector<2x64xf32>
    %576 = arith.negf %575 : vector<2x64xf32>
    %577 = math.exp %576 : vector<2x64xf32>
    %cst_131 = arith.constant 1.000000e+00 : f32
    %578 = vector.broadcast %cst_131 : f32 to vector<2x64xf32>
    %579 = arith.addf %578, %577 : vector<2x64xf32>
    %580 = arith.divf %578, %579 : vector<2x64xf32>
    %581 = vector.extract_strided_slice %561 {offsets = [0, 128], sizes = [2, 64], strides = [1, 1]} : vector<2x192xf32> to vector<2x64xf32>
    %582 = vector.extract_strided_slice %564 {offsets = [0, 128], sizes = [2, 64], strides = [1, 1]} : vector<2x192xf32> to vector<2x64xf32>
    %583 = arith.mulf %572, %582 : vector<2x64xf32>
    %584 = arith.addf %581, %583 : vector<2x64xf32>
    %585 = math.tanh %584 : vector<2x64xf32>
    %cst_132 = arith.constant 1.000000e+00 : f32
    %586 = vector.broadcast %cst_132 : f32 to vector<2x64xf32>
    %587 = arith.subf %586, %580 : vector<2x64xf32>
    %588 = arith.mulf %587, %585 : vector<2x64xf32>
    %589 = arith.mulf %580, %555 : vector<2x64xf32>
    %590 = arith.addf %588, %589 : vector<2x64xf32>
    %c5_i32 = arith.constant 5 : i32
    %591 = vector.broadcast %c5_i32 : i32 to vector<2x1xi32>
    %592 = arith.cmpi sgt, %347, %591 : vector<2x1xi32>
    %593 = vector.shape_cast %592 : vector<2x1xi1> to vector<2x1xi1>
    %594 = vector.broadcast %593 : vector<2x1xi1> to vector<2x64xi1>
    %595 = arith.select %594, %590, %555 : vector<2x64xi1>, vector<2x64xf32>
    %cst_133 = arith.constant 0.000000e+00 : f32
    %596 = vector.shape_cast %592 : vector<2x1xi1> to vector<2x1xi1>
    %597 = vector.broadcast %596 : vector<2x1xi1> to vector<2x64xi1>
    %598 = vector.broadcast %cst_133 : f32 to vector<2x64xf32>
    %599 = arith.select %597, %590, %598 : vector<2x64xi1>, vector<2x64xf32>
    %600 = vector.extract_strided_slice %355 {offsets = [12, 0], sizes = [2, 192], strides = [1, 1]} : vector<16x192xf32> to vector<2x192xf32>
    %601 = arith.addf %600, %357 : vector<2x192xf32>
    %cst_134 = arith.constant dense<0.000000e+00> : vector<2x192xf32>
    %602 = tpu.matmul %595, %358, %cst_134 {dimension_numbers = #tpu.dot_dimension_numbers<[1], [0], [0], [1], [0, 0, 1, 1], [], []>} : vector<2x64xf32>, vector<64x192xf32>, vector<2x192xf32> -> vector<2x192xf32>
    %603 = vector.broadcast %359 : vector<1x192xf32> to vector<2x192xf32>
    %604 = arith.addf %602, %603 : vector<2x192xf32>
    %605 = vector.extract_strided_slice %601 {offsets = [0, 0], sizes = [2, 64], strides = [1, 1]} : vector<2x192xf32> to vector<2x64xf32>
    %606 = vector.extract_strided_slice %604 {offsets = [0, 0], sizes = [2, 64], strides = [1, 1]} : vector<2x192xf32> to vector<2x64xf32>
    %607 = arith.addf %605, %606 : vector<2x64xf32>
    %608 = arith.negf %607 : vector<2x64xf32>
    %609 = math.exp %608 : vector<2x64xf32>
    %cst_135 = arith.constant 1.000000e+00 : f32
    %610 = vector.broadcast %cst_135 : f32 to vector<2x64xf32>
    %611 = arith.addf %610, %609 : vector<2x64xf32>
    %612 = arith.divf %610, %611 : vector<2x64xf32>
    %613 = vector.extract_strided_slice %601 {offsets = [0, 64], sizes = [2, 64], strides = [1, 1]} : vector<2x192xf32> to vector<2x64xf32>
    %614 = vector.extract_strided_slice %604 {offsets = [0, 64], sizes = [2, 64], strides = [1, 1]} : vector<2x192xf32> to vector<2x64xf32>
    %615 = arith.addf %613, %614 : vector<2x64xf32>
    %616 = arith.negf %615 : vector<2x64xf32>
    %617 = math.exp %616 : vector<2x64xf32>
    %cst_136 = arith.constant 1.000000e+00 : f32
    %618 = vector.broadcast %cst_136 : f32 to vector<2x64xf32>
    %619 = arith.addf %618, %617 : vector<2x64xf32>
    %620 = arith.divf %618, %619 : vector<2x64xf32>
    %621 = vector.extract_strided_slice %601 {offsets = [0, 128], sizes = [2, 64], strides = [1, 1]} : vector<2x192xf32> to vector<2x64xf32>
    %622 = vector.extract_strided_slice %604 {offsets = [0, 128], sizes = [2, 64], strides = [1, 1]} : vector<2x192xf32> to vector<2x64xf32>
    %623 = arith.mulf %612, %622 : vector<2x64xf32>
    %624 = arith.addf %621, %623 : vector<2x64xf32>
    %625 = math.tanh %624 : vector<2x64xf32>
    %cst_137 = arith.constant 1.000000e+00 : f32
    %626 = vector.broadcast %cst_137 : f32 to vector<2x64xf32>
    %627 = arith.subf %626, %620 : vector<2x64xf32>
    %628 = arith.mulf %627, %625 : vector<2x64xf32>
    %629 = arith.mulf %620, %595 : vector<2x64xf32>
    %630 = arith.addf %628, %629 : vector<2x64xf32>
    %c6_i32 = arith.constant 6 : i32
    %631 = vector.broadcast %c6_i32 : i32 to vector<2x1xi32>
    %632 = arith.cmpi sgt, %347, %631 : vector<2x1xi32>
    %633 = vector.shape_cast %632 : vector<2x1xi1> to vector<2x1xi1>
    %634 = vector.broadcast %633 : vector<2x1xi1> to vector<2x64xi1>
    %635 = arith.select %634, %630, %595 : vector<2x64xi1>, vector<2x64xf32>
    %cst_138 = arith.constant 0.000000e+00 : f32
    %636 = vector.shape_cast %632 : vector<2x1xi1> to vector<2x1xi1>
    %637 = vector.broadcast %636 : vector<2x1xi1> to vector<2x64xi1>
    %638 = vector.broadcast %cst_138 : f32 to vector<2x64xf32>
    %639 = arith.select %637, %630, %638 : vector<2x64xi1>, vector<2x64xf32>
    %640 = vector.extract_strided_slice %355 {offsets = [14, 0], sizes = [2, 192], strides = [1, 1]} : vector<16x192xf32> to vector<2x192xf32>
    %641 = arith.addf %640, %357 : vector<2x192xf32>
    %cst_139 = arith.constant dense<0.000000e+00> : vector<2x192xf32>
    %642 = tpu.matmul %635, %358, %cst_139 {dimension_numbers = #tpu.dot_dimension_numbers<[1], [0], [0], [1], [0, 0, 1, 1], [], []>} : vector<2x64xf32>, vector<64x192xf32>, vector<2x192xf32> -> vector<2x192xf32>
    %643 = vector.broadcast %359 : vector<1x192xf32> to vector<2x192xf32>
    %644 = arith.addf %642, %643 : vector<2x192xf32>
    %645 = vector.extract_strided_slice %641 {offsets = [0, 0], sizes = [2, 64], strides = [1, 1]} : vector<2x192xf32> to vector<2x64xf32>
    %646 = vector.extract_strided_slice %644 {offsets = [0, 0], sizes = [2, 64], strides = [1, 1]} : vector<2x192xf32> to vector<2x64xf32>
    %647 = arith.addf %645, %646 : vector<2x64xf32>
    %648 = arith.negf %647 : vector<2x64xf32>
    %649 = math.exp %648 : vector<2x64xf32>
    %cst_140 = arith.constant 1.000000e+00 : f32
    %650 = vector.broadcast %cst_140 : f32 to vector<2x64xf32>
    %651 = arith.addf %650, %649 : vector<2x64xf32>
    %652 = arith.divf %650, %651 : vector<2x64xf32>
    %653 = vector.extract_strided_slice %641 {offsets = [0, 64], sizes = [2, 64], strides = [1, 1]} : vector<2x192xf32> to vector<2x64xf32>
    %654 = vector.extract_strided_slice %644 {offsets = [0, 64], sizes = [2, 64], strides = [1, 1]} : vector<2x192xf32> to vector<2x64xf32>
    %655 = arith.addf %653, %654 : vector<2x64xf32>
    %656 = arith.negf %655 : vector<2x64xf32>
    %657 = math.exp %656 : vector<2x64xf32>
    %cst_141 = arith.constant 1.000000e+00 : f32
    %658 = vector.broadcast %cst_141 : f32 to vector<2x64xf32>
    %659 = arith.addf %658, %657 : vector<2x64xf32>
    %660 = arith.divf %658, %659 : vector<2x64xf32>
    %661 = vector.extract_strided_slice %641 {offsets = [0, 128], sizes = [2, 64], strides = [1, 1]} : vector<2x192xf32> to vector<2x64xf32>
    %662 = vector.extract_strided_slice %644 {offsets = [0, 128], sizes = [2, 64], strides = [1, 1]} : vector<2x192xf32> to vector<2x64xf32>
    %663 = arith.mulf %652, %662 : vector<2x64xf32>
    %664 = arith.addf %661, %663 : vector<2x64xf32>
    %665 = math.tanh %664 : vector<2x64xf32>
    %cst_142 = arith.constant 1.000000e+00 : f32
    %666 = vector.broadcast %cst_142 : f32 to vector<2x64xf32>
    %667 = arith.subf %666, %660 : vector<2x64xf32>
    %668 = arith.mulf %667, %665 : vector<2x64xf32>
    %669 = arith.mulf %660, %635 : vector<2x64xf32>
    %670 = arith.addf %668, %669 : vector<2x64xf32>
    %c7_i32 = arith.constant 7 : i32
    %671 = vector.broadcast %c7_i32 : i32 to vector<2x1xi32>
    %672 = arith.cmpi sgt, %347, %671 : vector<2x1xi32>
    %673 = vector.shape_cast %672 : vector<2x1xi1> to vector<2x1xi1>
    %674 = vector.broadcast %673 : vector<2x1xi1> to vector<2x64xi1>
    %675 = arith.select %674, %670, %635 : vector<2x64xi1>, vector<2x64xf32>
    %cst_143 = arith.constant 0.000000e+00 : f32
    %676 = vector.shape_cast %672 : vector<2x1xi1> to vector<2x1xi1>
    %677 = vector.broadcast %676 : vector<2x1xi1> to vector<2x64xi1>
    %678 = vector.broadcast %cst_143 : f32 to vector<2x64xf32>
    %679 = arith.select %677, %670, %678 : vector<2x64xi1>, vector<2x64xf32>
    %680 = tpu.concatenate %399, %439, %479, %519, %559, %599, %639, %679 in 0 : vector<2x64xf32>, vector<2x64xf32>, vector<2x64xf32>, vector<2x64xf32>, vector<2x64xf32>, vector<2x64xf32>, vector<2x64xf32>, vector<2x64xf32> -> vector<16x64xf32>
    %c568 = arith.constant 568 : index
    %c0_144 = arith.constant 0 : index
    %681 = vector.load %arg3[%c568, %c0_144] : memref<784x256xf32, #tpu.memory_space<vmem>>, vector<64x192xf32>
    %cst_145 = arith.constant dense<0.000000e+00> : vector<16x192xf32>
    %682 = tpu.matmul %680, %681, %cst_145 {dimension_numbers = #tpu.dot_dimension_numbers<[1], [0], [0], [1], [0, 0, 1, 1], [], []>} : vector<16x64xf32>, vector<64x192xf32>, vector<16x192xf32> -> vector<16x192xf32>
    %c632 = arith.constant 632 : index
    %c0_146 = arith.constant 0 : index
    %683 = vector.load %arg3[%c632, %c0_146] : memref<784x256xf32, #tpu.memory_space<vmem>>, vector<1x192xf32>
    %684 = vector.broadcast %683 : vector<1x192xf32> to vector<16x192xf32>
    %685 = arith.addf %682, %684 : vector<16x192xf32>
    %c640 = arith.constant 640 : index
    %c0_147 = arith.constant 0 : index
    %686 = vector.load %arg3[%c640, %c0_147] : memref<784x256xf32, #tpu.memory_space<vmem>>, vector<64x192xf32>
    %c704 = arith.constant 704 : index
    %c0_148 = arith.constant 0 : index
    %687 = vector.load %arg3[%c704, %c0_148] : memref<784x256xf32, #tpu.memory_space<vmem>>, vector<1x192xf32>
    %688 = vector.extract_strided_slice %685 {offsets = [0, 0], sizes = [2, 192], strides = [1, 1]} : vector<16x192xf32> to vector<2x192xf32>
    %cst_149 = arith.constant dense<0.000000e+00> : vector<2x192xf32>
    %689 = tpu.matmul %346, %686, %cst_149 {dimension_numbers = #tpu.dot_dimension_numbers<[1], [0], [0], [1], [0, 0, 1, 1], [], []>} : vector<2x64xf32>, vector<64x192xf32>, vector<2x192xf32> -> vector<2x192xf32>
    %690 = vector.broadcast %687 : vector<1x192xf32> to vector<2x192xf32>
    %691 = arith.addf %689, %690 : vector<2x192xf32>
    %692 = vector.extract_strided_slice %688 {offsets = [0, 0], sizes = [2, 64], strides = [1, 1]} : vector<2x192xf32> to vector<2x64xf32>
    %693 = vector.extract_strided_slice %691 {offsets = [0, 0], sizes = [2, 64], strides = [1, 1]} : vector<2x192xf32> to vector<2x64xf32>
    %694 = arith.addf %692, %693 : vector<2x64xf32>
    %695 = arith.negf %694 : vector<2x64xf32>
    %696 = math.exp %695 : vector<2x64xf32>
    %cst_150 = arith.constant 1.000000e+00 : f32
    %697 = vector.broadcast %cst_150 : f32 to vector<2x64xf32>
    %698 = arith.addf %697, %696 : vector<2x64xf32>
    %699 = arith.divf %697, %698 : vector<2x64xf32>
    %700 = vector.extract_strided_slice %688 {offsets = [0, 64], sizes = [2, 64], strides = [1, 1]} : vector<2x192xf32> to vector<2x64xf32>
    %701 = vector.extract_strided_slice %691 {offsets = [0, 64], sizes = [2, 64], strides = [1, 1]} : vector<2x192xf32> to vector<2x64xf32>
    %702 = arith.addf %700, %701 : vector<2x64xf32>
    %703 = arith.negf %702 : vector<2x64xf32>
    %704 = math.exp %703 : vector<2x64xf32>
    %cst_151 = arith.constant 1.000000e+00 : f32
    %705 = vector.broadcast %cst_151 : f32 to vector<2x64xf32>
    %706 = arith.addf %705, %704 : vector<2x64xf32>
    %707 = arith.divf %705, %706 : vector<2x64xf32>
    %708 = vector.extract_strided_slice %688 {offsets = [0, 128], sizes = [2, 64], strides = [1, 1]} : vector<2x192xf32> to vector<2x64xf32>
    %709 = vector.extract_strided_slice %691 {offsets = [0, 128], sizes = [2, 64], strides = [1, 1]} : vector<2x192xf32> to vector<2x64xf32>
    %710 = arith.mulf %699, %709 : vector<2x64xf32>
    %711 = arith.addf %708, %710 : vector<2x64xf32>
    %712 = math.tanh %711 : vector<2x64xf32>
    %cst_152 = arith.constant 1.000000e+00 : f32
    %713 = vector.broadcast %cst_152 : f32 to vector<2x64xf32>
    %714 = arith.subf %713, %707 : vector<2x64xf32>
    %715 = arith.mulf %714, %712 : vector<2x64xf32>
    %716 = arith.mulf %707, %346 : vector<2x64xf32>
    %717 = arith.addf %715, %716 : vector<2x64xf32>
    %c0_i32_153 = arith.constant 0 : i32
    %718 = vector.broadcast %c0_i32_153 : i32 to vector<2x1xi32>
    %719 = arith.cmpi sgt, %347, %718 : vector<2x1xi32>
    %720 = vector.shape_cast %719 : vector<2x1xi1> to vector<2x1xi1>
    %721 = vector.broadcast %720 : vector<2x1xi1> to vector<2x64xi1>
    %722 = arith.select %721, %717, %346 : vector<2x64xi1>, vector<2x64xf32>
    %cst_154 = arith.constant 0.000000e+00 : f32
    %723 = vector.shape_cast %719 : vector<2x1xi1> to vector<2x1xi1>
    %724 = vector.broadcast %723 : vector<2x1xi1> to vector<2x64xi1>
    %725 = vector.broadcast %cst_154 : f32 to vector<2x64xf32>
    %726 = arith.select %724, %717, %725 : vector<2x64xi1>, vector<2x64xf32>
    %727 = vector.extract_strided_slice %685 {offsets = [2, 0], sizes = [2, 192], strides = [1, 1]} : vector<16x192xf32> to vector<2x192xf32>
    %cst_155 = arith.constant dense<0.000000e+00> : vector<2x192xf32>
    %728 = tpu.matmul %722, %686, %cst_155 {dimension_numbers = #tpu.dot_dimension_numbers<[1], [0], [0], [1], [0, 0, 1, 1], [], []>} : vector<2x64xf32>, vector<64x192xf32>, vector<2x192xf32> -> vector<2x192xf32>
    %729 = vector.broadcast %687 : vector<1x192xf32> to vector<2x192xf32>
    %730 = arith.addf %728, %729 : vector<2x192xf32>
    %731 = vector.extract_strided_slice %727 {offsets = [0, 0], sizes = [2, 64], strides = [1, 1]} : vector<2x192xf32> to vector<2x64xf32>
    %732 = vector.extract_strided_slice %730 {offsets = [0, 0], sizes = [2, 64], strides = [1, 1]} : vector<2x192xf32> to vector<2x64xf32>
    %733 = arith.addf %731, %732 : vector<2x64xf32>
    %734 = arith.negf %733 : vector<2x64xf32>
    %735 = math.exp %734 : vector<2x64xf32>
    %cst_156 = arith.constant 1.000000e+00 : f32
    %736 = vector.broadcast %cst_156 : f32 to vector<2x64xf32>
    %737 = arith.addf %736, %735 : vector<2x64xf32>
    %738 = arith.divf %736, %737 : vector<2x64xf32>
    %739 = vector.extract_strided_slice %727 {offsets = [0, 64], sizes = [2, 64], strides = [1, 1]} : vector<2x192xf32> to vector<2x64xf32>
    %740 = vector.extract_strided_slice %730 {offsets = [0, 64], sizes = [2, 64], strides = [1, 1]} : vector<2x192xf32> to vector<2x64xf32>
    %741 = arith.addf %739, %740 : vector<2x64xf32>
    %742 = arith.negf %741 : vector<2x64xf32>
    %743 = math.exp %742 : vector<2x64xf32>
    %cst_157 = arith.constant 1.000000e+00 : f32
    %744 = vector.broadcast %cst_157 : f32 to vector<2x64xf32>
    %745 = arith.addf %744, %743 : vector<2x64xf32>
    %746 = arith.divf %744, %745 : vector<2x64xf32>
    %747 = vector.extract_strided_slice %727 {offsets = [0, 128], sizes = [2, 64], strides = [1, 1]} : vector<2x192xf32> to vector<2x64xf32>
    %748 = vector.extract_strided_slice %730 {offsets = [0, 128], sizes = [2, 64], strides = [1, 1]} : vector<2x192xf32> to vector<2x64xf32>
    %749 = arith.mulf %738, %748 : vector<2x64xf32>
    %750 = arith.addf %747, %749 : vector<2x64xf32>
    %751 = math.tanh %750 : vector<2x64xf32>
    %cst_158 = arith.constant 1.000000e+00 : f32
    %752 = vector.broadcast %cst_158 : f32 to vector<2x64xf32>
    %753 = arith.subf %752, %746 : vector<2x64xf32>
    %754 = arith.mulf %753, %751 : vector<2x64xf32>
    %755 = arith.mulf %746, %722 : vector<2x64xf32>
    %756 = arith.addf %754, %755 : vector<2x64xf32>
    %c1_i32_159 = arith.constant 1 : i32
    %757 = vector.broadcast %c1_i32_159 : i32 to vector<2x1xi32>
    %758 = arith.cmpi sgt, %347, %757 : vector<2x1xi32>
    %759 = vector.shape_cast %758 : vector<2x1xi1> to vector<2x1xi1>
    %760 = vector.broadcast %759 : vector<2x1xi1> to vector<2x64xi1>
    %761 = arith.select %760, %756, %722 : vector<2x64xi1>, vector<2x64xf32>
    %cst_160 = arith.constant 0.000000e+00 : f32
    %762 = vector.shape_cast %758 : vector<2x1xi1> to vector<2x1xi1>
    %763 = vector.broadcast %762 : vector<2x1xi1> to vector<2x64xi1>
    %764 = vector.broadcast %cst_160 : f32 to vector<2x64xf32>
    %765 = arith.select %763, %756, %764 : vector<2x64xi1>, vector<2x64xf32>
    %766 = vector.extract_strided_slice %685 {offsets = [4, 0], sizes = [2, 192], strides = [1, 1]} : vector<16x192xf32> to vector<2x192xf32>
    %cst_161 = arith.constant dense<0.000000e+00> : vector<2x192xf32>
    %767 = tpu.matmul %761, %686, %cst_161 {dimension_numbers = #tpu.dot_dimension_numbers<[1], [0], [0], [1], [0, 0, 1, 1], [], []>} : vector<2x64xf32>, vector<64x192xf32>, vector<2x192xf32> -> vector<2x192xf32>
    %768 = vector.broadcast %687 : vector<1x192xf32> to vector<2x192xf32>
    %769 = arith.addf %767, %768 : vector<2x192xf32>
    %770 = vector.extract_strided_slice %766 {offsets = [0, 0], sizes = [2, 64], strides = [1, 1]} : vector<2x192xf32> to vector<2x64xf32>
    %771 = vector.extract_strided_slice %769 {offsets = [0, 0], sizes = [2, 64], strides = [1, 1]} : vector<2x192xf32> to vector<2x64xf32>
    %772 = arith.addf %770, %771 : vector<2x64xf32>
    %773 = arith.negf %772 : vector<2x64xf32>
    %774 = math.exp %773 : vector<2x64xf32>
    %cst_162 = arith.constant 1.000000e+00 : f32
    %775 = vector.broadcast %cst_162 : f32 to vector<2x64xf32>
    %776 = arith.addf %775, %774 : vector<2x64xf32>
    %777 = arith.divf %775, %776 : vector<2x64xf32>
    %778 = vector.extract_strided_slice %766 {offsets = [0, 64], sizes = [2, 64], strides = [1, 1]} : vector<2x192xf32> to vector<2x64xf32>
    %779 = vector.extract_strided_slice %769 {offsets = [0, 64], sizes = [2, 64], strides = [1, 1]} : vector<2x192xf32> to vector<2x64xf32>
    %780 = arith.addf %778, %779 : vector<2x64xf32>
    %781 = arith.negf %780 : vector<2x64xf32>
    %782 = math.exp %781 : vector<2x64xf32>
    %cst_163 = arith.constant 1.000000e+00 : f32
    %783 = vector.broadcast %cst_163 : f32 to vector<2x64xf32>
    %784 = arith.addf %783, %782 : vector<2x64xf32>
    %785 = arith.divf %783, %784 : vector<2x64xf32>
    %786 = vector.extract_strided_slice %766 {offsets = [0, 128], sizes = [2, 64], strides = [1, 1]} : vector<2x192xf32> to vector<2x64xf32>
    %787 = vector.extract_strided_slice %769 {offsets = [0, 128], sizes = [2, 64], strides = [1, 1]} : vector<2x192xf32> to vector<2x64xf32>
    %788 = arith.mulf %777, %787 : vector<2x64xf32>
    %789 = arith.addf %786, %788 : vector<2x64xf32>
    %790 = math.tanh %789 : vector<2x64xf32>
    %cst_164 = arith.constant 1.000000e+00 : f32
    %791 = vector.broadcast %cst_164 : f32 to vector<2x64xf32>
    %792 = arith.subf %791, %785 : vector<2x64xf32>
    %793 = arith.mulf %792, %790 : vector<2x64xf32>
    %794 = arith.mulf %785, %761 : vector<2x64xf32>
    %795 = arith.addf %793, %794 : vector<2x64xf32>
    %c2_i32_165 = arith.constant 2 : i32
    %796 = vector.broadcast %c2_i32_165 : i32 to vector<2x1xi32>
    %797 = arith.cmpi sgt, %347, %796 : vector<2x1xi32>
    %798 = vector.shape_cast %797 : vector<2x1xi1> to vector<2x1xi1>
    %799 = vector.broadcast %798 : vector<2x1xi1> to vector<2x64xi1>
    %800 = arith.select %799, %795, %761 : vector<2x64xi1>, vector<2x64xf32>
    %cst_166 = arith.constant 0.000000e+00 : f32
    %801 = vector.shape_cast %797 : vector<2x1xi1> to vector<2x1xi1>
    %802 = vector.broadcast %801 : vector<2x1xi1> to vector<2x64xi1>
    %803 = vector.broadcast %cst_166 : f32 to vector<2x64xf32>
    %804 = arith.select %802, %795, %803 : vector<2x64xi1>, vector<2x64xf32>
    %805 = vector.extract_strided_slice %685 {offsets = [6, 0], sizes = [2, 192], strides = [1, 1]} : vector<16x192xf32> to vector<2x192xf32>
    %cst_167 = arith.constant dense<0.000000e+00> : vector<2x192xf32>
    %806 = tpu.matmul %800, %686, %cst_167 {dimension_numbers = #tpu.dot_dimension_numbers<[1], [0], [0], [1], [0, 0, 1, 1], [], []>} : vector<2x64xf32>, vector<64x192xf32>, vector<2x192xf32> -> vector<2x192xf32>
    %807 = vector.broadcast %687 : vector<1x192xf32> to vector<2x192xf32>
    %808 = arith.addf %806, %807 : vector<2x192xf32>
    %809 = vector.extract_strided_slice %805 {offsets = [0, 0], sizes = [2, 64], strides = [1, 1]} : vector<2x192xf32> to vector<2x64xf32>
    %810 = vector.extract_strided_slice %808 {offsets = [0, 0], sizes = [2, 64], strides = [1, 1]} : vector<2x192xf32> to vector<2x64xf32>
    %811 = arith.addf %809, %810 : vector<2x64xf32>
    %812 = arith.negf %811 : vector<2x64xf32>
    %813 = math.exp %812 : vector<2x64xf32>
    %cst_168 = arith.constant 1.000000e+00 : f32
    %814 = vector.broadcast %cst_168 : f32 to vector<2x64xf32>
    %815 = arith.addf %814, %813 : vector<2x64xf32>
    %816 = arith.divf %814, %815 : vector<2x64xf32>
    %817 = vector.extract_strided_slice %805 {offsets = [0, 64], sizes = [2, 64], strides = [1, 1]} : vector<2x192xf32> to vector<2x64xf32>
    %818 = vector.extract_strided_slice %808 {offsets = [0, 64], sizes = [2, 64], strides = [1, 1]} : vector<2x192xf32> to vector<2x64xf32>
    %819 = arith.addf %817, %818 : vector<2x64xf32>
    %820 = arith.negf %819 : vector<2x64xf32>
    %821 = math.exp %820 : vector<2x64xf32>
    %cst_169 = arith.constant 1.000000e+00 : f32
    %822 = vector.broadcast %cst_169 : f32 to vector<2x64xf32>
    %823 = arith.addf %822, %821 : vector<2x64xf32>
    %824 = arith.divf %822, %823 : vector<2x64xf32>
    %825 = vector.extract_strided_slice %805 {offsets = [0, 128], sizes = [2, 64], strides = [1, 1]} : vector<2x192xf32> to vector<2x64xf32>
    %826 = vector.extract_strided_slice %808 {offsets = [0, 128], sizes = [2, 64], strides = [1, 1]} : vector<2x192xf32> to vector<2x64xf32>
    %827 = arith.mulf %816, %826 : vector<2x64xf32>
    %828 = arith.addf %825, %827 : vector<2x64xf32>
    %829 = math.tanh %828 : vector<2x64xf32>
    %cst_170 = arith.constant 1.000000e+00 : f32
    %830 = vector.broadcast %cst_170 : f32 to vector<2x64xf32>
    %831 = arith.subf %830, %824 : vector<2x64xf32>
    %832 = arith.mulf %831, %829 : vector<2x64xf32>
    %833 = arith.mulf %824, %800 : vector<2x64xf32>
    %834 = arith.addf %832, %833 : vector<2x64xf32>
    %c3_i32_171 = arith.constant 3 : i32
    %835 = vector.broadcast %c3_i32_171 : i32 to vector<2x1xi32>
    %836 = arith.cmpi sgt, %347, %835 : vector<2x1xi32>
    %837 = vector.shape_cast %836 : vector<2x1xi1> to vector<2x1xi1>
    %838 = vector.broadcast %837 : vector<2x1xi1> to vector<2x64xi1>
    %839 = arith.select %838, %834, %800 : vector<2x64xi1>, vector<2x64xf32>
    %cst_172 = arith.constant 0.000000e+00 : f32
    %840 = vector.shape_cast %836 : vector<2x1xi1> to vector<2x1xi1>
    %841 = vector.broadcast %840 : vector<2x1xi1> to vector<2x64xi1>
    %842 = vector.broadcast %cst_172 : f32 to vector<2x64xf32>
    %843 = arith.select %841, %834, %842 : vector<2x64xi1>, vector<2x64xf32>
    %844 = vector.extract_strided_slice %685 {offsets = [8, 0], sizes = [2, 192], strides = [1, 1]} : vector<16x192xf32> to vector<2x192xf32>
    %cst_173 = arith.constant dense<0.000000e+00> : vector<2x192xf32>
    %845 = tpu.matmul %839, %686, %cst_173 {dimension_numbers = #tpu.dot_dimension_numbers<[1], [0], [0], [1], [0, 0, 1, 1], [], []>} : vector<2x64xf32>, vector<64x192xf32>, vector<2x192xf32> -> vector<2x192xf32>
    %846 = vector.broadcast %687 : vector<1x192xf32> to vector<2x192xf32>
    %847 = arith.addf %845, %846 : vector<2x192xf32>
    %848 = vector.extract_strided_slice %844 {offsets = [0, 0], sizes = [2, 64], strides = [1, 1]} : vector<2x192xf32> to vector<2x64xf32>
    %849 = vector.extract_strided_slice %847 {offsets = [0, 0], sizes = [2, 64], strides = [1, 1]} : vector<2x192xf32> to vector<2x64xf32>
    %850 = arith.addf %848, %849 : vector<2x64xf32>
    %851 = arith.negf %850 : vector<2x64xf32>
    %852 = math.exp %851 : vector<2x64xf32>
    %cst_174 = arith.constant 1.000000e+00 : f32
    %853 = vector.broadcast %cst_174 : f32 to vector<2x64xf32>
    %854 = arith.addf %853, %852 : vector<2x64xf32>
    %855 = arith.divf %853, %854 : vector<2x64xf32>
    %856 = vector.extract_strided_slice %844 {offsets = [0, 64], sizes = [2, 64], strides = [1, 1]} : vector<2x192xf32> to vector<2x64xf32>
    %857 = vector.extract_strided_slice %847 {offsets = [0, 64], sizes = [2, 64], strides = [1, 1]} : vector<2x192xf32> to vector<2x64xf32>
    %858 = arith.addf %856, %857 : vector<2x64xf32>
    %859 = arith.negf %858 : vector<2x64xf32>
    %860 = math.exp %859 : vector<2x64xf32>
    %cst_175 = arith.constant 1.000000e+00 : f32
    %861 = vector.broadcast %cst_175 : f32 to vector<2x64xf32>
    %862 = arith.addf %861, %860 : vector<2x64xf32>
    %863 = arith.divf %861, %862 : vector<2x64xf32>
    %864 = vector.extract_strided_slice %844 {offsets = [0, 128], sizes = [2, 64], strides = [1, 1]} : vector<2x192xf32> to vector<2x64xf32>
    %865 = vector.extract_strided_slice %847 {offsets = [0, 128], sizes = [2, 64], strides = [1, 1]} : vector<2x192xf32> to vector<2x64xf32>
    %866 = arith.mulf %855, %865 : vector<2x64xf32>
    %867 = arith.addf %864, %866 : vector<2x64xf32>
    %868 = math.tanh %867 : vector<2x64xf32>
    %cst_176 = arith.constant 1.000000e+00 : f32
    %869 = vector.broadcast %cst_176 : f32 to vector<2x64xf32>
    %870 = arith.subf %869, %863 : vector<2x64xf32>
    %871 = arith.mulf %870, %868 : vector<2x64xf32>
    %872 = arith.mulf %863, %839 : vector<2x64xf32>
    %873 = arith.addf %871, %872 : vector<2x64xf32>
    %c4_i32_177 = arith.constant 4 : i32
    %874 = vector.broadcast %c4_i32_177 : i32 to vector<2x1xi32>
    %875 = arith.cmpi sgt, %347, %874 : vector<2x1xi32>
    %876 = vector.shape_cast %875 : vector<2x1xi1> to vector<2x1xi1>
    %877 = vector.broadcast %876 : vector<2x1xi1> to vector<2x64xi1>
    %878 = arith.select %877, %873, %839 : vector<2x64xi1>, vector<2x64xf32>
    %cst_178 = arith.constant 0.000000e+00 : f32
    %879 = vector.shape_cast %875 : vector<2x1xi1> to vector<2x1xi1>
    %880 = vector.broadcast %879 : vector<2x1xi1> to vector<2x64xi1>
    %881 = vector.broadcast %cst_178 : f32 to vector<2x64xf32>
    %882 = arith.select %880, %873, %881 : vector<2x64xi1>, vector<2x64xf32>
    %883 = vector.extract_strided_slice %685 {offsets = [10, 0], sizes = [2, 192], strides = [1, 1]} : vector<16x192xf32> to vector<2x192xf32>
    %cst_179 = arith.constant dense<0.000000e+00> : vector<2x192xf32>
    %884 = tpu.matmul %878, %686, %cst_179 {dimension_numbers = #tpu.dot_dimension_numbers<[1], [0], [0], [1], [0, 0, 1, 1], [], []>} : vector<2x64xf32>, vector<64x192xf32>, vector<2x192xf32> -> vector<2x192xf32>
    %885 = vector.broadcast %687 : vector<1x192xf32> to vector<2x192xf32>
    %886 = arith.addf %884, %885 : vector<2x192xf32>
    %887 = vector.extract_strided_slice %883 {offsets = [0, 0], sizes = [2, 64], strides = [1, 1]} : vector<2x192xf32> to vector<2x64xf32>
    %888 = vector.extract_strided_slice %886 {offsets = [0, 0], sizes = [2, 64], strides = [1, 1]} : vector<2x192xf32> to vector<2x64xf32>
    %889 = arith.addf %887, %888 : vector<2x64xf32>
    %890 = arith.negf %889 : vector<2x64xf32>
    %891 = math.exp %890 : vector<2x64xf32>
    %cst_180 = arith.constant 1.000000e+00 : f32
    %892 = vector.broadcast %cst_180 : f32 to vector<2x64xf32>
    %893 = arith.addf %892, %891 : vector<2x64xf32>
    %894 = arith.divf %892, %893 : vector<2x64xf32>
    %895 = vector.extract_strided_slice %883 {offsets = [0, 64], sizes = [2, 64], strides = [1, 1]} : vector<2x192xf32> to vector<2x64xf32>
    %896 = vector.extract_strided_slice %886 {offsets = [0, 64], sizes = [2, 64], strides = [1, 1]} : vector<2x192xf32> to vector<2x64xf32>
    %897 = arith.addf %895, %896 : vector<2x64xf32>
    %898 = arith.negf %897 : vector<2x64xf32>
    %899 = math.exp %898 : vector<2x64xf32>
    %cst_181 = arith.constant 1.000000e+00 : f32
    %900 = vector.broadcast %cst_181 : f32 to vector<2x64xf32>
    %901 = arith.addf %900, %899 : vector<2x64xf32>
    %902 = arith.divf %900, %901 : vector<2x64xf32>
    %903 = vector.extract_strided_slice %883 {offsets = [0, 128], sizes = [2, 64], strides = [1, 1]} : vector<2x192xf32> to vector<2x64xf32>
    %904 = vector.extract_strided_slice %886 {offsets = [0, 128], sizes = [2, 64], strides = [1, 1]} : vector<2x192xf32> to vector<2x64xf32>
    %905 = arith.mulf %894, %904 : vector<2x64xf32>
    %906 = arith.addf %903, %905 : vector<2x64xf32>
    %907 = math.tanh %906 : vector<2x64xf32>
    %cst_182 = arith.constant 1.000000e+00 : f32
    %908 = vector.broadcast %cst_182 : f32 to vector<2x64xf32>
    %909 = arith.subf %908, %902 : vector<2x64xf32>
    %910 = arith.mulf %909, %907 : vector<2x64xf32>
    %911 = arith.mulf %902, %878 : vector<2x64xf32>
    %912 = arith.addf %910, %911 : vector<2x64xf32>
    %c5_i32_183 = arith.constant 5 : i32
    %913 = vector.broadcast %c5_i32_183 : i32 to vector<2x1xi32>
    %914 = arith.cmpi sgt, %347, %913 : vector<2x1xi32>
    %915 = vector.shape_cast %914 : vector<2x1xi1> to vector<2x1xi1>
    %916 = vector.broadcast %915 : vector<2x1xi1> to vector<2x64xi1>
    %917 = arith.select %916, %912, %878 : vector<2x64xi1>, vector<2x64xf32>
    %cst_184 = arith.constant 0.000000e+00 : f32
    %918 = vector.shape_cast %914 : vector<2x1xi1> to vector<2x1xi1>
    %919 = vector.broadcast %918 : vector<2x1xi1> to vector<2x64xi1>
    %920 = vector.broadcast %cst_184 : f32 to vector<2x64xf32>
    %921 = arith.select %919, %912, %920 : vector<2x64xi1>, vector<2x64xf32>
    %922 = vector.extract_strided_slice %685 {offsets = [12, 0], sizes = [2, 192], strides = [1, 1]} : vector<16x192xf32> to vector<2x192xf32>
    %cst_185 = arith.constant dense<0.000000e+00> : vector<2x192xf32>
    %923 = tpu.matmul %917, %686, %cst_185 {dimension_numbers = #tpu.dot_dimension_numbers<[1], [0], [0], [1], [0, 0, 1, 1], [], []>} : vector<2x64xf32>, vector<64x192xf32>, vector<2x192xf32> -> vector<2x192xf32>
    %924 = vector.broadcast %687 : vector<1x192xf32> to vector<2x192xf32>
    %925 = arith.addf %923, %924 : vector<2x192xf32>
    %926 = vector.extract_strided_slice %922 {offsets = [0, 0], sizes = [2, 64], strides = [1, 1]} : vector<2x192xf32> to vector<2x64xf32>
    %927 = vector.extract_strided_slice %925 {offsets = [0, 0], sizes = [2, 64], strides = [1, 1]} : vector<2x192xf32> to vector<2x64xf32>
    %928 = arith.addf %926, %927 : vector<2x64xf32>
    %929 = arith.negf %928 : vector<2x64xf32>
    %930 = math.exp %929 : vector<2x64xf32>
    %cst_186 = arith.constant 1.000000e+00 : f32
    %931 = vector.broadcast %cst_186 : f32 to vector<2x64xf32>
    %932 = arith.addf %931, %930 : vector<2x64xf32>
    %933 = arith.divf %931, %932 : vector<2x64xf32>
    %934 = vector.extract_strided_slice %922 {offsets = [0, 64], sizes = [2, 64], strides = [1, 1]} : vector<2x192xf32> to vector<2x64xf32>
    %935 = vector.extract_strided_slice %925 {offsets = [0, 64], sizes = [2, 64], strides = [1, 1]} : vector<2x192xf32> to vector<2x64xf32>
    %936 = arith.addf %934, %935 : vector<2x64xf32>
    %937 = arith.negf %936 : vector<2x64xf32>
    %938 = math.exp %937 : vector<2x64xf32>
    %cst_187 = arith.constant 1.000000e+00 : f32
    %939 = vector.broadcast %cst_187 : f32 to vector<2x64xf32>
    %940 = arith.addf %939, %938 : vector<2x64xf32>
    %941 = arith.divf %939, %940 : vector<2x64xf32>
    %942 = vector.extract_strided_slice %922 {offsets = [0, 128], sizes = [2, 64], strides = [1, 1]} : vector<2x192xf32> to vector<2x64xf32>
    %943 = vector.extract_strided_slice %925 {offsets = [0, 128], sizes = [2, 64], strides = [1, 1]} : vector<2x192xf32> to vector<2x64xf32>
    %944 = arith.mulf %933, %943 : vector<2x64xf32>
    %945 = arith.addf %942, %944 : vector<2x64xf32>
    %946 = math.tanh %945 : vector<2x64xf32>
    %cst_188 = arith.constant 1.000000e+00 : f32
    %947 = vector.broadcast %cst_188 : f32 to vector<2x64xf32>
    %948 = arith.subf %947, %941 : vector<2x64xf32>
    %949 = arith.mulf %948, %946 : vector<2x64xf32>
    %950 = arith.mulf %941, %917 : vector<2x64xf32>
    %951 = arith.addf %949, %950 : vector<2x64xf32>
    %c6_i32_189 = arith.constant 6 : i32
    %952 = vector.broadcast %c6_i32_189 : i32 to vector<2x1xi32>
    %953 = arith.cmpi sgt, %347, %952 : vector<2x1xi32>
    %954 = vector.shape_cast %953 : vector<2x1xi1> to vector<2x1xi1>
    %955 = vector.broadcast %954 : vector<2x1xi1> to vector<2x64xi1>
    %956 = arith.select %955, %951, %917 : vector<2x64xi1>, vector<2x64xf32>
    %cst_190 = arith.constant 0.000000e+00 : f32
    %957 = vector.shape_cast %953 : vector<2x1xi1> to vector<2x1xi1>
    %958 = vector.broadcast %957 : vector<2x1xi1> to vector<2x64xi1>
    %959 = vector.broadcast %cst_190 : f32 to vector<2x64xf32>
    %960 = arith.select %958, %951, %959 : vector<2x64xi1>, vector<2x64xf32>
    %961 = vector.extract_strided_slice %685 {offsets = [14, 0], sizes = [2, 192], strides = [1, 1]} : vector<16x192xf32> to vector<2x192xf32>
    %cst_191 = arith.constant dense<0.000000e+00> : vector<2x192xf32>
    %962 = tpu.matmul %956, %686, %cst_191 {dimension_numbers = #tpu.dot_dimension_numbers<[1], [0], [0], [1], [0, 0, 1, 1], [], []>} : vector<2x64xf32>, vector<64x192xf32>, vector<2x192xf32> -> vector<2x192xf32>
    %963 = vector.broadcast %687 : vector<1x192xf32> to vector<2x192xf32>
    %964 = arith.addf %962, %963 : vector<2x192xf32>
    %965 = vector.extract_strided_slice %961 {offsets = [0, 0], sizes = [2, 64], strides = [1, 1]} : vector<2x192xf32> to vector<2x64xf32>
    %966 = vector.extract_strided_slice %964 {offsets = [0, 0], sizes = [2, 64], strides = [1, 1]} : vector<2x192xf32> to vector<2x64xf32>
    %967 = arith.addf %965, %966 : vector<2x64xf32>
    %968 = arith.negf %967 : vector<2x64xf32>
    %969 = math.exp %968 : vector<2x64xf32>
    %cst_192 = arith.constant 1.000000e+00 : f32
    %970 = vector.broadcast %cst_192 : f32 to vector<2x64xf32>
    %971 = arith.addf %970, %969 : vector<2x64xf32>
    %972 = arith.divf %970, %971 : vector<2x64xf32>
    %973 = vector.extract_strided_slice %961 {offsets = [0, 64], sizes = [2, 64], strides = [1, 1]} : vector<2x192xf32> to vector<2x64xf32>
    %974 = vector.extract_strided_slice %964 {offsets = [0, 64], sizes = [2, 64], strides = [1, 1]} : vector<2x192xf32> to vector<2x64xf32>
    %975 = arith.addf %973, %974 : vector<2x64xf32>
    %976 = arith.negf %975 : vector<2x64xf32>
    %977 = math.exp %976 : vector<2x64xf32>
    %cst_193 = arith.constant 1.000000e+00 : f32
    %978 = vector.broadcast %cst_193 : f32 to vector<2x64xf32>
    %979 = arith.addf %978, %977 : vector<2x64xf32>
    %980 = arith.divf %978, %979 : vector<2x64xf32>
    %981 = vector.extract_strided_slice %961 {offsets = [0, 128], sizes = [2, 64], strides = [1, 1]} : vector<2x192xf32> to vector<2x64xf32>
    %982 = vector.extract_strided_slice %964 {offsets = [0, 128], sizes = [2, 64], strides = [1, 1]} : vector<2x192xf32> to vector<2x64xf32>
    %983 = arith.mulf %972, %982 : vector<2x64xf32>
    %984 = arith.addf %981, %983 : vector<2x64xf32>
    %985 = math.tanh %984 : vector<2x64xf32>
    %cst_194 = arith.constant 1.000000e+00 : f32
    %986 = vector.broadcast %cst_194 : f32 to vector<2x64xf32>
    %987 = arith.subf %986, %980 : vector<2x64xf32>
    %988 = arith.mulf %987, %985 : vector<2x64xf32>
    %989 = arith.mulf %980, %956 : vector<2x64xf32>
    %990 = arith.addf %988, %989 : vector<2x64xf32>
    %c7_i32_195 = arith.constant 7 : i32
    %991 = vector.broadcast %c7_i32_195 : i32 to vector<2x1xi32>
    %992 = arith.cmpi sgt, %347, %991 : vector<2x1xi32>
    %993 = vector.shape_cast %992 : vector<2x1xi1> to vector<2x1xi1>
    %994 = vector.broadcast %993 : vector<2x1xi1> to vector<2x64xi1>
    %995 = arith.select %994, %990, %956 : vector<2x64xi1>, vector<2x64xf32>
    %cst_196 = arith.constant 0.000000e+00 : f32
    %996 = vector.shape_cast %992 : vector<2x1xi1> to vector<2x1xi1>
    %997 = vector.broadcast %996 : vector<2x1xi1> to vector<2x64xi1>
    %998 = vector.broadcast %cst_196 : f32 to vector<2x64xf32>
    %999 = arith.select %997, %990, %998 : vector<2x64xi1>, vector<2x64xf32>
    %1000 = tpu.concatenate %726, %765, %804, %843, %882, %921, %960, %999 in 0 : vector<2x64xf32>, vector<2x64xf32>, vector<2x64xf32>, vector<2x64xf32>, vector<2x64xf32>, vector<2x64xf32>, vector<2x64xf32>, vector<2x64xf32> -> vector<16x64xf32>
    %c712 = arith.constant 712 : index
    %c0_197 = arith.constant 0 : index
    %1001 = vector.load %arg3[%c712, %c0_197] : memref<784x256xf32, #tpu.memory_space<vmem>>, vector<64x128xf32>
    %cst_198 = arith.constant dense<0.000000e+00> : vector<16x128xf32>
    %1002 = tpu.matmul %1000, %1001, %cst_198 {dimension_numbers = #tpu.dot_dimension_numbers<[1], [0], [0], [1], [0, 0, 1, 1], [], []>} : vector<16x64xf32>, vector<64x128xf32>, vector<16x128xf32> -> vector<16x128xf32>
    %c776 = arith.constant 776 : index
    %c0_199 = arith.constant 0 : index
    %1003 = vector.load %arg3[%c776, %c0_199] : memref<784x256xf32, #tpu.memory_space<vmem>>, vector<1x128xf32>
    %1004 = vector.broadcast %1003 : vector<1x128xf32> to vector<16x128xf32>
    %1005 = arith.addf %1002, %1004 : vector<16x128xf32>
    %c0_200 = arith.constant 0 : index
    %c0_201 = arith.constant 0 : index
    %1006 = vector.load %arg4[%c0_200, %c0_201] : memref<16x128xf32, #tpu.memory_space<vmem>>, vector<16x128xf32>
    tpu.vector_store %arg4[%c0_200, %c0_201], %1005 {strides = array<i32>} : memref<16x128xf32, #tpu.memory_space<vmem>>, vector<16x128xf32>,
    %c0_202 = arith.constant 0 : index
    %c0_203 = arith.constant 0 : index
    %c0_204 = arith.constant 0 : index
    %1007 = vector.load %arg5[%c0_202, %c0_203, %c0_204] : memref<2x2x64xf32, #tpu.memory_space<vmem>>, vector<1x2x64xf32>
    %1008 = vector.shape_cast %1007 : vector<1x2x64xf32> to vector<2x64xf32>
    %1009 = vector.shape_cast %675 : vector<2x64xf32> to vector<1x2x64xf32>
    tpu.vector_store %arg5[%c0_202, %c0_203, %c0_204], %1009 {strides = array<i32>} : memref<2x2x64xf32, #tpu.memory_space<vmem>>, vector<1x2x64xf32>,
    %c1_205 = arith.constant 1 : index
    %c0_206 = arith.constant 0 : index
    %c0_207 = arith.constant 0 : index
    %1010 = vector.load %arg5[%c1_205, %c0_206, %c0_207] : memref<2x2x64xf32, #tpu.memory_space<vmem>>, vector<1x2x64xf32>
    %1011 = vector.shape_cast %1010 : vector<1x2x64xf32> to vector<2x64xf32>
    %1012 = vector.shape_cast %995 : vector<2x64xf32> to vector<1x2x64xf32>
    tpu.vector_store %arg5[%c1_205, %c0_206, %c0_207], %1012 {strides = array<i32>} : memref<2x2x64xf32, #tpu.memory_space<vmem>>, vector<1x2x64xf32>,
    return
  }
}

</mosaic_0001>

<bundles_post_ra>
// kernel: molopt_forward.1
= control target key start
LH: loop header
LB: loop body
LE: loop exit
PB: predicated region body
PF: predicated region fallthrough
CT: control target
= control target key end

     0   :  { %v6896_v7 = vmov 0.0   ;;  %s8485_s0 = inlined_call_operand.vmem [shape: f32[16,32], index: 0, kind: input, shape index: {}]   ;;  %s8486_s1 = inlined_call_operand.vmem [shape: f32[8,16,16], index: 1, kind: input, shape index: {}]   ;;  %s8487_s2 = inlined_call_operand.vmem [shape: s32[48,1], index: 2, kind: input, shape index: {}]   ;;  %s8488_s3 = inlined_call_operand.vmem [shape: f32[784,256], index: 3, kind: input, shape index: {}]   ;;  %s8489_s4 = inlined_call_operand.vmem [shape: f32[16,128], index: 4, kind: output, shape index: {0}]   ;;  %s8490_s5 = inlined_call_operand.hbm [shape: f32[2,2,64], index: 5, kind: output, shape index: {1}]   ;;  %s8491_s6 = inlined_call_operand.vmem [shape: f32[2,32], index: 6, kind: output, shape index: {2}]  }
   0x1   :  { %v24_v0 = vld [vmem:[%s8488_s3 + $0x8] sm:$0xff]  ;;  %v26_v1 = vld [vmem:[%s8488_s3 + $0x18] sm:$0xff]  ;;  %v23_v2 = vld [vmem:[%s8488_s3] sm:$0xff]  ;;  %164 = vmatprep.mubr.f32.mxu0 %v6896_v7 }
   0x2   :  { %v6949_v3 = vpack.c.bf16 %v26_v1, %v24_v0  ;;  %v25_v4 = vld [vmem:[%s8488_s3 + $0x10] sm:$0xff]  ;;  %v28_v5 = vld [vmem:[%s8488_s3 + $0x28] sm:$0xff]  ;;  %v30_v6 = vld [vmem:[%s8488_s3 + $0x38] sm:$0xff] }
   0x3   :  { %v6961_v8 = vpack.c.bf16 %v25_v4, %v23_v2  ;;  %v6963_v9 = vpack.c.bf16 %v30_v6, %v28_v5  ;;  %v27_v10 = vld [vmem:[%s8488_s3 + $0x20] sm:$0xff]  ;;  %v29_v11 = vld [vmem:[%s8488_s3 + $0x30] sm:$0xff] }
   0x4   :  { %6070 = vmatprep.subr.bf16.mxu0 %v6949_v3 }
   0x5   :  { %12 = vsyncpa [#allocation3], 0  ;;  %6072 = vmatpush1.bf16.msra.mxu0 %v6961_v8  ;;  %v6973_v12 = vpack.c.bf16 %v29_v11, %v27_v10  ;;  %v6980_v13 = vld [vmem:[%s8485_s0] sm:$0xff]  ;;  %vm93_vm0 = vcmask 261120   ;;  %v6988_v14 = vld [vmem:[%s8485_s0 + $0x8] sm:$0xff]  ;;  %v83_v15 = vlaneseq  ;;  %vm185_vm1 = vcmask 130048  }
   0x6   :  { %6074 = vmatprep.subr.bf16.mxu0 %v6963_v9  ;;  %v5399_v18 = vld [vmem:[%s8488_s3 + $0x40] ss:$8 sm:$0x3]  ;;  %v7013_v24 = vld [vmem:[%s8486_s1 + $0x10] sm:$0xff]  ;;  %s6897_s20 = smov 64   ;;  %s6898_s21 = smov 96  }
   0x7   :  { %v6993_v16 = vshrl.u32 %v83_v15, 7  ;;  %5716 = vmatprep.mubr.msk.f32.mxu1 %vm185_vm1, %v7013_v24  ;;  %s6899_s22 = smov 32   ;;  %v7030_v42 = vld [vmem:[%s8486_s1 + $0x18] sm:$0xff]  ;;  %v7035_v43 = vld [vmem:[%s8486_s1] sm:$0xff]  ;;  %v7044_v46 = vld [vmem:[%s8486_s1 + $0x8] sm:$0xff]  ;;  %vm890_vm2 = vcmask 523264  }
   0x8   :  { %v7049_v47 = vld [vmem:[%s8486_s1 + $0x50] sm:$0xff]  ;;  %v7058_v50 = vld [vmem:[%s8486_s1 + $0x58] sm:$0xff]  ;;  %v7063_v51 = vld [vmem:[%s8486_s1 + $0x40] sm:$0xff]  ;;  %vm893_vm3 = vcmask 785408   ;;  %vm6902_vm4 = vmmov 0   ;;  %s6903_s11 = smov [#allocation2]  }
   0x9   :  { %6076 = vmatpush1.bf16.msra.mxu0 %v6973_v12  ;;  %v6996_v17 = vsub.s32 0, %v6993_v16  ;;  %v7002_v19 = vsub.s32 1, %v6993_v16  ;;  %v7072_v57 = vld [vmem:[%s8486_s1 + $0x48] sm:$0xff]  ;;  %v7077_v58 = vld [vmem:[%s8486_s1 + $0x20] sm:$0xff]  ;;  %v7105_v6 = vld [vmem:[%s8486_s1 + $0x30] sm:$0xff]  ;;  %s5382_s12 = sshll.u32 %s6903_s11, 4  ;;  %s5383_s12 = int_to_ptr.vmem [resolvable:$true] %s5382_s12 }
   0xa   :  { %v7086_v63 = vld [vmem:[%s8486_s1 + $0x28] sm:$0xff]  ;;  %v7091_v0 = vld [vmem:[%s8486_s1 + $0x60] sm:$0xff]  ;;  %v7114_v11 = vld [vmem:[%s8486_s1 + $0x38] sm:$0xff]  ;;  %s6872_s13 = scalar_lea.vmem %s5383_s12, 64  ;;  %p6877_p1 = scmp.lt.s32.totalorder %s5383_s12, %s5383_s12 }
   0xb   :  { %v7005_v21 = vrot.slane %v5399_v18, %v6996_v17  ;;  %v7008_v23 = vrot.slane %v5399_v18, %v7002_v19  ;;  %v7100_v5 = vld [vmem:[%s8486_s1 + $0x68] sm:$0xff]  ;;  %v7119_v18 = vld [vmem:[%s8486_s1 + $0x70] sm:$0xff]  ;;  %p6873_p0 = scmp.ne.s32.totalorder %s5383_s12, %s6872_s13  ;;  %p6878_p2 = scmp.lt.s32.totalorder %s6872_s13, %s6872_s13 }
   0xc   :  { %5414 = vmatmul.mubr.msk.f32.vlgmr.msra.gmra.mrb[0].mxu0 %vm93_vm0, %v6980_v13 }
   0xd   :  { %170 = vmatprep.mubr.f32.mxu0 %v6896_v7  ;;  %p6879_p3 = por %p6878_p2, %p6877_p1 }
   0xf   :  { %p6880_p4 = pnand %p6879_p3, %p6873_p0 }
  0x10   :  { %5415 = vmatmul.mubr.msk.f32.gmra.mrb[2].mxu0 %vm93_vm0, %v6988_v14 }
  0xdf   :  { %v166_v20 = vpop.f32.mrb[0].mxu0 }
  0xe0   :  { %v168_v22 = vpop.f32.mrb[1].mxu0  ;;  %v167_v26 = vadd.f32 %v166_v20, %v7005_v21  ;;  %v7128_v20 = vld [vmem:[%s8486_s1 + $0x78] sm:$0xff] }
  0xe1   :  { %v169_v29 = vadd.f32 %v168_v22, %v7008_v23  ;;  %v33_v22 = vld [vmem:[%s8488_s3 + $0x50] sm:$0xff] }
  0xe3   :  { %v172_v25 = vpop.f32.mrb[2].mxu0 }
  0xe4   :  { %v173_v27 = vadd.f32 %v172_v25, %v7005_v21  ;;  %v174_v28 = vpop.f32.mrb[3].mxu0  ;;  %v34_v25 = vld [vmem:[%s8488_s3 + $0x60] sm:$0xff] }
  0xe5   :  { %v175_v30 = vadd.f32 %v174_v28, %v7008_v23 }
  0xe6   :  { %v6659_v31 = vpack.i.bf16 %v173_v27, %v167_v26  ;;  %v6081_v32 = vpack.c.bf16 %v173_v27, %v167_v26  ;;  %v7146_v26 = vpack.c.bf16 %v34_v25, %v33_v22  ;;  %v38_v27 = vld [vmem:[%s8488_s3 + $0xa0] sm:$0xff]  ;;  %v53_v25 = vld [vmem:[%s8488_s3 + $0x190] sm:$0xff] }
  0xe7   :  { %v6664_v33 = vpack.i.bf16 %v175_v30, %v169_v29  ;;  %v6089_v34 = vpack.c.bf16 %v175_v30, %v169_v29  ;;  %v39_v29 = vld [vmem:[%s8488_s3 + $0xb0] sm:$0xff]  ;;  %v40_v30 = vld [vmem:[%s8488_s3 + $0xc0] sm:$0xff] }
  0xe8   :  { %6660 = vrot.lane.b32.xlu1 %v6659_v31, %s6897_s20  ;;  %6650 = vrot.lane.b32.xlu0 %v6659_v31, %s6898_s21  ;;  %v52_v22 = vld [vmem:[%s8488_s3 + $0x180] sm:$0xff] }
  0xe9   :  { %6110 = vmatprep.subr.bf16.mxu0 %v7146_v26 }
  0xea   :  { %6112 = vmatpush3.bf16.msra.mxu0 %v7146_v26 }
  0xec   :  { %6665 = vrot.lane.b32.xlu1 %v6664_v33, %s6897_s20  ;;  %6655 = vrot.lane.b32.xlu0 %v6664_v33, %s6898_s21 }
  0xf0   :  { %6675 = vrot.lane.b32.xlu1 %v6664_v33, %s6899_s22  ;;  %6670 = vrot.lane.b32.xlu0 %v6659_v31, %s6899_s22  ;;  %v7172_v31 = vpack.c.bf16 %v40_v30, %v39_v29  ;;  %v42_v33 = vld [vmem:[%s8488_s3 + $0xe0] sm:$0xff]  ;;  %v57_v30 = vld [vmem:[%s8488_s3 + $0x1d0] sm:$0xff] }
  0xf1   :  { %v56_v29 = vld [vmem:[%s8488_s3 + $0x1c0] sm:$0xff] }
 0x15a   :  { %v6651_v35 = vpop.permute.xlu0 %6650  ;;  %v6661_v45 = vpop.permute.xlu1 %6660 }
 0x15b   :  { %v6653_v36 = vunpack.i.h.bf16 %v6651_v35  ;;  %v6652_v37 = vunpack.i.l.bf16 %v6651_v35  ;;  %v6663_v48 = vunpack.i.h.bf16 %v6661_v45  ;;  %v6662_v49 = vunpack.i.l.bf16 %v6661_v45  ;;  %v43_v35 = vld [vmem:[%s8488_s3 + $0xf0] sm:$0xff] }
 0x15d   :  { %v6077_v38 = vpack.c.bf16 %v6653_v36, %v6652_v37  ;;  %v6093_v52 = vpack.c.bf16 %v6663_v48, %v6662_v49  ;;  %v44_v36 = vld [vmem:[%s8488_s3 + $0x100] sm:$0xff] }
 0x15e   :  { %v6656_v39 = vpop.permute.xlu0 %6655  ;;  %v6666_v53 = vpop.permute.xlu1 %6665  ;;  %v7193_v37 = vpack.c.bf16 %v44_v36, %v43_v35 }
 0x15f   :  { %v6658_v40 = vunpack.i.h.bf16 %v6656_v39  ;;  %v6657_v41 = vunpack.i.l.bf16 %v6656_v39  ;;  %6078 = vmatprep.subr.bf16.mxu1 %v6077_v38  ;;  %v6668_v54 = vunpack.i.h.bf16 %v6666_v53  ;;  %v6667_v55 = vunpack.i.l.bf16 %v6666_v53 }
 0x160   :  { %6080 = vmatpush3.bf16.msra.mxu1 %v6077_v38 }
 0x161   :  { %6082 = vmatprep.subr.bf16.mxu1 %v6081_v32  ;;  %v6085_v44 = vpack.c.bf16 %v6658_v40, %v6657_v41  ;;  %v6097_v61 = vpack.c.bf16 %v6668_v54, %v6667_v55 }
 0x162   :  { %v6671_v56 = vpop.permute.xlu0 %6670  ;;  %v6676_v62 = vpop.permute.xlu1 %6675 }
 0x163   :  { %5717 = vmatmul.mubr.msk.f32.vlgmr.msra.gmra.mrb[0].mxu1 %vm185_vm1, %v7030_v42  ;;  %v6673_v59 = vunpack.i.h.bf16 %v6671_v56  ;;  %v6672_v60 = vunpack.i.l.bf16 %v6671_v56  ;;  %v6678_v1 = vunpack.i.h.bf16 %v6676_v62  ;;  %v6677_v2 = vunpack.i.l.bf16 %v6676_v62  ;;  %v46_v56 = vld [vmem:[%s8488_s3 + $0x120] sm:$0xff]  ;;  %v49_v62 = vld [vmem:[%s8488_s3 + $0x150] sm:$0xff] }
 0x164   :  { %6084 = vmatpush3.bf16.msra.mxu1 %v6081_v32  ;;  %5723 = vmatprep.mubr.msk.f32.mxu1 %vm185_vm1, %v7035_v43  ;;  %v41_v32 = vld [vmem:[%s8488_s3 + $0xd0] sm:$0xff] }
 0x165   :  { %6086 = vmatprep.subr.bf16.mxu1 %v6085_v44  ;;  %v6101_v4 = vpack.c.bf16 %v6673_v59, %v6672_v60  ;;  %v6105_v10 = vpack.c.bf16 %v6678_v1, %v6677_v2  ;;  %v47_v59 = vld [vmem:[%s8488_s3 + $0x130] sm:$0xff]  ;;  %v48_v60 = vld [vmem:[%s8488_s3 + $0x140] sm:$0xff] }
 0x166   :  { %v7229_v1 = vpack.c.bf16 %v49_v62, %v48_v60  ;;  %v50_v2 = vld [vmem:[%s8488_s3 + $0x160] sm:$0xff] }
 0x16b   :  { %5724 = vmatmul.mubr.msk.f32.vlgmr.msra.gmra.mrb[0].mxu1 %vm185_vm1, %v7044_v46 }
 0x16c   :  { %6088 = vmatpush3.bf16.msra.mxu1 %v6085_v44  ;;  %5730 = vmatprep.mubr.msk.f32.mxu1 %vm185_vm1, %v7049_v47 }
 0x16d   :  { %6090 = vmatprep.subr.bf16.mxu1 %v6089_v34 }
 0x16f   :  { %5731 = vmatmul.mubr.msk.f32.vlgmr.msra.gmra.mrb[2].mxu1 %vm185_vm1, %v7058_v50 }
 0x170   :  { %6092 = vmatpush3.bf16.msra.mxu1 %v6089_v34  ;;  %5737 = vmatprep.mubr.msk.f32.mxu1 %vm185_vm1, %v7063_v51  ;;  %v7182_v34 = vpack.c.bf16 %v42_v33, %v41_v32  ;;  %v7270_v32 = vpack.c.bf16 %v57_v30, %v56_v29  ;;  %v7279_v33 = vld [vmem:[%s8488_s3 + $0x110] ss:$0 sm:$0xff] }
 0x171   :  { %6094 = vmatprep.subr.bf16.mxu1 %v6093_v52 }
 0x177   :  { %5738 = vmatmul.mubr.msk.f32.vlgmr.msra.gmra.mrb[2].mxu1 %vm185_vm1, %v7072_v57 }
 0x178   :  { %6096 = vmatpush3.bf16.msra.mxu1 %v6093_v52  ;;  %5744 = vmatprep.mubr.msk.f32.mxu1 %vm185_vm1, %v7077_v58 }
 0x179   :  { %6098 = vmatprep.subr.bf16.mxu1 %v6097_v61 }
 0x17b   :  { %5745 = vmatmul.mubr.msk.f32.vlgmr.msra.gmra.mrb[0].mxu1 %vm185_vm1, %v7086_v63 }
 0x17c   :  { %6100 = vmatpush3.bf16.msra.mxu1 %v6097_v61  ;;  %5751 = vmatprep.mubr.msk.f32.mxu1 %vm185_vm1, %v7091_v0  ;;  %v7224_v61 = vpack.c.bf16 %v47_v59, %v46_v56 }
 0x17d   :  { %6102 = vmatprep.subr.bf16.mxu1 %v6101_v4 }
 0x17f   :  { %5752 = vmatmul.mubr.msk.f32.vlgmr.msra.gmra.mrb[2].mxu1 %vm185_vm1, %v7100_v5 }
 0x180   :  { %6104 = vmatpush3.bf16.msra.mxu1 %v6101_v4  ;;  %5758 = vmatprep.mubr.msk.f32.mxu1 %vm185_vm1, %v7105_v6  ;;  %v51_v4 = vld [vmem:[%s8488_s3 + $0x170] sm:$0xff] }
 0x181   :  { %6106 = vmatprep.subr.bf16.mxu1 %v6105_v10 }
 0x183   :  { %5759 = vmatmul.mubr.msk.f32.vlgmr.msra.gmra.mrb[0].mxu1 %vm185_vm1, %v7114_v11 }
 0x184   :  { %6108 = vmatpush3.bf16.msra.mxu1 %v6105_v10  ;;  %5765 = vmatprep.mubr.msk.f32.mxu1 %vm185_vm1, %v7119_v18  ;;  %v7240_v10 = vpack.c.bf16 %v51_v4, %v50_v2 }
 0x185   :  { %6158 = vmatprep.subr.bf16.mxu1 %v6949_v3  ;;  %v35_v3 = vld [vmem:[%s8488_s3 + $0x70] sm:$0xff] }
 0x187   :  { %5766 = vmatmul.mubr.msk.f32.vlgmr.msra.gmra.mrb[2].mxu1 %vm185_vm1, %v7128_v20 }
 0x188   :  { %6160 = vmatpush1.bf16.msra.mxu1 %v6961_v8  ;;  %1178 = vmatprep.mubr.f32.mxu1 %v6896_v7  ;;  %v36_v8 = vld [vmem:[%s8488_s3 + $0x80] sm:$0xff] }
 0x189   :  { %6162 = vmatprep.subr.bf16.mxu1 %v6963_v9  ;;  %v7151_v9 = vpack.c.bf16 %v36_v8, %v35_v3  ;;  %v7250_v3 = vpack.c.bf16 %v53_v25, %v52_v22  ;;  %v54_v8 = vld [vmem:[%s8488_s3 + $0x1a0] sm:$0xff] }
 0x18b   :  { %6114 = vmatprep.subr.bf16.mxu0 %v7151_v9 }
 0x18c   :  { %6164 = vmatpush1.bf16.msra.mxu1 %v6973_v12  ;;  %v37_v12 = vld [vmem:[%s8488_s3 + $0x90] sm:$0xff]  ;;  %6116 = vmatpush3.bf16.msra.mxu0 %v7151_v9 }
 0x18d   :  { %v7162_v28 = vpack.c.bf16 %v38_v27, %v37_v12  ;;  %v55_v12 = vld [vmem:[%s8488_s3 + $0x1b0] sm:$0xff] }
 0x18e   :  { %v7260_v27 = vpack.c.bf16 %v55_v12, %v54_v8 }
 0x18f   :  { %6118 = vmatprep.subr.bf16.mxu0 %v7162_v28 }
 0x190   :  { %6120 = vmatpush3.bf16.msra.mxu0 %v7162_v28 }
 0x191   :  { %6122 = vmatprep.subr.bf16.mxu0 %v7172_v31 }
 0x194   :  { %6124 = vmatpush3.bf16.msra.mxu0 %v7172_v31 }
 0x195   :  { %6126 = vmatprep.subr.bf16.mxu0 %v7182_v34 }
 0x198   :  { %6128 = vmatpush3.bf16.msra.mxu0 %v7182_v34 }
 0x199   :  { %6130 = vmatprep.subr.bf16.mxu0 %v7193_v37 }
 0x19c   :  { %6132 = vmatpush3.bf16.msra.mxu0 %v7193_v37 }
 0x19d   :  { %6134 = vmatprep.subr.bf16.mxu0 %v7224_v61 }
 0x256   :  { %v5760_v38 = vpop.f32.mrb[0].mxu1 }
 0x257   :  { %v774_v39 = vpop.f32.mrb[1].mxu1 }
 0x25a   :  { %v5767_v40 = vpop.f32.mrb[2].mxu1 }
 0x25b   :  { %878 = vrot.lane.b32.xlu1 %v5767_v40, %s6899_s22  ;;  %v863_v41 = vpop.f32.mrb[3].mxu1 }
 0x25c   :  { %876 = vrot.lane.b32.xlu0 %v863_v41, %s6899_s22 }
 0x25f   :  { %886 = vrot.lane.b32.xlu1 %v6988_v14, %s6897_s20 }
 0x260   :  { %884 = vrot.lane.b32.xlu0 %v6980_v13, %s6897_s20 }
 0x2cd   :  { %v879_v44 = vpop.permute.xlu1 %878 }
 0x2ce   :  { %v877_v45 = vpop.permute.xlu0 %876  ;;  %v7207_v53 = vsel %vm93_vm0, %v5760_v38, %v879_v44 }
 0x2cf   :  { %v7204_v49 = vsel %vm93_vm0, %v774_v39, %v877_v45 }
 0x2d1   :  { %v887_v48 = vpop.permute.xlu1 %886 }
 0x2d2   :  { %v885_v52 = vpop.permute.xlu0 %884  ;;  %v892_v55 = vsel %vm890_vm2, %v7207_v53, %v887_v48 }
 0x2d3   :  { %v891_v54 = vsel %vm890_vm2, %v7204_v49, %v885_v52 }
 0x2d4   :  { %5792 = vmatprep.mubr.msk.f32.mxu0 %vm893_vm3, %v891_v54 }
 0x2d5   :  { %5793 = vmatmul.mubr.msk.f32.vlgmr.msra.gmra.mrb[4].mxu0 %vm893_vm3, %v892_v55 }
 0x2d6   :  { %6136 = vmatpush3.bf16.msra.mxu0 %v7224_v61 }
 0x2d7   :  { %6138 = vmatprep.subr.bf16.mxu0 %v7229_v1 }
 0x2da   :  { %6140 = vmatpush3.bf16.msra.mxu0 %v7229_v1 }
 0x2db   :  { %6142 = vmatprep.subr.bf16.mxu0 %v7240_v10 }
 0x2de   :  { %6144 = vmatpush3.bf16.msra.mxu0 %v7240_v10 }
 0x2df   :  { %6146 = vmatprep.subr.bf16.mxu0 %v7250_v3 }
 0x2e2   :  { %6148 = vmatpush3.bf16.msra.mxu0 %v7250_v3 }
 0x2e3   :  { %6150 = vmatprep.subr.bf16.mxu0 %v7260_v27 }
 0x2e6   :  { %6152 = vmatpush3.bf16.msra.mxu0 %v7260_v27 }
 0x2e7   :  { %6154 = vmatprep.subr.bf16.mxu0 %v7270_v32 }
 0x2ea   :  { %6156 = vmatpush3.bf16.msra.mxu0 %v7270_v32 }
 0x2eb   :  { %6198 = vmatprep.subr.bf16.mxu0 %v7146_v26 }
 0x3a8   :  { %v5794_v35 = vpop.f32.mrb[4].mxu0 }
 0x3a9   :  { %v972_v36 = vadd.f32 %v5794_v35, %v7279_v33  ;;  %v966_v38 = vpop.f32.mrb[5].mxu0 }
 0x3aa   :  { %v967_v39 = vadd.f32 %v966_v38, %v7279_v33 }
 0x3ab   :  { %v5435_v40 = vmul.f32 -1.442695, %v972_v36 }
 0x3ac   :  { %v5434_v41 = vmul.f32 -1.442695, %v967_v39 }
 0x3ad   :  { %6711 = vpow2.f32 %v5435_v40 }
 0x3ae   :  { %6713 = vpow2.f32 %v5434_v41 }
 0x3b7   :  { %v6712_v44 = vpop.eup %6711 }
 0x3b8   :  { %v6714_v45 = vpop.eup %6713  ;;  %v982_v48 = vadd.f32 1.0, %v6712_v44 }
 0x3b9   :  { %v981_v52 = vadd.f32 1.0, %v6714_v45 }
 0x3ba   :  { %6715 = vrcp.f32 %v982_v48 }
 0x3bb   :  { %6717 = vrcp.f32 %v981_v52 }
 0x3c4   :  { %v6716_v54 = vpop.eup %6715 }
 0x3c5   :  { %v6718_v55 = vpop.eup %6717  ;;  %v988_v56 = vmul.f32 %v6716_v54, %v6988_v14  ;;  %v1083_v12 = vsub.f32 1.0, %v6716_v54 }
 0x3c6   :  { %v987_v59 = vmul.f32 %v6718_v55, %v6980_v13 }
 0x3c7   :  { %993 = vrot.lane.b32.xlu1 %v988_v56, %s6897_s20 }
 0x3c8   :  { %991 = vrot.lane.b32.xlu0 %v987_v59, %s6897_s20 }
 0x3cc   :  { %1084 = vrot.lane.b32.xlu0 %v6980_v13, %s6899_s22  ;;  %v7311_v13 = vld [vmem:[%s8488_s3 + $0x1e0] ss:$0 sm:$0xff] }
 0x3d0   :  { %1086 = vrot.lane.b32.xlu0 %v6988_v14, %s6899_s22 }
 0x439   :  { %v994_v60 = vpop.permute.xlu1 %993 }
 0x43a   :  { %v992_v62 = vpop.permute.xlu0 %991  ;;  %v998_v4 = vsel %vm890_vm2, %v7207_v53, %v994_v60 }
 0x43b   :  { %v997_v2 = vsel %vm890_vm2, %v7204_v49, %v992_v62  ;;  %v1082_v49 = vsub.f32 1.0, %v6718_v55 }
 0x43c   :  { %5819 = vmatprep.mubr.msk.f32.mxu0 %vm893_vm3, %v997_v2 }
 0x43d   :  { %5820 = vmatmul.mubr.msk.f32.vlgmr.msra.gmra.mrb[6].mxu0 %vm893_vm3, %v998_v4 }
 0x43e   :  { %6200 = vmatpush3.bf16.msra.mxu0 %v7146_v26 }
 0x43f   :  { %6202 = vmatprep.subr.bf16.mxu0 %v7151_v9 }
 0x442   :  { %6204 = vmatpush3.bf16.msra.mxu0 %v7151_v9 }
 0x443   :  { %6206 = vmatprep.subr.bf16.mxu0 %v7162_v28 }
 0x446   :  { %6208 = vmatpush3.bf16.msra.mxu0 %v7162_v28 }
 0x447   :  { %6210 = vmatprep.subr.bf16.mxu0 %v7172_v31 }
 0x44a   :  { %6212 = vmatpush3.bf16.msra.mxu0 %v7172_v31 }
 0x44b   :  { %6214 = vmatprep.subr.bf16.mxu0 %v7182_v34 }
 0x44e   :  { %6216 = vmatpush3.bf16.msra.mxu0 %v7182_v34 }
 0x44f   :  { %6218 = vmatprep.subr.bf16.mxu0 %v7193_v37 }
 0x452   :  { %6220 = vmatpush3.bf16.msra.mxu0 %v7193_v37  ;;  %v7317_v37 = vpop.permute.xlu0 %1084 }
 0x453   :  { %v1090_v22 = vmul.f32 %v7317_v37, %v1082_v49 }
 0x456   :  { %v7320_v8 = vpop.permute.xlu0 %1086 }
 0x457   :  { %v1091_v35 = vmul.f32 %v7320_v8, %v1083_v12 }
 0x510   :  { %v5821_v14 = vpop.f32.mrb[6].mxu0 }
 0x511   :  { %v1071_v26 = vpop.f32.mrb[7].mxu0  ;;  %v1077_v28 = vadd.f32 %v5821_v14, %v7311_v13 }
 0x512   :  { %v1072_v9 = vadd.f32 %v1071_v26, %v7311_v13 }
 0x514   :  { %6719 = vtanh.f32 %v1072_v9 }
 0x515   :  { %6721 = vtanh.f32 %v1077_v28 }
 0x51e   :  { %v6720_v31 = vpop.eup %6719 }
 0x51f   :  { %1094 = vrot.lane.b32.xlu1 %v6720_v31, %s6899_s22  ;;  %v6722_v34 = vpop.eup %6721 }
 0x523   :  { %1096 = vrot.lane.b32.xlu1 %v6722_v34, %s6899_s22 }
 0x591   :  { %v1095_v53 = vpop.permute.xlu1 %1094 }
 0x592   :  { %v1100_v25 = vmul.f32 %v6718_v55, %v1095_v53 }
 0x594   :  { %v7322_v29 = vadd.f32 %v1100_v25, %v1090_v22 }
 0x595   :  { %v1097_v30 = vpop.permute.xlu1 %1096 }
 0x596   :  { %v1101_v36 = vmul.f32 %v6716_v54, %v1097_v30  ;;  %1106 = vrot.lane.b32.xlu0 %v7322_v29, %s6898_s21 }
 0x598   :  { %v7327_v38 = vadd.f32 %v1101_v36, %v1091_v35 }
 0x59a   :  { %1108 = vrot.lane.b32.xlu1 %v7327_v38, %s6898_s21 }
 0x608   :  { %v7331_v39 = vpop.permute.xlu0 %1106 }
 0x609   :  { %5438 = vmatmul.mubr.msk.f32.vlgmr.msra.gmra.mrb[4].mxu1 %vm93_vm0, %v7331_v39 }
 0x60a   :  { %1184 = vmatprep.mubr.f32.mxu1 %v6896_v7 }
 0x60c   :  { %v7336_v40 = vpop.permute.xlu1 %1108 }
 0x60d   :  { %5439 = vmatmul.mubr.msk.f32.gmra.mrb[6].mxu1 %vm93_vm0, %v7336_v40 }
 0x60e   :  { %5826 = vmatprep.mubr.msk.f32.mxu1 %vm185_vm1, %v7013_v24 }
 0x6dc   :  { %v1180_v41 = vpop.f32.mrb[4].mxu1 }
 0x6dd   :  { %v1182_v44 = vpop.f32.mrb[5].mxu1  ;;  %v1181_v48 = vadd.f32 %v1180_v41, %v7005_v21 }
 0x6de   :  { %v1183_v55 = vadd.f32 %v1182_v44, %v7008_v23 }
 0x6e0   :  { %v1186_v45 = vpop.f32.mrb[6].mxu1 }
 0x6e1   :  { %v1187_v52 = vadd.f32 %v1186_v45, %v7005_v21  ;;  %v1188_v54 = vpop.f32.mrb[7].mxu1 }
 0x6e2   :  { %v1189_v56 = vadd.f32 %v1188_v54, %v7008_v23 }
 0x6e3   :  { %v6679_v59 = vpack.i.bf16 %v1187_v52, %v1181_v48  ;;  %v6169_v60 = vpack.c.bf16 %v1187_v52, %v1181_v48 }
 0x6e4   :  { %v6684_v62 = vpack.i.bf16 %v1189_v56, %v1183_v55  ;;  %v6177_v2 = vpack.c.bf16 %v1189_v56, %v1183_v55 }
 0x6e5   :  { %6680 = vrot.lane.b32.xlu0 %v6679_v59, %s6898_s21 }
 0x6e6   :  { %6685 = vrot.lane.b32.xlu1 %v6684_v62, %s6898_s21 }
 0x6e9   :  { %6690 = vrot.lane.b32.xlu0 %v6679_v59, %s6897_s20 }
 0x6ea   :  { %6695 = vrot.lane.b32.xlu1 %v6684_v62, %s6897_s20 }
 0x6ed   :  { %6700 = vrot.lane.b32.xlu0 %v6679_v59, %s6899_s22 }
 0x6ee   :  { %6705 = vrot.lane.b32.xlu1 %v6684_v62, %s6899_s22 }
 0x757   :  { %v6681_v21 = vpop.permute.xlu0 %6680 }
 0x758   :  { %v6683_v24 = vunpack.i.h.bf16 %v6681_v21  ;;  %v6682_v4 = vunpack.i.l.bf16 %v6681_v21  ;;  %v6686_v23 = vpop.permute.xlu1 %6685 }
 0x759   :  { %v6688_v26 = vunpack.i.h.bf16 %v6686_v23  ;;  %v6687_v9 = vunpack.i.l.bf16 %v6686_v23 }
 0x75a   :  { %v6165_v14 = vpack.c.bf16 %v6683_v24, %v6682_v4 }
 0x75b   :  { %v6173_v28 = vpack.c.bf16 %v6688_v26, %v6687_v9  ;;  %v6691_v31 = vpop.permute.xlu0 %6690  ;;  %v2074_v26 = vld [vmem:[%s8488_s3 + $0x200] sm:$0xff]  ;;  %v2075_v9 = vld [vmem:[%s8488_s3 + $0x210] sm:$0xff] }
 0x75c   :  { %6166 = vmatprep.subr.bf16.mxu1 %v6165_v14  ;;  %v6693_v34 = vunpack.i.h.bf16 %v6691_v31  ;;  %v6692_v49 = vunpack.i.l.bf16 %v6691_v31  ;;  %v6696_v53 = vpop.permute.xlu1 %6695  ;;  %v2076_v31 = vld [vmem:[%s8488_s3 + $0x220] sm:$0xff] }
 0x75d   :  { %6168 = vmatpush3.bf16.msra.mxu1 %v6165_v14  ;;  %v6697_v22 = vunpack.i.l.bf16 %v6696_v53  ;;  %v2073_v14 = vld [vmem:[%s8488_s3 + $0x1f0] sm:$0xff] }
 0x75e   :  { %6170 = vmatprep.subr.bf16.mxu1 %v6169_v60 }
 0x75f   :  { %v6701_v25 = vpop.permute.xlu0 %6700 }
 0x760   :  { %5827 = vmatmul.mubr.msk.f32.vlgmr.msra.gmra.mrb[8].mxu1 %vm185_vm1, %v7030_v42  ;;  %v6181_v42 = vpack.c.bf16 %v6693_v34, %v6692_v49  ;;  %v6703_v12 = vunpack.i.h.bf16 %v6701_v25  ;;  %v6706_v30 = vpop.permute.xlu1 %6705  ;;  %v2077_v34 = vld [vmem:[%s8488_s3 + $0x230] sm:$0xff]  ;;  %v2078_v49 = vld [vmem:[%s8488_s3 + $0x240] sm:$0xff] }
 0x761   :  { %6172 = vmatpush3.bf16.msra.mxu1 %v6169_v60  ;;  %5833 = vmatprep.mubr.msk.f32.mxu1 %vm185_vm1, %v7035_v43  ;;  %v6698_v43 = vunpack.i.h.bf16 %v6696_v53  ;;  %v6707_v35 = vunpack.i.l.bf16 %v6706_v30  ;;  %v2079_v53 = vld [vmem:[%s8488_s3 + $0x250] sm:$0xff] }
 0x762   :  { %6174 = vmatprep.subr.bf16.mxu1 %v6173_v28 }
 0x768   :  { %5834 = vmatmul.mubr.msk.f32.vlgmr.msra.gmra.mrb[8].mxu1 %vm185_vm1, %v7044_v46  ;;  %v6702_v46 = vunpack.i.l.bf16 %v6701_v25 }
 0x769   :  { %6176 = vmatpush3.bf16.msra.mxu1 %v6173_v28  ;;  %5840 = vmatprep.mubr.msk.f32.mxu1 %vm185_vm1, %v7049_v47  ;;  %v6185_v47 = vpack.c.bf16 %v6698_v43, %v6697_v22  ;;  %v6245_v28 = vpack.c.bf16 %v2074_v26, %v2073_v14  ;;  %v2080_v43 = vld [vmem:[%s8488_s3 + $0x260] sm:$0xff] }
 0x76a   :  { %6178 = vmatprep.subr.bf16.mxu1 %v6177_v2 }
 0x76b   :  { %6246 = vmatprep.subr.bf16.mxu0 %v6245_v28 }
 0x76c   :  { %5841 = vmatmul.mubr.msk.f32.vlgmr.msra.gmra.mrb[10].mxu1 %vm185_vm1, %v7058_v50  ;;  %v6708_v50 = vunpack.i.h.bf16 %v6706_v30  ;;  %v2349_v30 = vld [vmem:[%s8488_s3 + $0x2b0] sm:$0xff] }
 0x76d   :  { %6180 = vmatpush3.bf16.msra.mxu1 %v6177_v2  ;;  %5847 = vmatprep.mubr.msk.f32.mxu1 %vm185_vm1, %v7063_v51  ;;  %v6189_v51 = vpack.c.bf16 %v6703_v12, %v6702_v46  ;;  %v6257_v12 = vpack.c.bf16 %v2080_v43, %v2079_v53  ;;  %v6900_v46 = vmov 0  }
 0x76e   :  { %6182 = vmatprep.subr.bf16.mxu1 %v6181_v42  ;;  %6709 = vset.pattern.permute.xlu0 %v6900_v46 }
 0x76f   :  { %6710 = vset.pattern.permute.xlu1 %v6900_v46 }
 0x774   :  { %5848 = vmatmul.mubr.msk.f32.vlgmr.msra.gmra.mrb[10].mxu1 %vm185_vm1, %v7072_v57  ;;  %v6193_v57 = vpack.c.bf16 %v6708_v50, %v6707_v35  ;;  %v2350_v50 = vld [vmem:[%s8488_s3 + $0x2c0] sm:$0xff] }
 0x775   :  { %6184 = vmatpush3.bf16.msra.mxu1 %v6181_v42  ;;  %5854 = vmatprep.mubr.msk.f32.mxu1 %vm185_vm1, %v7077_v58  ;;  %v6253_v42 = vpack.c.bf16 %v2078_v49, %v2077_v34 }
 0x776   :  { %6186 = vmatprep.subr.bf16.mxu1 %v6185_v47 }
 0x778   :  { %5855 = vmatmul.mubr.msk.f32.vlgmr.msra.gmra.mrb[8].mxu1 %vm185_vm1, %v7086_v63 }
 0x779   :  { %6188 = vmatpush3.bf16.msra.mxu1 %v6185_v47  ;;  %5861 = vmatprep.mubr.msk.f32.mxu1 %vm185_vm1, %v7091_v0  ;;  %v2348_v47 = vld [vmem:[%s8488_s3 + $0x2a0] sm:$0xff] }
 0x77a   :  { %6190 = vmatprep.subr.bf16.mxu1 %v6189_v51 }
 0x77c   :  { %5862 = vmatmul.mubr.msk.f32.vlgmr.msra.gmra.mrb[10].mxu1 %vm185_vm1, %v7100_v5 }
 0x77d   :  { %6192 = vmatpush3.bf16.msra.mxu1 %v6189_v51  ;;  %5868 = vmatprep.mubr.msk.f32.mxu1 %vm185_vm1, %v7105_v6  ;;  %v6901_v51 = vmov 0.0|0.0  }
 0x77e   :  { %6194 = vmatprep.subr.bf16.mxu1 %v6193_v57 }
 0x780   :  { %5869 = vmatmul.mubr.msk.f32.vlgmr.msra.gmra.mrb[8].mxu1 %vm185_vm1, %v7114_v11 }
 0x781   :  { %6196 = vmatpush3.bf16.msra.mxu1 %v6193_v57  ;;  %5875 = vmatprep.mubr.msk.f32.mxu1 %vm185_vm1, %v7119_v18  ;;  %v7459_v57 = vpack.c.bf16 %v2349_v30, %v2348_v47 }
 0x782   :  { %6222 = vmatprep.subr.bf16.mxu1 %v7224_v61 }
 0x784   :  { %5876 = vmatmul.mubr.msk.f32.vlgmr.msra.gmra.mrb[10].mxu1 %vm185_vm1, %v7128_v20 }
 0x785   :  { %6224 = vmatpush3.bf16.msra.mxu1 %v7224_v61 }
 0x786   :  { %6226 = vmatprep.subr.bf16.mxu1 %v7229_v1 }
 0x789   :  { %6228 = vmatpush3.bf16.msra.mxu1 %v7229_v1 }
 0x78a   :  { %6230 = vmatprep.subr.bf16.mxu1 %v7240_v10 }
 0x78d   :  { %6232 = vmatpush3.bf16.msra.mxu1 %v7240_v10 }
 0x78e   :  { %6234 = vmatprep.subr.bf16.mxu1 %v7250_v3 }
 0x791   :  { %6236 = vmatpush3.bf16.msra.mxu1 %v7250_v3 }
 0x792   :  { %6238 = vmatprep.subr.bf16.mxu1 %v7260_v27 }
 0x795   :  { %6240 = vmatpush3.bf16.msra.mxu1 %v7260_v27 }
 0x796   :  { %6242 = vmatprep.subr.bf16.mxu1 %v7270_v32 }
 0x799   :  { %6244 = vmatpush3.bf16.msra.mxu1 %v7270_v32 }
 0x79a   :  { %6268 = vmatprep.subr.bf16.mxu1 %v6901_v51 }
 0x853   :  { %v5870_v58 = vpop.f32.mrb[8].mxu1 }
 0x854   :  { %v1745_v63 = vpop.f32.mrb[9].mxu1 }
 0x857   :  { %v5877_v0 = vpop.f32.mrb[10].mxu1 }
 0x858   :  { %1843 = vrot.lane.b32.xlu1 %v5877_v0, %s6899_s22  ;;  %v1828_v5 = vpop.f32.mrb[11].mxu1 }
 0x859   :  { %1841 = vrot.lane.b32.xlu0 %v1828_v5, %s6899_s22 }
 0x85c   :  { %1851 = vrot.lane.b32.xlu1 %v7327_v38, %s6899_s22 }
 0x85d   :  { %1849 = vrot.lane.b32.xlu0 %v7322_v29, %s6899_s22 }
 0x8ca   :  { %v1844_v6 = vpop.permute.xlu1 %1843 }
 0x8cb   :  { %v1842_v11 = vpop.permute.xlu0 %1841  ;;  %v1848_v1 = vsel %vm93_vm0, %v5870_v58, %v1844_v6  ;;  %v2351_v58 = vld [vmem:[%s8488_s3 + $0x2d0] sm:$0xff] }
 0x8cc   :  { %v1847_v20 = vsel %vm93_vm0, %v1745_v63, %v1842_v11  ;;  %v7469_v0 = vpack.c.bf16 %v2351_v58, %v2350_v50 }
 0x8ce   :  { %v1852_v18 = vpop.permute.xlu1 %1851 }
 0x8cf   :  { %v1850_v61 = vpop.permute.xlu0 %1849  ;;  %v1856_v3 = vsel %vm890_vm2, %v1848_v1, %v1852_v18 }
 0x8d0   :  { %v1855_v10 = vsel %vm890_vm2, %v1847_v20, %v1850_v61 }
 0x8d1   :  { %5902 = vmatprep.mubr.msk.f32.mxu0 %vm893_vm3, %v1855_v10 }
 0x8d2   :  { %5903 = vmatmul.mubr.msk.f32.vlgmr.msra.gmra.mrb[8].mxu0 %vm893_vm3, %v1856_v3  ;;  %v2252_v3 = vld [vmem:[%s8487_s2 + $0x8] sm:$0xf] }
 0x8d3   :  { %6248 = vmatpush3.bf16.msra.mxu0 %v6245_v28 }
 0x9a5   :  { %v5904_v27 = vpop.f32.mrb[8].mxu0 }
 0x9a6   :  { %v1935_v32 = vadd.f32 %v5904_v27, %v7279_v33  ;;  %v1929_v36 = vpop.f32.mrb[9].mxu0 }
 0x9a7   :  { %v1930_v41 = vadd.f32 %v1929_v36, %v7279_v33 }
 0x9a8   :  { %v5459_v44 = vmul.f32 -1.442695, %v1935_v32 }
 0x9a9   :  { %v5458_v45 = vmul.f32 -1.442695, %v1930_v41 }
 0x9aa   :  { %6723 = vpow2.f32 %v5459_v44  ;;  %v7506_v44 = vld [vmem:[%s8488_s3 + $0x2e0] ss:$0 sm:$0xff] }
 0x9ab   :  { %6725 = vpow2.f32 %v5458_v45 }
 0x9b4   :  { %v6724_v48 = vpop.eup %6723 }
 0x9b5   :  { %v6726_v52 = vpop.eup %6725  ;;  %v1945_v54 = vadd.f32 1.0, %v6724_v48 }
 0x9b6   :  { %v1944_v55 = vadd.f32 1.0, %v6726_v52 }
 0x9b7   :  { %6727 = vrcp.f32 %v1945_v54 }
 0x9b8   :  { %6729 = vrcp.f32 %v1944_v55 }
 0x9c1   :  { %v6728_v56 = vpop.eup %6727 }
 0x9c2   :  { %v7408_v59 = vpop.eup %6729  ;;  %v1953_v60 = vmul.f32 %v6728_v56, %v7336_v40  ;;  %v2048_v35 = vsub.f32 1.0, %v6728_v56 }
 0x9c3   :  { %v1952_v62 = vmul.f32 %v7408_v59, %v7331_v39  ;;  %v2047_v63 = vsub.f32 1.0, %v7408_v59 }
 0x9c4   :  { %1958 = vrot.lane.b32.xlu1 %v1953_v60, %s6897_s20  ;;  %v2050_v6 = vmul.f32 %v2048_v35, %v7327_v38  ;;  %v2251_v38 = vld [vmem:[%s8487_s2] sm:$0xff] }
 0x9c5   :  { %1956 = vrot.lane.b32.xlu0 %v1952_v62, %s6897_s20  ;;  %v7515_v62 = vand.u32 127, %v83_v15 }
 0xa36   :  { %v1959_v33 = vpop.permute.xlu1 %1958 }
 0xa37   :  { %v1957_v2 = vpop.permute.xlu0 %1956  ;;  %v1963_v24 = vsel %vm890_vm2, %v1848_v1, %v1959_v33 }
 0xa38   :  { %v1962_v21 = vsel %vm890_vm2, %v1847_v20, %v1957_v2  ;;  %v2049_v20 = vmul.f32 %v2047_v63, %v7322_v29  ;;  %v2165_v29 = vld [vmem:[%s8487_s2 + $0x20] sm:$0x3] }
 0xa39   :  { %5929 = vmatprep.mubr.msk.f32.mxu1 %vm893_vm3, %v1962_v21  ;;  %v2265_v21 = vld [vmem:[%s8488_s3 + $0x280] sm:$0xff] }
 0xa3a   :  { %5930 = vmatmul.mubr.msk.f32.vlgmr.msra.gmra.mrb[12].mxu1 %vm893_vm3, %v1963_v24  ;;  %v2266_v24 = vld [vmem:[%s8488_s3 + $0x290] sm:$0xff] }
 0xa3b   :  { %5973 = vmatprep.mubr.msk.f32.mxu1 %vm6902_vm4, %v6896_v7  ;;  %6270 = vmatpush3.bf16.msra.mxu1 %v7459_v57 }
 0xa3c   :  { %6271 = vmatprep.subr.bf16.mxu1 %v6901_v51 }
 0xa3f   :  { %6273 = vmatpush3.bf16.msra.mxu1 %v7469_v0 }
 0xa40   :  { %6280 = vmatprep.subr.bf16.mxu1 %v6901_v51 }
 0xa42   :  { %5974 = vmatmul.mubr.f32.vlgmr.msra.gmra.mrb[14].mxu1 %v6896_v7 }
 0xa43   :  { %6282 = vmatpush3.bf16.msra.mxu1 %v7459_v57  ;;  %5995 = vmatprep.mubr.msk.f32.mxu1 %vm6902_vm4, %v6896_v7 }
 0xa44   :  { %6283 = vmatprep.subr.bf16.mxu1 %v6901_v51 }
 0xa47   :  { %6285 = vmatpush3.bf16.msra.mxu1 %v7469_v0 }
 0xa48   :  { %6292 = vmatprep.subr.bf16.mxu1 %v6901_v51 }
 0xb0d   :  { %v5931_v4 = vpop.f32.mrb[12].mxu1 }
 0xb0e   :  { %v2042_v40 = vadd.f32 %v5931_v4, %v7311_v13  ;;  %v2036_v23 = vpop.f32.mrb[13].mxu1 }
 0xb0f   :  { %v2037_v39 = vadd.f32 %v2036_v23, %v7311_v13  ;;  %v6249_v13 = vpack.c.bf16 %v2076_v31, %v2075_v9  ;;  %v6264_v23 = vpack.c.bf16 %v2266_v24, %v2265_v21 }
 0xb10   :  { %6731 = vtanh.f32 %v2042_v40 }
 0xb11   :  { %6733 = vtanh.f32 %v2037_v39  ;;  %6250 = vmatprep.subr.bf16.mxu0 %v6249_v13 }
 0xb12   :  { %6252 = vmatpush3.bf16.msra.mxu0 %v6249_v13 }
 0xb13   :  { %6254 = vmatprep.subr.bf16.mxu0 %v6253_v42 }
 0xb15   :  { %v2422_v45 = vpop.f32.mrb[14].mxu1 }
 0xb16   :  { %6256 = vmatpush3.bf16.msra.mxu0 %v6253_v42  ;;  %v2423_v48 = vadd.f32 %v2422_v45, %v7506_v44  ;;  %v5975_v52 = vpop.f32.mrb[15].mxu1 }
 0xb17   :  { %6258 = vmatprep.subr.bf16.mxu0 %v6257_v12 }
 0xb1a   :  { %v6732_v22 = vpop.eup %6731  ;;  %6260 = vmatpush3.bf16.msra.mxu0 %v6257_v12 }
 0xb1b   :  { %v6734_v25 = vpop.eup %6733  ;;  %2055 = vrot.lane.b32.xlu1 %v6732_v22, %s6899_s22  ;;  %6261 = vmatprep.subr.bf16.mxu0 %v6901_v51 }
 0xb1c   :  { %2053 = vrot.lane.b32.xlu0 %v6734_v25, %s6899_s22 }
 0xb8d   :  { %v2056_v5 = vpop.permute.xlu1 %2055 }
 0xb8e   :  { %v2060_v11 = vmul.f32 %v6728_v56, %v2056_v5  ;;  %v2054_v18 = vpop.permute.xlu0 %2053 }
 0xb8f   :  { %v2059_v61 = vmul.f32 %v7408_v59, %v2054_v18  ;;  %v2170_v59 = vmul.u32 8, %v6993_v16 }
 0xb90   :  { %v2062_v1 = vadd.f32 %v2060_v11, %v2050_v6 }
 0xb91   :  { %v2061_v10 = vadd.f32 %v2059_v61, %v2049_v20 }
 0xb92   :  { %2067 = vrot.lane.b32.xlu1 %v2062_v1, %s6898_s21 }
 0xb93   :  { %2065 = vrot.lane.b32.xlu0 %v2061_v10, %s6898_s21 }
 0xb96   :  { %2254 = vperm.xlu1 %6710, %v2251_v38  }
 0xb97   :  { %2172 = vperm.xlu0 %6709, %v2165_v29  }
 0xb9a   :  { %2257 = vperm.xlu1 %6710, %v2252_v3  }
 0xb9b   :  { %2434 = vrot.lane.b32.xlu0 %v2423_v48, %s6897_s20 }
 0xc04   :  { %v2068_v27 = vpop.permute.xlu1 %2067 }
 0xc05   :  { %v2066_v32 = vpop.permute.xlu0 %2065  ;;  %v2072_v41 = vsel %vm93_vm0, %v2068_v27, %v7320_v8 }
 0xc06   :  { %v2071_v36 = vsel %vm93_vm0, %v2066_v32, %v7317_v37  ;;  %v2081_v37 = vld [vmem:[%s8488_s3 + $0x270] ss:$0 sm:$0xff] }
 0xc07   :  { %5948 = vmatprep.mubr.msk.f32.mxu0 %vm890_vm2, %v2071_v36 }
 0xc08   :  { %5949 = vmatmul.mubr.msk.f32.vlgmr.msra.gmra.mrb[10].mxu0 %vm890_vm2, %v2072_v41 }
 0xc09   :  { %5955 = vmatprep.mubr.msk.f32.mxu0 %vm6902_vm4, %v6896_v7 }
 0xc15   :  { %v2255_v2 = vpop.permute.xlu1 %2254 }
 0xc16   :  { %v2173_v60 = vpop.permute.xlu0 %2172  ;;  %vm2259_vm6 = vcmp.eq.s32.totalorder %v7515_v62, %v2255_v2 }
 0xc17   :  { %v2174_v33 = vadd.s32 %v2173_v60, %v2170_v59  ;;  %v5466_v14 = vsel %vm2259_vm6, 1.0, %v6896_v7 }
 0xc19   :  { %vm2175_vm5 = vcmp.eq.s32.totalorder %v7515_v62, %v2174_v33  ;;  %v2258_v39 = vpop.permute.xlu1 %2257 }
 0xc1a   :  { %v5464_v15 = vsel %vm2175_vm5, 1.0, %v6896_v7  ;;  %vm2260_vm7 = vcmp.eq.s32.totalorder %v7515_v62, %v2258_v39  ;;  %v2435_v43 = vpop.permute.xlu0 %2434 }
 0xc1b   :  { %v5467_v26 = vsel %vm2260_vm7, 1.0, %v6896_v7 }
 0xcdb   :  { %v5950_v8 = vpop.f32.mrb[10].mxu0 }
 0xcdc   :  { %v2160_v54 = vadd.f32 %v5950_v8, %v2081_v37  ;;  %v2154_v55 = vpop.f32.mrb[11].mxu0 }
 0xcdd   :  { %v2155_v56 = vadd.f32 %v2154_v55, %v2081_v37 }
 0xcde   :  { %6735 = vtanh.f32 %v2160_v54 }
 0xcdf   :  { %6737 = vtanh.f32 %v2155_v56 }
 0xce8   :  { %v6736_v4 = vpop.eup %6735 }
 0xce9   :  { %v6738_v40 = vpop.eup %6737 }
 0xcea   :  { %v6262_v16 = vpack.c.bf16 %v6736_v4, %v6738_v40 }
 0xcec   :  { %6263 = vmatpush3.bf16.msra.mxu0 %v6262_v16 }
 0xced   :  { %6265 = vmatprep.subr.bf16.mxu0 %v6264_v23 }
 0xcef   :  { %5956 = vmatmul.mubr.msk.f32.vlgmr.msra.gmra.mrb[12].mxu0 %vm185_vm1, %v5464_v15 }
 0xcf0   :  { %6267 = vmatpush3.bf16.msra.mxu0 %v6264_v23  ;;  %5962 = vmatprep.mubr.msk.f32.mxu0 %vm185_vm1, %v5466_v14 }
 0xcf1   :  { %6274 = vmatprep.subr.bf16.mxu0 %v6901_v51 }
 0xcf3   :  { %5963 = vmatmul.mubr.msk.f32.vlgmr.msra.gmra.mrb[14].mxu0 %vm185_vm1, %v5467_v26 }
 0xcf4   :  { %6276 = vmatpush3.bf16.msra.mxu0 %v7459_v57  ;;  %5984 = vmatprep.mubr.msk.f32.mxu0 %vm6902_vm4, %v6896_v7 }
 0xcf5   :  { %6277 = vmatprep.subr.bf16.mxu0 %v6901_v51 }
 0xcf8   :  { %6279 = vmatpush3.bf16.msra.mxu0 %v7469_v0 }
 0xcf9   :  { %6286 = vmatprep.subr.bf16.mxu0 %v6901_v51 }
 0xdc2   :  { %v7539_v9 = vpop.f32.mrb[12].mxu0 }
 0xdc3   :  { %v5957_v28 = vpop.f32.mrb[13].mxu0 }
 0xdc6   :  { %v7541_v31 = vpop.f32.mrb[14].mxu0 }
 0xdc7   :  { %v7543_v13 = vpop.f32.mrb[15].mxu0 }
 0xdc8   :  { %v2426_v34 = vadd.f32 %v2423_v48, %v7543_v13 }
 0xdca   :  { %v5470_v49 = vmul.f32 -1.442695, %v2426_v34 }
 0xdcc   :  { %6739 = vpow2.f32 %v5470_v49 }
 0xdd6   :  { %v6740_v42 = vpop.eup %6739 }
 0xdd7   :  { %v2430_v53 = vadd.f32 1.0, %v6740_v42 }
 0xdd9   :  { %6741 = vrcp.f32 %v2430_v53 }
 0xde3   :  { %v6742_v22 = vpop.eup %6741 }
 0xde4   :  { %v2437_v25 = vmul.f32 %v6742_v22, %v2435_v43  ;;  %v2444_v50 = vsub.f32 1.0, %v6742_v22  ;;  %v2450_v58 = vmul.f32 0.0, %v6742_v22 }
 0xde6   :  { %2439 = vrot.lane.b32.xlu1 %v2437_v25, %s6897_s20 }
 0xe58   :  { %v2440_v12 = vpop.permute.xlu1 %2439 }
 0xe59   :  { %v2442_v47 = vadd.f32 %v2440_v12, %v7543_v13 }
 0xe5b   :  { %6743 = vtanh.f32 %v2442_v47 }
 0xe65   :  { %v6744_v30 = vpop.eup %6743 }
 0xe66   :  { %2446 = vrot.lane.b32.xlu0 %v6744_v30, %s6898_s21 }
 0xed8   :  { %v2447_v35 = vpop.permute.xlu0 %2446 }
 0xed9   :  { %v2449_v63 = vmul.f32 %v2447_v35, %v2444_v50 }
 0xedb   :  { %v2451_v5 = vadd.f32 %v2450_v58, %v2449_v63 }
 0xedd   :  { %2453 = vrot.lane.b32.xlu1 %v2451_v5, %s6898_s21  ;;  %v2553_v48 = vrot.slane %v2451_v5, 6 }
 0xf4f   :  { %v2454_v6 = vpop.permute.xlu1 %2453 }
 0xf50   :  { %5985 = vmatmul.mubr.msk.f32.vlgmr.msra.gmra.mrb[16].mxu0 %vm93_vm0, %v2454_v6 }
 0xf51   :  { %6288 = vmatpush3.bf16.msra.mxu0 %v7459_v57  ;;  %6006 = vmatprep.mubr.msk.f32.mxu0 %vm6902_vm4, %v6896_v7 }
 0xf52   :  { %6289 = vmatprep.subr.bf16.mxu0 %v6901_v51 }
 0xf55   :  { %6291 = vmatpush3.bf16.msra.mxu0 %v7469_v0 }
 0xf56   :  { %6298 = vmatprep.subr.bf16.mxu0 %v6901_v51 }
0x1023   :  { %v2523_v11 = vpop.f32.mrb[16].mxu0 }
0x1024   :  { %v2524_v18 = vadd.f32 %v2523_v11, %v7506_v44  ;;  %v5986_v20 = vpop.f32.mrb[17].mxu0 }
0x1026   :  { %v2528_v61 = vrot.slane %v2524_v18, 6 }
0x1028   :  { %v2530_v1 = vadd.f32 %v2528_v61, %v7543_v13  ;;  %2537 = vrot.lane.b32.xlu0 %v2528_v61, %s6897_s20 }
0x102a   :  { %v5472_v10 = vmul.f32 -1.442695, %v2530_v1 }
0x102c   :  { %6745 = vpow2.f32 %v5472_v10 }
0x1036   :  { %v6746_v38 = vpop.eup %6745 }
0x1037   :  { %v2534_v29 = vadd.f32 1.0, %v6746_v38 }
0x1039   :  { %6747 = vrcp.f32 %v2534_v29 }
0x1043   :  { %v6748_v3 = vpop.eup %6747 }
0x1044   :  { %v2547_v52 = vsub.f32 1.0, %v6748_v3  ;;  %v2555_v54 = vmul.f32 %v6748_v3, %v2553_v48 }
0x109a   :  { %v2538_v27 = vpop.permute.xlu0 %2537 }
0x109b   :  { %v2540_v32 = vmul.f32 %v6748_v3, %v2538_v27 }
0x109d   :  { %2542 = vrot.lane.b32.xlu1 %v2540_v32, %s6897_s20 }
0x110f   :  { %v2543_v36 = vpop.permute.xlu1 %2542 }
0x1110   :  { %v2545_v41 = vadd.f32 %v2543_v36, %v7543_v13 }
0x1112   :  { %6749 = vtanh.f32 %v2545_v41 }
0x111c   :  { %v6750_v45 = vpop.eup %6749 }
0x111d   :  { %2549 = vrot.lane.b32.xlu0 %v6750_v45, %s6898_s21 }
0x118f   :  { %v2550_v37 = vpop.permute.xlu0 %2549 }
0x1190   :  { %v2552_v8 = vmul.f32 %v2550_v37, %v2547_v52 }
0x1192   :  { %v2556_v55 = vadd.f32 %v2555_v54, %v2552_v8 }
0x1194   :  { %v2558_v56 = vrot.slane %v2556_v55, 2  ;;  %v2659_v34 = vrot.slane %v2556_v55, 6 }
0x1196   :  { %2559 = vrot.lane.b32.xlu1 %v2558_v56, %s6898_s21 }
0x1208   :  { %v2560_v59 = vpop.permute.xlu1 %2559 }
0x1209   :  { %5996 = vmatmul.mubr.msk.f32.vlgmr.msra.gmra.mrb[16].mxu1 %vm93_vm0, %v2560_v59 }
0x120a   :  { %6294 = vmatpush3.bf16.msra.mxu1 %v7459_v57  ;;  %6017 = vmatprep.mubr.msk.f32.mxu1 %vm6902_vm4, %v6896_v7 }
0x120b   :  { %6295 = vmatprep.subr.bf16.mxu1 %v6901_v51 }
0x120e   :  { %6297 = vmatpush3.bf16.msra.mxu1 %v7469_v0 }
0x120f   :  { %6304 = vmatprep.subr.bf16.mxu1 %v6901_v51 }
0x12dc   :  { %v2629_v60 = vpop.f32.mrb[16].mxu1 }
0x12dd   :  { %v2630_v33 = vadd.f32 %v2629_v60, %v7506_v44  ;;  %v5997_v2 = vpop.f32.mrb[17].mxu1 }
0x12df   :  { %v2634_v21 = vrot.slane %v2630_v33, 4 }
0x12e1   :  { %v2636_v24 = vadd.f32 %v2634_v21, %v7543_v13  ;;  %2643 = vrot.lane.b32.xlu0 %v2634_v21, %s6897_s20 }
0x12e3   :  { %v5474_v4 = vmul.f32 -1.442695, %v2636_v24 }
0x12e5   :  { %6751 = vpow2.f32 %v5474_v4 }
0x12ef   :  { %v6752_v40 = vpop.eup %6751 }
0x12f0   :  { %v2640_v23 = vadd.f32 1.0, %v6752_v40 }
0x12f2   :  { %6753 = vrcp.f32 %v2640_v23 }
0x12fc   :  { %v6754_v16 = vpop.eup %6753 }
0x12fd   :  { %v2653_v49 = vsub.f32 1.0, %v6754_v16  ;;  %v2661_v53 = vmul.f32 %v6754_v16, %v2659_v34 }
0x1353   :  { %v2644_v15 = vpop.permute.xlu0 %2643 }
0x1354   :  { %v2646_v39 = vmul.f32 %v6754_v16, %v2644_v15 }
0x1356   :  { %2648 = vrot.lane.b32.xlu1 %v2646_v39, %s6897_s20 }
0x13c8   :  { %v2649_v14 = vpop.permute.xlu1 %2648 }
0x13c9   :  { %v2651_v26 = vadd.f32 %v2649_v14, %v7543_v13 }
0x13cb   :  { %6755 = vtanh.f32 %v2651_v26 }
0x13d5   :  { %v6756_v28 = vpop.eup %6755 }
0x13d6   :  { %2655 = vrot.lane.b32.xlu0 %v6756_v28, %s6898_s21 }
0x1448   :  { %v2656_v42 = vpop.permute.xlu0 %2655 }
0x1449   :  { %v2658_v43 = vmul.f32 %v2656_v42, %v2653_v49 }
0x144b   :  { %v2662_v22 = vadd.f32 %v2661_v53, %v2658_v43 }
0x144d   :  { %v2664_v25 = vrot.slane %v2662_v22, 4  ;;  %v2765_v1 = vrot.slane %v2662_v22, 6  ;;  %v3087_v22 = vld [vmem:[%s8488_s3 + $0x398] sm:$0xff] }
0x144f   :  { %2665 = vrot.lane.b32.xlu1 %v2664_v25, %s6898_s21  ;;  %v3084_v25 = vld [vmem:[%s8488_s3 + $0x380] sm:$0xff] }
0x14c1   :  { %v2666_v12 = vpop.permute.xlu1 %2665 }
0x14c2   :  { %6007 = vmatmul.mubr.msk.f32.vlgmr.msra.gmra.mrb[18].mxu0 %vm93_vm0, %v2666_v12  ;;  %v3070_v12 = vld [vmem:[%s8487_s2 + $0x10] sm:$0xff] }
0x14c3   :  { %6300 = vmatpush3.bf16.msra.mxu0 %v7459_v57  ;;  %6028 = vmatprep.mubr.msk.f32.mxu0 %vm6902_vm4, %v6896_v7 }
0x14c4   :  { %6301 = vmatprep.subr.bf16.mxu0 %v6901_v51 }
0x14c7   :  { %6303 = vmatpush3.bf16.msra.mxu0 %v7469_v0 }
0x1595   :  { %v2735_v47 = vpop.f32.mrb[18].mxu0 }
0x1596   :  { %v2736_v30 = vadd.f32 %v2735_v47, %v7506_v44  ;;  %v6008_v50 = vpop.f32.mrb[19].mxu0 }
0x1598   :  { %v2740_v35 = vrot.slane %v2736_v30, 2  ;;  %v3086_v30 = vld [vmem:[%s8488_s3 + $0x390] sm:$0xff] }
0x1599   :  { %v6318_v50 = vpack.c.bf16 %v3086_v30, %v3084_v25 }
0x159a   :  { %v2742_v58 = vadd.f32 %v2740_v35, %v7543_v13  ;;  %2749 = vrot.lane.b32.xlu0 %v2740_v35, %s6897_s20  ;;  %v2986_v35 = vld [vmem:[%s8488_s3 + $0x2f0] sm:$0xff] }
0x159c   :  { %v5476_v63 = vmul.f32 -1.442695, %v2742_v58  ;;  %v2987_v58 = vld [vmem:[%s8488_s3 + $0x300] sm:$0xff] }
0x159e   :  { %6757 = vpow2.f32 %v5476_v63  ;;  %v2988_v63 = vld [vmem:[%s8488_s3 + $0x310] sm:$0xff] }
0x15a8   :  { %v6758_v5 = vpop.eup %6757 }
0x15a9   :  { %v2746_v57 = vadd.f32 1.0, %v6758_v5  ;;  %v6305_v5 = vpack.c.bf16 %v2987_v58, %v2986_v35  ;;  %v3267_v58 = vld [vmem:[%s8488_s3 + $0x448] sm:$0xff] }
0x15ab   :  { %6759 = vrcp.f32 %v2746_v57  ;;  %v2989_v57 = vld [vmem:[%s8488_s3 + $0x320] sm:$0xff] }
0x15b5   :  { %v6760_v6 = vpop.eup %6759 }
0x15b6   :  { %v2759_v10 = vsub.f32 1.0, %v6760_v6  ;;  %v2767_v29 = vmul.f32 %v6760_v6, %v2765_v1  ;;  %v2992_v1 = vld [vmem:[%s8488_s3 + $0x350] sm:$0xff] }
0x160c   :  { %v2750_v11 = vpop.permute.xlu0 %2749 }
0x160d   :  { %v2752_v18 = vmul.f32 %v6760_v6, %v2750_v11  ;;  %v6308_v6 = vpack.c.bf16 %v2989_v57, %v2988_v63  ;;  %v2990_v11 = vld [vmem:[%s8488_s3 + $0x330] sm:$0xff]  ;;  %v3269_v63 = vld [vmem:[%s8488_s3 + $0x458] sm:$0xff] }
0x160e   :  { %v3268_v57 = vld [vmem:[%s8488_s3 + $0x450] sm:$0xff] }
0x160f   :  { %2754 = vrot.lane.b32.xlu1 %v2752_v18, %s6897_s20  ;;  %v2991_v18 = vld [vmem:[%s8488_s3 + $0x340] sm:$0xff] }
0x1681   :  { %v2755_v0 = vpop.permute.xlu1 %2754 }
0x1682   :  { %v2757_v20 = vadd.f32 %v2755_v0, %v7543_v13 }
0x1684   :  { %6761 = vtanh.f32 %v2757_v20  ;;  %v6311_v20 = vpack.c.bf16 %v2991_v18, %v2990_v11 }
0x168e   :  { %v6762_v61 = vpop.eup %6761 }
0x168f   :  { %2761 = vrot.lane.b32.xlu0 %v6762_v61, %s6898_s21 }
0x1701   :  { %v2762_v38 = vpop.permute.xlu0 %2761 }
0x1702   :  { %v2764_v3 = vmul.f32 %v2762_v38, %v2759_v10  ;;  %v2993_v10 = vld [vmem:[%s8488_s3 + $0x360] sm:$0xff] }
0x1703   :  { %v6314_v38 = vpack.c.bf16 %v2993_v10, %v2992_v1 }
0x1704   :  { %v2768_v27 = vadd.f32 %v2767_v29, %v2764_v3  ;;  %v7659_v3 = vld [vmem:[%s8487_s2 + $0x28] sm:$0x3] }
0x1705   :  { %vm3380_vm8 = vcmp.gt.s32.totalorder %v7659_v3, 0  ;;  %vm3498_vm12 = vcmp.gt.s32.totalorder %v7659_v3, 1  ;;  %vm3620_vm14 = vcmp.gt.s32.totalorder %v7659_v3, 2  ;;  %vm3963_vm5 = vcmp.gt.s32.totalorder %v7659_v3, 5 }
0x1706   :  { %v2770_v32 = vrot.slane %v2768_v27, 6  ;;  %vm4081_vm7 = vcmp.gt.s32.totalorder %v7659_v3, 6 }
0x1708   :  { %2771 = vrot.lane.b32.xlu1 %v2770_v32, %s6898_s21 }
0x177a   :  { %v2772_v36 = vpop.permute.xlu1 %2771 }
0x177b   :  { %6018 = vmatmul.mubr.msk.f32.vlgmr.msra.gmra.mrb[18].mxu1 %vm93_vm0, %v2772_v36  ;;  %v3172_v36 = vld [vmem:[%s8488_s3 + $0x3a8] sm:$0xff] }
0x177c   :  { %6047 = vmatprep.mubr.msk.f32.mxu1 %vm6902_vm4, %v6896_v7  ;;  %6306 = vmatpush3.bf16.msra.mxu1 %v6305_v5  ;;  %v7771_v5 = vpack.c.bf16 %v3269_v63, %v3267_v58 }
0x177d   :  { %6307 = vmatprep.subr.bf16.mxu1 %v6901_v51 }
0x1780   :  { %6309 = vmatpush3.bf16.msra.mxu1 %v6308_v6 }
0x1781   :  { %6310 = vmatprep.subr.bf16.mxu1 %v6901_v51 }
0x1784   :  { %6312 = vmatpush3.bf16.msra.mxu1 %v6311_v20  ;;  %v2994_v20 = vld [vmem:[%s8488_s3 + $0x370] ss:$0 sm:$0xff] }
0x1785   :  { %6313 = vmatprep.subr.bf16.mxu1 %v6901_v51  ;;  %v3071_v51 = vld [vmem:[%s8487_s2 + $0x18] sm:$0xff] }
0x1788   :  { %6315 = vmatpush3.bf16.msra.mxu1 %v6314_v38 }
0x184e   :  { %v2841_v13 = vpop.f32.mrb[18].mxu1 }
0x184f   :  { %v2842_v41 = vadd.f32 %v2841_v13, %v7506_v44  ;;  %v6019_v45 = vpop.f32.mrb[19].mxu1  ;;  %v3174_v13 = vld [vmem:[%s8488_s3 + $0x3b8] sm:$0xff] }
0x1850   :  { %v6320_v45 = vpack.c.bf16 %v3174_v13, %v3172_v36 }
0x1851   :  { %v2845_v48 = vadd.f32 %v7541_v31, %v2842_v41  ;;  %2853 = vrot.lane.b32.xlu0 %v2842_v41, %s6897_s20  ;;  %v3171_v41 = vld [vmem:[%s8488_s3 + $0x3a0] sm:$0xff] }
0x1853   :  { %v5478_v52 = vmul.f32 -1.442695, %v2845_v48  ;;  %v3173_v48 = vld [vmem:[%s8488_s3 + $0x3b0] sm:$0xff] }
0x1855   :  { %6763 = vpow2.f32 %v5478_v52  ;;  %v3176_v52 = vld [vmem:[%s8488_s3 + $0x3c8] sm:$0xff] }
0x185f   :  { %v6764_v37 = vpop.eup %6763 }
0x1860   :  { %v2849_v8 = vadd.f32 1.0, %v6764_v37  ;;  %v3178_v37 = vld [vmem:[%s8488_s3 + $0x3d8] sm:$0xff] }
0x1862   :  { %6765 = vrcp.f32 %v2849_v8  ;;  %v6322_v8 = vpack.c.bf16 %v3173_v48, %v3171_v41 }
0x186c   :  { %v6766_v54 = vpop.eup %6765 }
0x186d   :  { %v2863_v2 = vsub.f32 1.0, %v6766_v54  ;;  %v2870_v24 = vmul.f32 %v6766_v54, %v2770_v32  ;;  %v3381_v32 = vsel %vm3380_vm8, 1, %v6900_v46 }
0x18c3   :  { %v2854_v55 = vpop.permute.xlu0 %2853 }
0x18c4   :  { %v2856_v56 = vmul.f32 %v6766_v54, %v2854_v55  ;;  %v6324_v54 = vpack.c.bf16 %v3178_v37, %v3176_v52  ;;  %v3175_v55 = vld [vmem:[%s8488_s3 + $0x3c0] sm:$0xff] }
0x18c6   :  { %2858 = vrot.lane.b32.xlu1 %v2856_v56, %s6897_s20  ;;  %v3177_v56 = vld [vmem:[%s8488_s3 + $0x3d0] sm:$0xff] }
0x1938   :  { %v2859_v59 = vpop.permute.xlu1 %2858 }
0x1939   :  { %v2861_v60 = vadd.f32 %v7541_v31, %v2859_v59  ;;  %v6326_v59 = vpack.c.bf16 %v3177_v56, %v3175_v55 }
0x193b   :  { %6767 = vtanh.f32 %v2861_v60  ;;  %v3255_v60 = vld [vmem:[%s8488_s3 + $0x3e8] sm:$0xff] }
0x1945   :  { %v6768_v33 = vpop.eup %6767 }
0x1946   :  { %2865 = vrot.lane.b32.xlu0 %v6768_v33, %s6898_s21  ;;  %v3257_v33 = vld [vmem:[%s8488_s3 + $0x3f8] sm:$0xff] }
0x19b8   :  { %v2866_v21 = vpop.permute.xlu0 %2865 }
0x19b9   :  { %v2868_v4 = vmul.f32 %v2866_v21, %v2863_v2  ;;  %v7701_v2 = vpack.c.bf16 %v3257_v33, %v3255_v60 }
0x19bb   :  { %v7600_v40 = vadd.f32 %v2870_v24, %v2868_v4  ;;  %6345 = vmatprep.subr.bf16.mxu1 %v7701_v2 }
0x19bd   :  { %2873 = vrot.lane.b32.xlu1 %v7600_v40, %s6898_s21  ;;  %v2973_v21 = vrot.slane %v7600_v40, 6  ;;  %v3259_v40 = vld [vmem:[%s8488_s3 + $0x408] sm:$0xff] }
0x1a2f   :  { %v2874_v23 = vpop.permute.xlu1 %2873 }
0x1a30   :  { %6029 = vmatmul.mubr.msk.f32.vlgmr.msra.gmra.mrb[20].mxu0 %vm93_vm0, %v2874_v23 }
0x1a31   :  { %3158 = vmatprep.mubr.f32.mxu0 %v6896_v7 }
0x1b03   :  { %v2943_v16 = vpop.f32.mrb[20].mxu0 }
0x1b04   :  { %v2944_v15 = vadd.f32 %v2943_v16, %v7506_v44  ;;  %v6030_v39 = vpop.f32.mrb[21].mxu0  ;;  %v3085_v44 = vld [vmem:[%s8488_s3 + $0x388] sm:$0xff] }
0x1b05   :  { %v6316_v47 = vpack.c.bf16 %v3087_v22, %v3085_v44  ;;  %v3254_v39 = vld [vmem:[%s8488_s3 + $0x3e0] sm:$0xff]  ;;  %v3263_v44 = vld [vmem:[%s8488_s3 + $0x428] sm:$0xff] }
0x1b06   :  { %v2948_v14 = vrot.slane %v2944_v15, 6 }
0x1b07   :  { %6317 = vmatprep.subr.bf16.mxu0 %v6316_v47  ;;  %v3264_v47 = vld [vmem:[%s8488_s3 + $0x430] sm:$0xff] }
0x1b08   :  { %v2950_v26 = vadd.f32 %v7541_v31, %v2948_v14  ;;  %2957 = vrot.lane.b32.xlu0 %v2948_v14, %s6897_s20  ;;  %6319 = vmatpush1.bf16.msra.mxu0 %v6318_v50  ;;  %v3256_v14 = vld [vmem:[%s8488_s3 + $0x3f0] sm:$0xff] }
0x1b09   :  { %6321 = vmatprep.subr.bf16.mxu0 %v6320_v45 }
0x1b0a   :  { %v5480_v28 = vmul.f32 -1.442695, %v2950_v26 }
0x1b0c   :  { %6769 = vpow2.f32 %v5480_v28  ;;  %v3261_v28 = vld [vmem:[%s8488_s3 + $0x418] sm:$0xff] }
0x1b16   :  { %v6770_v34 = vpop.eup %6769 }
0x1b17   :  { %v2954_v49 = vadd.f32 1.0, %v6770_v34 }
0x1b19   :  { %6771 = vrcp.f32 %v2954_v49  ;;  %v7726_v49 = vpack.c.bf16 %v3256_v14, %v3254_v39 }
0x1b23   :  { %v7609_v42 = vpop.eup %6771 }
0x1b24   :  { %v2967_v24 = vsub.f32 1.0, %v7609_v42  ;;  %v2975_v16 = vmul.f32 %v7609_v42, %v2973_v21 }
0x1b7a   :  { %v2958_v53 = vpop.permute.xlu0 %2957 }
0x1b7b   :  { %v2960_v43 = vmul.f32 %v7609_v42, %v2958_v53  ;;  %v7729_v42 = vpack.c.bf16 %v3261_v28, %v3259_v40  ;;  %v3258_v53 = vld [vmem:[%s8488_s3 + $0x400] sm:$0xff] }
0x1b7d   :  { %2962 = vrot.lane.b32.xlu1 %v2960_v43, %s6897_s20  ;;  %v3260_v43 = vld [vmem:[%s8488_s3 + $0x410] sm:$0xff] }
0x1b7e   :  { %v7746_v22 = vpack.c.bf16 %v3260_v43, %v3258_v53 }
0x1b81   :  { %3073 = vperm.xlu1 %6710, %v3070_v12   ;;  %v3262_v12 = vld [vmem:[%s8488_s3 + $0x420] sm:$0xff] }
0x1b82   :  { %v7758_v30 = vpack.c.bf16 %v3264_v47, %v3262_v12 }
0x1bef   :  { %v2963_v0 = vpop.permute.xlu1 %2962 }
0x1bf0   :  { %v2965_v61 = vadd.f32 %v7541_v31, %v2963_v0 }
0x1bf2   :  { %6773 = vtanh.f32 %v2965_v61 }
0x1bfc   :  { %v6774_v29 = vpop.eup %6773 }
0x1bfd   :  { %2969 = vrot.lane.b32.xlu0 %v6774_v29, %s6898_s21 }
0x1c00   :  { %v3074_v31 = vpop.permute.xlu1 %3073 }
0x1c01   :  { %vm3078_vm9 = vcmp.eq.s32.totalorder %v7515_v62, %v3074_v31  ;;  %3076 = vperm.xlu0 %6709, %v3071_v51  }
0x1c02   :  { %v5482_v27 = vsel %vm3078_vm9, 1.0, %v6896_v7  ;;  %vm4241_vm9 = vcmask 1041408  }
0x1c03   :  { %5484 = vmatmul.mubr.msk.f32.vlgmr.msra.gmra.mrb[22].mxu0 %vm185_vm1, %v5482_v27 }
0x1c04   :  { %3164 = vmatprep.mubr.f32.mxu0 %v6896_v7  ;;  %6323 = vmatpush1.bf16.msra.mxu0 %v6322_v8 }
0x1c05   :  { %3383 = vperm.xlu0 %6709, %v3381_v32   ;;  %6325 = vmatprep.subr.bf16.mxu0 %v6324_v54 }
0x1c08   :  { %6327 = vmatpush1.bf16.msra.mxu0 %v6326_v59 }
0x1c09   :  { %6329 = vmatprep.subr.bf16.mxu0 %v7701_v2 }
0x1c6f   :  { %v2970_v4 = vpop.permute.xlu0 %2969 }
0x1c70   :  { %v2972_v23 = vmul.f32 %v2970_v4, %v2967_v24 }
0x1c72   :  { %v7708_v15 = vadd.f32 %v2975_v16, %v2972_v23 }
0x1c74   :  { %v2983_v26 = vrot.slane %v7708_v15, 2 }
0x1c76   :  { %3179 = vrot.lane.b32.xlu1 %v2983_v26, %s6898_s21  ;;  %v2985_v34 = vsel %vm93_vm0, %v7539_v9, %v2983_v26  ;;  %v3265_v9 = vld [vmem:[%s8488_s3 + $0x438] sm:$0xff]  ;;  %v5487_v26 = vld [vmem:[%s8488_s3 + $0x460] ss:$8 sm:$0x3] }
0x1c77   :  { %6048 = vmatmul.mubr.msk.f32.vlgmr.msra.gmra.mrb[20].mxu1 %vm890_vm2, %v2985_v34  ;;  %v7748_v25 = vpack.c.bf16 %v3265_v9, %v3263_v44  ;;  %v7842_v40 = vrot.slane %v5487_v26, %v6996_v17  ;;  %v7846_v47 = vrot.slane %v5487_v26, %v7002_v19 }
0x1c78   :  { %6347 = vmatpush1.bf16.msra.mxu1 %v7726_v49  ;;  %3465 = vmatprep.mubr.f32.mxu1 %v6896_v7 }
0x1c79   :  { %6349 = vmatprep.subr.bf16.mxu1 %v7729_v42 }
0x1c7c   :  { %6351 = vmatpush1.bf16.msra.mxu1 %v7746_v22 }
0x1c7d   :  { %6353 = vmatprep.subr.bf16.mxu1 %v7748_v25 }
0x1c80   :  { %v3077_v50 = vpop.permute.xlu0 %3076  ;;  %6355 = vmatpush1.bf16.msra.mxu1 %v7758_v30 }
0x1c81   :  { %vm3079_vm10 = vcmp.eq.s32.totalorder %v7515_v62, %v3077_v50  ;;  %v3266_v62 = vld [vmem:[%s8488_s3 + $0x440] sm:$0xff]  ;;  %6357 = vmatprep.subr.bf16.mxu1 %v7771_v5 }
0x1c82   :  { %v5483_v35 = vsel %vm3079_vm10, 1.0, %v6896_v7  ;;  %v7779_v6 = vpack.c.bf16 %v3268_v57, %v3266_v62  ;;  %vm4243_vm10 = vcmask 1043456  }
0x1c83   :  { %5485 = vmatmul.mubr.msk.f32.gmra.mrb[24].mxu0 %vm185_vm1, %v5483_v35  ;;  %vm3851_vm1 = vcmp.gt.s32.totalorder %v7659_v3, 4 }
0x1c84   :  { %3247 = vmatprep.mubr.f32.mxu0 %v6896_v7  ;;  %6359 = vmatpush1.bf16.msra.mxu1 %v7779_v6  ;;  %v7850_v57 = vpop.permute.xlu0 %3383 }
0x1c85   :  { %6377 = vmatprep.subr.bf16.mxu1 %v7701_v2  ;;  %vm3385_vm11 = vcmp.eq.s32.totalorder %v7850_v57, 1 }
0x1cd6   :  { %v3160_v11 = vpop.f32.mrb[22].mxu0 }
0x1cd7   :  { %v3162_v18 = vpop.f32.mrb[23].mxu0 }
0x1ce8   :  { %v3180_v0 = vpop.permute.xlu1 %3179 }
0x1ce9   :  { %5486 = vmatmul.mubr.msk.f32.vlgmr.msra.gmra.mrb[26].mxu0 %vm93_vm0, %v3180_v0  ;;  %vm3741_vm0 = vcmp.gt.s32.totalorder %v7659_v3, 3  ;;  %v4367_v3 = vld [vmem:[%s8488_s3 + $0x508] sm:$0xff] }
0x1cea   :  { %6331 = vmatpush1.bf16.msra.mxu0 %v7726_v49  ;;  %3352 = vmatprep.mubr.f32.mxu0 %v6896_v7 }
0x1ceb   :  { %6333 = vmatprep.subr.bf16.mxu0 %v7729_v42 }
0x1cee   :  { %6335 = vmatpush1.bf16.msra.mxu0 %v7746_v22 }
0x1cef   :  { %6337 = vmatprep.subr.bf16.mxu0 %v7748_v25 }
0x1cf2   :  { %6339 = vmatpush1.bf16.msra.mxu0 %v7758_v30 }
0x1cf3   :  { %6341 = vmatprep.subr.bf16.mxu0 %v7771_v5 }
0x1cf6   :  { %6343 = vmatpush1.bf16.msra.mxu0 %v7779_v6 }
0x1cf7   :  { %6361 = vmatprep.subr.bf16.mxu0 %v7701_v2 }
0x1d4a   :  { %v3064_v61 = vpop.f32.mrb[20].mxu1 }
0x1d4b   :  { %v3065_v1 = vadd.f32 %v3064_v61, %v2994_v20  ;;  %v6049_v10 = vpop.f32.mrb[21].mxu1 }
0x1d4d   :  { %v7797_v38 = vmax.f32 %v3065_v1, 0.0 }
0x1d4f   :  { %3375 = vrot.lane.b32.xlu0 %v7797_v38, %s6897_s20  ;;  %5488 = vmatmul.mubr.msk.f32.vlgmr.msra.gmra.mrb[28].mxu0 %vm890_vm2, %v7797_v38 }
0x1d50   :  { %6363 = vmatpush1.bf16.msra.mxu0 %v7726_v49  ;;  %3585 = vmatprep.mubr.f32.mxu0 %v6896_v7 }
0x1d51   :  { %6365 = vmatprep.subr.bf16.mxu0 %v7729_v42 }
0x1d54   :  { %6367 = vmatpush1.bf16.msra.mxu0 %v7746_v22 }
0x1d55   :  { %6369 = vmatprep.subr.bf16.mxu0 %v7748_v25 }
0x1d56   :  { %v3166_v29 = vpop.f32.mrb[24].mxu0 }
0x1d57   :  { %v3168_v51 = vpop.f32.mrb[25].mxu0 }
0x1d58   :  { %6371 = vmatpush1.bf16.msra.mxu0 %v7758_v30 }
0x1d59   :  { %6373 = vmatprep.subr.bf16.mxu0 %v7771_v5 }
0x1d5c   :  { %6375 = vmatpush1.bf16.msra.mxu0 %v7779_v6 }
0x1d5d   :  { %6393 = vmatprep.subr.bf16.mxu0 %v7701_v2 }
0x1dbc   :  { %v3249_v31 = vpop.f32.mrb[26].mxu0 }
0x1dbd   :  { %v3251_v27 = vpop.f32.mrb[27].mxu0  ;;  %v3272_v32 = vadd.f32 %v3249_v31, %v3160_v11  ;;  %v3390_v36 = vrot.slane %v3249_v31, 6  ;;  %v3512_v13 = vrot.slane %v3249_v31, 4  ;;  %v3633_v41 = vrot.slane %v3249_v31, 2 }
0x1dbe   :  { %v3391_v45 = vrot.slane %v3251_v27, 6  ;;  %v3513_v48 = vrot.slane %v3251_v27, 4  ;;  %v3634_v52 = vrot.slane %v3251_v27, 2  ;;  %v3273_v37 = vadd.f32 %v3251_v27, %v3162_v18 }
0x1dbf   :  { %v3394_v8 = vadd.f32 %v3390_v36, %v3160_v11  ;;  %v7812_v54 = vadd.f32 %v3512_v13, %v3160_v11  ;;  %v7814_v55 = vadd.f32 %v3633_v41, %v3160_v11  ;;  %v7816_v56 = vadd.f32 %v3249_v31, %v3166_v29 }
0x1dc0   :  { %v7818_v59 = vadd.f32 %v3391_v45, %v3162_v18  ;;  %v7820_v60 = vadd.f32 %v3513_v48, %v3162_v18  ;;  %v7822_v33 = vadd.f32 %v3634_v52, %v3162_v18  ;;  %v7824_v21 = vadd.f32 %v3251_v27, %v3168_v51 }
0x1dc1   :  { %v7826_v24 = vadd.f32 %v3390_v36, %v3166_v29  ;;  %v7828_v4 = vadd.f32 %v3391_v45, %v3168_v51  ;;  %v7830_v23 = vadd.f32 %v3512_v13, %v3166_v29  ;;  %v7832_v16 = vadd.f32 %v3513_v48, %v3168_v51  ;;  %v7852_v18 = vpop.permute.xlu0 %3375 }
0x1dc2   :  { %v7834_v39 = vadd.f32 %v3633_v41, %v3166_v29  ;;  %v7836_v14 = vadd.f32 %v3634_v52, %v3168_v51  ;;  %v3499_v29 = vsel %vm3498_vm12, 1, %v6900_v46  ;;  %vm4245_vm12 = vcmask 1045504  }
0x1e22   :  { %v3354_v28 = vpop.f32.mrb[28].mxu0 }
0x1e23   :  { %v3355_v34 = vadd.f32 %v3354_v28, %v7842_v40  ;;  %v3356_v53 = vpop.f32.mrb[29].mxu0 }
0x1e24   :  { %v3357_v50 = vadd.f32 %v3356_v53, %v7846_v47 }
0x1e25   :  { %v3359_v43 = vadd.f32 %v3355_v34, %v3272_v32 }
0x1e27   :  { %v5489_v44 = vmul.f32 -1.442695, %v3359_v43 }
0x1e29   :  { %6775 = vpow2.f32 %v5489_v44 }
0x1e33   :  { %v6776_v9 = vpop.eup %6775 }
0x1e34   :  { %v3363_v12 = vadd.f32 1.0, %v6776_v9 }
0x1e36   :  { %6777 = vrcp.f32 %v3363_v12 }
0x1e40   :  { %v6778_v35 = vpop.eup %6777 }
0x1e41   :  { %v3366_v58 = vmul.f32 %v6778_v35, %v3357_v50  ;;  %v3369_v11 = vsub.f32 1.0, %v6778_v35  ;;  %v3378_v20 = vmul.f32 %v6778_v35, %v7852_v18 }
0x1e43   :  { %v3367_v63 = vadd.f32 %v3366_v58, %v3273_v37 }
0x1e45   :  { %6779 = vtanh.f32 %v3367_v63 }
0x1e4f   :  { %v6780_v62 = vpop.eup %6779 }
0x1e50   :  { %3371 = vrot.lane.b32.xlu1 %v6780_v62, %s6897_s20 }
0x1ec2   :  { %v3372_v0 = vpop.permute.xlu1 %3371 }
0x1ec3   :  { %v3374_v61 = vmul.f32 %v3372_v0, %v3369_v11 }
0x1ec5   :  { %v7855_v1 = vadd.f32 %v3378_v20, %v3374_v61 }
0x1ec7   :  { %v3386_v10 = vsel %vm3385_vm11, %v7855_v1, %v7852_v18 }
0x1ec8   :  { %3397 = vrot.lane.b32.xlu1 %v3386_v10, %s6897_s20  ;;  %v3494_v37 = vrot.slane %v3386_v10, 6 }
0x1ecc   :  { %3501 = vperm.xlu1 %6710, %v3499_v29  }
0x1f3a   :  { %v3398_v51 = vpop.permute.xlu1 %3397 }
0x1f3b   :  { %5490 = vmatmul.mubr.msk.f32.vlgmr.msra.gmra.mrb[22].mxu1 %vm890_vm2, %v3398_v51 }
0x1f3c   :  { %6379 = vmatpush1.bf16.msra.mxu1 %v7726_v49  ;;  %3706 = vmatprep.mubr.f32.mxu1 %v6896_v7 }
0x1f3d   :  { %6381 = vmatprep.subr.bf16.mxu1 %v7729_v42 }
0x1f40   :  { %6383 = vmatpush1.bf16.msra.mxu1 %v7746_v22 }
0x1f41   :  { %6385 = vmatprep.subr.bf16.mxu1 %v7748_v25 }
0x1f44   :  { %6387 = vmatpush1.bf16.msra.mxu1 %v7758_v30 }
0x1f45   :  { %6389 = vmatprep.subr.bf16.mxu1 %v7771_v5 }
0x1f48   :  { %6391 = vmatpush1.bf16.msra.mxu1 %v7779_v6 }
0x1f49   :  { %6409 = vmatprep.subr.bf16.mxu1 %v7701_v2 }
0x1f4b   :  { %v7880_v58 = vpop.permute.xlu1 %3501 }
0x1f4c   :  { %vm3503_vm13 = vcmp.eq.s32.totalorder %v7880_v58, 1 }
0x200e   :  { %v3467_v31 = vpop.f32.mrb[22].mxu1 }
0x200f   :  { %v3468_v27 = vadd.f32 %v3467_v31, %v7842_v40  ;;  %v3469_v32 = vpop.f32.mrb[23].mxu1 }
0x2010   :  { %v3470_v52 = vadd.f32 %v3469_v32, %v7846_v47 }
0x2011   :  { %v3473_v36 = vrot.slane %v3468_v27, 6 }
0x2012   :  { %v3483_v26 = vrot.slane %v3470_v52, 6 }
0x2013   :  { %v3475_v13 = vadd.f32 %v3473_v36, %v3394_v8 }
0x2015   :  { %v5491_v41 = vmul.f32 -1.442695, %v3475_v13 }
0x2017   :  { %6781 = vpow2.f32 %v5491_v41 }
0x2021   :  { %v6782_v45 = vpop.eup %6781 }
0x2022   :  { %v3479_v48 = vadd.f32 1.0, %v6782_v45 }
0x2024   :  { %6783 = vrcp.f32 %v3479_v48 }
0x202e   :  { %v6784_v28 = vpop.eup %6783 }
0x202f   :  { %v3485_v34 = vmul.f32 %v6784_v28, %v3483_v26  ;;  %v3496_v53 = vmul.f32 %v6784_v28, %v3494_v37  ;;  %v3488_v9 = vsub.f32 1.0, %v6784_v28 }
0x2031   :  { %v3486_v43 = vadd.f32 %v3485_v34, %v7818_v59 }
0x2033   :  { %6785 = vtanh.f32 %v3486_v43 }
0x203d   :  { %v6786_v44 = vpop.eup %6785 }
0x203e   :  { %3490 = vrot.lane.b32.xlu0 %v6786_v44, %s6897_s20 }
0x20b0   :  { %v3491_v8 = vpop.permute.xlu0 %3490 }
0x20b1   :  { %v3493_v12 = vmul.f32 %v3491_v8, %v3488_v9 }
0x20b3   :  { %v3497_v50 = vadd.f32 %v3496_v53, %v3493_v12 }
0x20b5   :  { %v3505_v35 = vrot.slane %v3497_v50, 2 }
0x20b7   :  { %3506 = vrot.lane.b32.xlu0 %v3505_v35, %s6897_s20 }
0x2129   :  { %v7883_v63 = vpop.permute.xlu0 %3506 }
0x212a   :  { %v3510_v59 = vsel %vm3503_vm13, %v7883_v63, %v3398_v51 }
0x212b   :  { %5492 = vmatmul.mubr.msk.f32.vlgmr.msra.gmra.mrb[30].mxu0 %vm890_vm2, %v3510_v59  ;;  %v3614_v62 = vrot.slane %v3510_v59, 4 }
0x212c   :  { %6395 = vmatpush1.bf16.msra.mxu0 %v7726_v49  ;;  %3823 = vmatprep.mubr.f32.mxu0 %v6896_v7 }
0x212d   :  { %3615 = vrot.lane.b32.xlu0 %v3614_v62, %s6897_s20  ;;  %6397 = vmatprep.subr.bf16.mxu0 %v7729_v42 }
0x2130   :  { %6399 = vmatpush1.bf16.msra.mxu0 %v7746_v22 }
0x2131   :  { %6401 = vmatprep.subr.bf16.mxu0 %v7748_v25 }
0x2134   :  { %6403 = vmatpush1.bf16.msra.mxu0 %v7758_v30 }
0x2135   :  { %6405 = vmatprep.subr.bf16.mxu0 %v7771_v5 }
0x2138   :  { %6407 = vmatpush1.bf16.msra.mxu0 %v7779_v6 }
0x2139   :  { %6425 = vmatprep.subr.bf16.mxu0 %v7701_v2 }
0x219f   :  { %v3616_v52 = vpop.permute.xlu0 %3615 }
0x21fe   :  { %v3587_v11 = vpop.f32.mrb[30].mxu0 }
0x21ff   :  { %v3588_v0 = vadd.f32 %v3587_v11, %v7842_v40  ;;  %v3589_v20 = vpop.f32.mrb[31].mxu0 }
0x2200   :  { %v3590_v27 = vadd.f32 %v3589_v20, %v7846_v47 }
0x2201   :  { %v3593_v61 = vrot.slane %v3588_v0, 4 }
0x2202   :  { %v3603_v32 = vrot.slane %v3590_v27, 4 }
0x2203   :  { %v3595_v10 = vadd.f32 %v3593_v61, %v7812_v54  ;;  %v3621_v54 = vsel %vm3620_vm14, 1, %v6900_v46 }
0x2205   :  { %v5493_v29 = vmul.f32 -1.442695, %v3595_v10 }
0x2207   :  { %6787 = vpow2.f32 %v5493_v29 }
0x2211   :  { %v6788_v51 = vpop.eup %6787 }
0x2212   :  { %v3599_v31 = vadd.f32 1.0, %v6788_v51 }
0x2214   :  { %6789 = vrcp.f32 %v3599_v31  ;;  %v3852_v31 = vsel %vm3851_vm1, 1, %v6900_v46 }
0x221e   :  { %v6790_v36 = vpop.eup %6789 }
0x221f   :  { %v3605_v13 = vmul.f32 %v6790_v36, %v3603_v32  ;;  %v3608_v48 = vsub.f32 1.0, %v6790_v36  ;;  %v3618_v26 = vmul.f32 %v6790_v36, %v3616_v52 }
0x2221   :  { %v3606_v41 = vadd.f32 %v3605_v13, %v7820_v60 }
0x2223   :  { %6791 = vtanh.f32 %v3606_v41 }
0x222d   :  { %v6792_v45 = vpop.eup %6791 }
0x222e   :  { %3610 = vrot.lane.b32.xlu1 %v6792_v45, %s6897_s20 }
0x2232   :  { %3623 = vperm.xlu1 %6710, %v3621_v54  }
0x22a0   :  { %v3611_v37 = vpop.permute.xlu1 %3610 }
0x22a1   :  { %v3613_v28 = vmul.f32 %v3611_v37, %v3608_v48 }
0x22a3   :  { %v3619_v34 = vadd.f32 %v3618_v26, %v3613_v28 }
0x22a5   :  { %v3627_v53 = vrot.slane %v3619_v34, 4 }
0x22a7   :  { %3628 = vrot.lane.b32.xlu0 %v3627_v53, %s6897_s20 }
0x22b1   :  { %v7907_v43 = vpop.permute.xlu1 %3623 }
0x22b2   :  { %vm3625_vm15 = vcmp.eq.s32.totalorder %v7907_v43, 1 }
0x2319   :  { %v7910_v60 = vpop.permute.xlu0 %3628 }
0x231a   :  { %v3631_v44 = vsel %vm3625_vm15, %v7910_v60, %v3510_v59 }
0x231b   :  { %5494 = vmatmul.mubr.msk.f32.vlgmr.msra.gmra.mrb[24].mxu1 %vm890_vm2, %v3631_v44  ;;  %v3735_v9 = vrot.slane %v3631_v44, 2 }
0x231c   :  { %6411 = vmatpush1.bf16.msra.mxu1 %v7726_v49  ;;  %3930 = vmatprep.mubr.f32.mxu1 %v6896_v7 }
0x231d   :  { %3736 = vrot.lane.b32.xlu0 %v3735_v9, %s6897_s20  ;;  %6413 = vmatprep.subr.bf16.mxu1 %v7729_v42 }
0x2320   :  { %6415 = vmatpush1.bf16.msra.mxu1 %v7746_v22 }
0x2321   :  { %6417 = vmatprep.subr.bf16.mxu1 %v7748_v25 }
0x2324   :  { %6419 = vmatpush1.bf16.msra.mxu1 %v7758_v30 }
0x2325   :  { %6421 = vmatprep.subr.bf16.mxu1 %v7771_v5 }
0x2328   :  { %6423 = vmatpush1.bf16.msra.mxu1 %v7779_v6 }
0x2329   :  { %6441 = vmatprep.subr.bf16.mxu1 %v7701_v2 }
0x238f   :  { %v3737_v32 = vpop.permute.xlu0 %3736 }
0x23ee   :  { %v3708_v8 = vpop.f32.mrb[24].mxu1 }
0x23ef   :  { %v3709_v12 = vadd.f32 %v3708_v8, %v7842_v40  ;;  %v3710_v50 = vpop.f32.mrb[25].mxu1 }
0x23f0   :  { %v3711_v20 = vadd.f32 %v3710_v50, %v7846_v47 }
0x23f1   :  { %v3714_v35 = vrot.slane %v3709_v12, 2 }
0x23f2   :  { %v3724_v61 = vrot.slane %v3711_v20, 2 }
0x23f3   :  { %v3716_v59 = vadd.f32 %v3714_v35, %v7814_v55  ;;  %v3742_v55 = vsel %vm3741_vm0, 1, %v6900_v46  ;;  %vm5371_vm0 = vcmask 517120  }
0x23f5   :  { %v5495_v62 = vmul.f32 -1.442695, %v3716_v59 }
0x23f7   :  { %6793 = vpow2.f32 %v5495_v62 }
0x2401   :  { %v6794_v11 = vpop.eup %6793 }
0x2402   :  { %v3720_v0 = vadd.f32 1.0, %v6794_v11 }
0x2404   :  { %6795 = vrcp.f32 %v3720_v0 }
0x240e   :  { %v6796_v10 = vpop.eup %6795 }
0x240f   :  { %v3726_v29 = vmul.f32 %v6796_v10, %v3724_v61  ;;  %v3729_v27 = vsub.f32 1.0, %v6796_v10  ;;  %v3739_v13 = vmul.f32 %v6796_v10, %v3737_v32 }
0x2411   :  { %v3727_v51 = vadd.f32 %v3726_v29, %v7822_v33  ;;  %v3964_v29 = vsel %vm3963_vm5, 1, %v6900_v46 }
0x2413   :  { %6797 = vtanh.f32 %v3727_v51 }
0x241d   :  { %v6798_v2 = vpop.eup %6797 }
0x241e   :  { %3731 = vrot.lane.b32.xlu1 %v6798_v2, %s6897_s20 }
0x2422   :  { %3744 = vperm.xlu1 %6710, %v3742_v55  }
0x2426   :  { %3854 = vperm.xlu1 %6710, %v3852_v31  }
0x2490   :  { %v3732_v36 = vpop.permute.xlu1 %3731 }
0x2491   :  { %v3734_v41 = vmul.f32 %v3732_v36, %v3729_v27 }
0x2493   :  { %v3740_v33 = vadd.f32 %v3739_v13, %v3734_v41 }
0x2495   :  { %v3748_v45 = vrot.slane %v3740_v33, 6 }
0x2497   :  { %3749 = vrot.lane.b32.xlu0 %v3748_v45, %s6897_s20 }
0x24a1   :  { %v7936_v54 = vpop.permute.xlu1 %3744 }
0x24a2   :  { %vm3746_vm3 = vcmp.eq.s32.totalorder %v7936_v54, 1  ;;  %v5276_v54 = vld [vmem:[%s8488_s3 + $0x5a0] sm:$0xff] }
0x24a5   :  { %v7959_v62 = vpop.permute.xlu1 %3854 }
0x24a6   :  { %vm3856_vm4 = vcmp.eq.s32.totalorder %v7959_v62, 1 }
0x2509   :  { %v7939_v48 = vpop.permute.xlu0 %3749 }
0x250a   :  { %v3752_v52 = vsel %vm3746_vm3, %v7939_v48, %v3631_v44 }
0x250b   :  { %3846 = vrot.lane.b32.xlu1 %v3752_v52, %s6897_s20  ;;  %5496 = vmatmul.mubr.msk.f32.vlgmr.msra.gmra.mrb[32].mxu0 %vm890_vm2, %v3752_v52 }
0x250c   :  { %6427 = vmatpush1.bf16.msra.mxu0 %v7726_v49  ;;  %4046 = vmatprep.mubr.f32.mxu0 %v6896_v7 }
0x250d   :  { %6429 = vmatprep.subr.bf16.mxu0 %v7729_v42 }
0x2510   :  { %6431 = vmatpush1.bf16.msra.mxu0 %v7746_v22 }
0x2511   :  { %6433 = vmatprep.subr.bf16.mxu0 %v7748_v25 }
0x2514   :  { %6435 = vmatpush1.bf16.msra.mxu0 %v7758_v30 }
0x2515   :  { %6437 = vmatprep.subr.bf16.mxu0 %v7771_v5 }
0x2518   :  { %6439 = vmatpush1.bf16.msra.mxu0 %v7779_v6 }
0x257d   :  { %v3847_v0 = vpop.permute.xlu1 %3846 }
0x25de   :  { %v3825_v37 = vpop.f32.mrb[32].mxu0 }
0x25df   :  { %v3826_v26 = vadd.f32 %v3825_v37, %v7842_v40  ;;  %v3827_v28 = vpop.f32.mrb[33].mxu0 }
0x25e0   :  { %v3828_v8 = vadd.f32 %v3827_v28, %v7846_v47 }
0x25e1   :  { %v3830_v34 = vadd.f32 %v3826_v26, %v7816_v56 }
0x25e3   :  { %v5497_v53 = vmul.f32 -1.442695, %v3830_v34 }
0x25e5   :  { %6799 = vpow2.f32 %v5497_v53 }
0x25ef   :  { %v6800_v44 = vpop.eup %6799 }
0x25f0   :  { %v3834_v9 = vadd.f32 1.0, %v6800_v44 }
0x25f2   :  { %6801 = vrcp.f32 %v3834_v9 }
0x25fc   :  { %v6802_v12 = vpop.eup %6801 }
0x25fd   :  { %v3837_v50 = vmul.f32 %v6802_v12, %v3828_v8  ;;  %v3840_v11 = vsub.f32 1.0, %v6802_v12  ;;  %v3849_v61 = vmul.f32 %v6802_v12, %v3847_v0 }
0x25ff   :  { %v3838_v35 = vadd.f32 %v3837_v50, %v7824_v21 }
0x2601   :  { %6803 = vtanh.f32 %v3838_v35 }
0x260b   :  { %v6804_v59 = vpop.eup %6803 }
0x260c   :  { %3842 = vrot.lane.b32.xlu0 %v6804_v59, %s6897_s20 }
0x267e   :  { %v3843_v56 = vpop.permute.xlu0 %3842 }
0x267f   :  { %v3845_v20 = vmul.f32 %v3843_v56, %v3840_v11 }
0x2681   :  { %v7961_v10 = vadd.f32 %v3849_v61, %v3845_v20 }
0x2683   :  { %v3857_v21 = vsel %vm3856_vm4, %v7961_v10, %v3847_v0 }
0x2684   :  { %3862 = vrot.lane.b32.xlu0 %v3857_v21, %s6897_s20 }
0x2688   :  { %3966 = vperm.xlu0 %6709, %v3964_v29  }
0x26f6   :  { %v3863_v51 = vpop.permute.xlu0 %3862 }
0x26f7   :  { %5498 = vmatmul.mubr.msk.f32.vlgmr.msra.gmra.mrb[26].mxu1 %vm890_vm2, %v3863_v51 }
0x26f8   :  { %6443 = vmatpush1.bf16.msra.mxu1 %v7726_v49  ;;  %4163 = vmatprep.mubr.f32.mxu1 %v6896_v7 }
0x26f9   :  { %6445 = vmatprep.subr.bf16.mxu1 %v7729_v42 }
0x26fc   :  { %6447 = vmatpush1.bf16.msra.mxu1 %v7746_v22 }
0x26fd   :  { %6449 = vmatprep.subr.bf16.mxu1 %v7748_v25  ;;  %v3959_v25 = vrot.slane %v3857_v21, 6 }
0x2700   :  { %6451 = vmatpush1.bf16.msra.mxu1 %v7758_v30 }
0x2701   :  { %6453 = vmatprep.subr.bf16.mxu1 %v7771_v5 }
0x2704   :  { %6455 = vmatpush1.bf16.msra.mxu1 %v7779_v6 }
0x2707   :  { %v7985_v28 = vpop.permute.xlu0 %3966 }
0x2708   :  { %vm3968_vm6 = vcmp.eq.s32.totalorder %v7985_v28, 1 }
0x27ca   :  { %v3932_v2 = vpop.f32.mrb[26].mxu1 }
0x27cb   :  { %v3933_v55 = vadd.f32 %v3932_v2, %v7842_v40  ;;  %v3934_v31 = vpop.f32.mrb[27].mxu1 }
0x27cc   :  { %v3935_v22 = vadd.f32 %v3934_v31, %v7846_v47  ;;  %v4369_v31 = vld [vmem:[%s8488_s3 + $0x518] sm:$0xff] }
0x27cd   :  { %v3938_v27 = vrot.slane %v3933_v55, 6  ;;  %v3753_v55 = vsel %vm3746_vm3, %v7939_v48, 0.0 }
0x27ce   :  { %v3948_v30 = vrot.slane %v3935_v22, 6 }
0x27cf   :  { %v3940_v49 = vadd.f32 %v3938_v27, %v7826_v24 }
0x27d1   :  { %v5499_v32 = vmul.f32 -1.442695, %v3940_v49 }
0x27d3   :  { %6805 = vpow2.f32 %v5499_v32 }
0x27dd   :  { %v6806_v42 = vpop.eup %6805 }
0x27de   :  { %v3944_v36 = vadd.f32 1.0, %v6806_v42 }
0x27e0   :  { %6807 = vrcp.f32 %v3944_v36 }
0x27ea   :  { %v6808_v13 = vpop.eup %6807 }
0x27eb   :  { %v3950_v5 = vmul.f32 %v6808_v13, %v3948_v30  ;;  %v3961_v41 = vmul.f32 %v6808_v13, %v3959_v25  ;;  %v3953_v45 = vsub.f32 1.0, %v6808_v13  ;;  %v3632_v25 = vsel %vm3625_vm15, %v7910_v60, 0.0  ;;  %v4251_v13 = vld [vmem:[%s8488_s3 + $0x478] sm:$0xff]  ;;  %v4252_v60 = vld [vmem:[%s8488_s3 + $0x480] sm:$0xff] }
0x27ec   :  { %v4217_v30 = vrot.slane %v3632_v25, 4 }
0x27ed   :  { %v3951_v6 = vadd.f32 %v3950_v5, %v7828_v4  ;;  %v4253_v5 = vld [vmem:[%s8488_s3 + $0x488] sm:$0xff] }
0x27ef   :  { %6809 = vtanh.f32 %v3951_v6  ;;  %v6456_v6 = vpack.c.bf16 %v4253_v5, %v4251_v13  ;;  %v4374_v13 = vld [vmem:[%s8488_s3 + $0x540] sm:$0xff] }
0x27f1   :  { %6457 = vmatprep.subr.bf16.mxu0 %v6456_v6  ;;  %v4379_v6 = vld [vmem:[%s8488_s3 + $0x568] sm:$0xff] }
0x27f9   :  { %v6810_v33 = vpop.eup %6809 }
0x27fa   :  { %3955 = vrot.lane.b32.xlu1 %v6810_v33, %s6897_s20  ;;  %v4255_v33 = vld [vmem:[%s8488_s3 + $0x498] sm:$0xff] }
0x286c   :  { %v3956_v24 = vpop.permute.xlu1 %3955 }
0x286d   :  { %v3958_v52 = vmul.f32 %v3956_v24, %v3953_v45  ;;  %v4257_v45 = vld [vmem:[%s8488_s3 + $0x4a8] sm:$0xff] }
0x286f   :  { %v3962_v37 = vadd.f32 %v3961_v41, %v3958_v52  ;;  %v4250_v41 = vld [vmem:[%s8488_s3 + $0x470] sm:$0xff]  ;;  %v6460_v52 = vpack.c.bf16 %v4257_v45, %v4255_v33 }
0x2870   :  { %v6458_v24 = vpack.c.bf16 %v4252_v60, %v4250_v41  ;;  %v4381_v60 = vld [vmem:[%s8488_s3 + $0x578] sm:$0xff] }
0x2871   :  { %v3970_v26 = vrot.slane %v3962_v37, 2  ;;  %v4254_v37 = vld [vmem:[%s8488_s3 + $0x490] sm:$0xff] }
0x2873   :  { %3971 = vrot.lane.b32.xlu1 %v3970_v26, %s6897_s20  ;;  %v4256_v26 = vld [vmem:[%s8488_s3 + $0x4a0] sm:$0xff] }
0x28e5   :  { %v7988_v34 = vpop.permute.xlu1 %3971 }
0x28e6   :  { %v7993_v4 = vsel %vm3968_vm6, %v7988_v34, %v3863_v51  ;;  %v3511_v51 = vsel %vm3503_vm13, %v7883_v63, 0.0  ;;  %v8021_v63 = vpack.c.bf16 %v4369_v31, %v4367_v3 }
0x28e7   :  { %5500 = vmatmul.mubr.msk.f32.vlgmr.msra.gmra.mrb[34].mxu0 %vm890_vm2, %v7993_v4  ;;  %v4075_v53 = vrot.slane %v7993_v4, 4  ;;  %v4212_v2 = vrot.slane %v3511_v51, 6  ;;  %v4371_v51 = vld [vmem:[%s8488_s3 + $0x528] sm:$0xff] }
0x28e8   :  { %4353 = vmatprep.mubr.f32.mxu0 %v6896_v7  ;;  %6473 = vmatprep.subr.bf16.mxu1 %v8021_v63 }
0x28e9   :  { %4076 = vrot.lane.b32.xlu1 %v4075_v53, %s6897_s20  ;;  %v4259_v53 = vld [vmem:[%s8488_s3 + $0x4b8] sm:$0xff]  ;;  %6459 = vmatpush1.bf16.msra.mxu0 %v6458_v24  ;;  %v8149_v24 = vpack.c.bf16 %v4381_v60, %v4379_v6 }
0x28ea   :  { %6461 = vmatprep.subr.bf16.mxu0 %v6460_v52  ;;  %v4378_v52 = vld [vmem:[%s8488_s3 + $0x560] sm:$0xff] }
0x295b   :  { %v4077_v49 = vpop.permute.xlu1 %4076 }
0x29ba   :  { %v4048_v44 = vpop.f32.mrb[34].mxu0 }
0x29bb   :  { %v4049_v9 = vadd.f32 %v4048_v44, %v7842_v40  ;;  %v4050_v8 = vpop.f32.mrb[35].mxu0  ;;  %v4261_v44 = vld [vmem:[%s8488_s3 + $0x4c8] sm:$0xff] }
0x29bc   :  { %v4051_v0 = vadd.f32 %v4050_v8, %v7846_v47  ;;  %v6464_v8 = vpack.c.bf16 %v4261_v44, %v4259_v53 }
0x29bd   :  { %v4054_v12 = vrot.slane %v4049_v9, 4  ;;  %v6462_v9 = vpack.c.bf16 %v4256_v26, %v4254_v37  ;;  %v4380_v37 = vld [vmem:[%s8488_s3 + $0x570] sm:$0xff] }
0x29be   :  { %v4064_v56 = vrot.slane %v4051_v0, 4  ;;  %v8160_v53 = vpack.c.bf16 %v4380_v37, %v4378_v52 }
0x29bf   :  { %v4056_v50 = vadd.f32 %v4054_v12, %v7830_v23  ;;  %v4082_v23 = vsel %vm4081_vm7, 1, %v6900_v46  ;;  %v4258_v12 = vld [vmem:[%s8488_s3 + $0x4b0] sm:$0xff]  ;;  %6463 = vmatpush1.bf16.msra.mxu0 %v6462_v9 }
0x29c0   :  { %6465 = vmatprep.subr.bf16.mxu0 %v6464_v8 }
0x29c1   :  { %v5501_v35 = vmul.f32 -1.442695, %v4056_v50  ;;  %v4260_v50 = vld [vmem:[%s8488_s3 + $0x4c0] sm:$0xff] }
0x29c3   :  { %6811 = vpow2.f32 %v5501_v35  ;;  %v4263_v35 = vld [vmem:[%s8488_s3 + $0x4d8] sm:$0xff] }
0x29cd   :  { %v6812_v59 = vpop.eup %6811 }
0x29ce   :  { %v4060_v11 = vadd.f32 1.0, %v6812_v59  ;;  %v4265_v59 = vld [vmem:[%s8488_s3 + $0x4e8] sm:$0xff] }
0x29cf   :  { %v6468_v0 = vpack.c.bf16 %v4265_v59, %v4263_v35 }
0x29d0   :  { %6813 = vrcp.f32 %v4060_v11  ;;  %v6466_v11 = vpack.c.bf16 %v4260_v50, %v4258_v12 }
0x29d2   :  { %6467 = vmatpush1.bf16.msra.mxu0 %v6466_v11 }
0x29d3   :  { %6469 = vmatprep.subr.bf16.mxu0 %v6468_v0 }
0x29da   :  { %v6814_v20 = vpop.eup %6813 }
0x29db   :  { %v4066_v61 = vmul.f32 %v6814_v20, %v4064_v56  ;;  %v4069_v27 = vsub.f32 1.0, %v6814_v20  ;;  %v4079_v32 = vmul.f32 %v6814_v20, %v4077_v49  ;;  %v4262_v56 = vld [vmem:[%s8488_s3 + $0x4d0] sm:$0xff]  ;;  %v4264_v20 = vld [vmem:[%s8488_s3 + $0x4e0] sm:$0xff] }
0x29dc   :  { %v4372_v49 = vld [vmem:[%s8488_s3 + $0x530] sm:$0xff] }
0x29dd   :  { %v4067_v21 = vadd.f32 %v4066_v61, %v7832_v16  ;;  %v4222_v16 = vrot.slane %v3753_v55, 2  ;;  %v6470_v61 = vpack.c.bf16 %v4264_v20, %v4262_v56 }
0x29df   :  { %6815 = vtanh.f32 %v4067_v21  ;;  %6471 = vmatpush1.bf16.msra.mxu0 %v6470_v61 }
0x29e0   :  { %6489 = vmatprep.subr.bf16.mxu0 %v8021_v63 }
0x29e9   :  { %v6816_v29 = vpop.eup %6815 }
0x29ea   :  { %4071 = vrot.lane.b32.xlu0 %v6816_v29, %s6897_s20  ;;  %v4366_v29 = vld [vmem:[%s8488_s3 + $0x500] sm:$0xff] }
0x29ee   :  { %4084 = vperm.xlu0 %6709, %v4082_v23   ;;  %v4368_v23 = vld [vmem:[%s8488_s3 + $0x510] sm:$0xff] }
0x29f2   :  { %4213 = vrot.lane.b32.xlu0 %v4212_v2, %s6897_s20  ;;  %v4373_v2 = vld [vmem:[%s8488_s3 + $0x538] sm:$0xff] }
0x29f3   :  { %v8097_v31 = vpack.c.bf16 %v4373_v2, %v4371_v51 }
0x29f6   :  { %4223 = vrot.lane.b32.xlu0 %v4222_v16, %s6897_s20  ;;  %v8092_v16 = vpack.c.bf16 %v4368_v23, %v4366_v29 }
0x2a5c   :  { %v4072_v48 = vpop.permute.xlu0 %4071 }
0x2a5d   :  { %v4074_v42 = vmul.f32 %v4072_v48, %v4069_v27  ;;  %v4370_v27 = vld [vmem:[%s8488_s3 + $0x520] sm:$0xff] }
0x2a5f   :  { %v4080_v36 = vadd.f32 %v4079_v32, %v4074_v42  ;;  %v4375_v32 = vld [vmem:[%s8488_s3 + $0x548] sm:$0xff]  ;;  %v4377_v42 = vld [vmem:[%s8488_s3 + $0x558] sm:$0xff] }
0x2a61   :  { %v4088_v22 = vrot.slane %v4080_v36, 4  ;;  %v3387_v36 = vsel %vm3385_vm11, %v7855_v1, 0.0  ;;  %v4376_v1 = vld [vmem:[%s8488_s3 + $0x550] sm:$0xff] }
0x2a62   :  { %v8146_v45 = vpack.c.bf16 %v4376_v1, %v4374_v13 }
0x2a63   :  { %4089 = vrot.lane.b32.xlu1 %v4088_v22, %s6897_s20 }
0x2a67   :  { %4218 = vrot.lane.b32.xlu1 %v4217_v30, %s6897_s20  ;;  %v8128_v30 = vpack.c.bf16 %v4377_v42, %v4375_v32 }
0x2a6d   :  { %v8078_v21 = vpop.permute.xlu0 %4084 }
0x2a6e   :  { %vm4086_vm8 = vcmp.eq.s32.totalorder %v8078_v21, 1 }
0x2a71   :  { %v4214_v55 = vpop.permute.xlu0 %4213 }
0x2a72   :  { %v4242_v22 = vsel %vm4241_vm9, %v3387_v36, %v4214_v55 }
0x2a75   :  { %v4224_v5 = vpop.permute.xlu0 %4223 }
0x2ad5   :  { %v8095_v3 = vpop.permute.xlu1 %4089 }
0x2ad6   :  { %v8109_v48 = vsel %vm4086_vm8, %v8095_v3, %v7993_v4  ;;  %v8123_v4 = vpack.c.bf16 %v4372_v49, %v4370_v27  ;;  %v5504_v27 = vld [vmem:[%s8488_s3 + $0x4f0] ss:$8 sm:$0x3] }
0x2ad7   :  { %5502 = vmatmul.mubr.msk.f32.vlgmr.msra.gmra.mrb[28].mxu1 %vm890_vm2, %v8109_v48  ;;  %v4192_v26 = vrot.slane %v8109_v48, 2  ;;  %v8221_v60 = vrot.slane %v5504_v27, %v7002_v19 }
0x2ad8   :  { %6475 = vmatpush1.bf16.msra.mxu1 %v8092_v16  ;;  %4459 = vmatprep.mubr.f32.mxu1 %v6896_v7 }
0x2ad9   :  { %v4219_v25 = vpop.permute.xlu1 %4218  ;;  %6477 = vmatprep.subr.bf16.mxu1 %v8097_v31 }
0x2ada   :  { %v4244_v41 = vsel %vm4243_vm10, %v4242_v22, %v4219_v25 }
0x2adb   :  { %v4246_v33 = vsel %vm4245_vm12, %v4244_v41, %v4224_v5 }
0x2adc   :  { %6479 = vmatpush1.bf16.msra.mxu1 %v8123_v4  ;;  %4281 = vrot.lane.b32.xlu1 %v4246_v33, %s6897_s20 }
0x2add   :  { %6481 = vmatprep.subr.bf16.mxu1 %v8128_v30 }
0x2ae0   :  { %6483 = vmatpush1.bf16.msra.mxu1 %v8146_v45  ;;  %4193 = vrot.lane.b32.xlu1 %v4192_v26, %s6897_s20 }
0x2ae1   :  { %6485 = vmatprep.subr.bf16.mxu1 %v8149_v24 }
0x2ae4   :  { %6487 = vmatpush1.bf16.msra.mxu1 %v8160_v53 }
0x2ae5   :  { %6505 = vmatprep.subr.bf16.mxu1 %v8021_v63 }
0x2ae7   :  { %5508 = vmatmul.mubr.msk.f32.vlgmr.msra.gmra.mrb[30].mxu1 %vm890_vm2, %v7797_v38 }
0x2ae8   :  { %6507 = vmatpush1.bf16.msra.mxu1 %v8092_v16  ;;  %4663 = vmatprep.mubr.f32.mxu1 %v6896_v7 }
0x2ae9   :  { %6509 = vmatprep.subr.bf16.mxu1 %v8097_v31 }
0x2aec   :  { %6511 = vmatpush1.bf16.msra.mxu1 %v8123_v4 }
0x2aed   :  { %6513 = vmatprep.subr.bf16.mxu1 %v8128_v30 }
0x2af0   :  { %6515 = vmatpush1.bf16.msra.mxu1 %v8146_v45 }
0x2af1   :  { %6517 = vmatprep.subr.bf16.mxu1 %v8149_v24 }
0x2af4   :  { %6519 = vmatpush1.bf16.msra.mxu1 %v8160_v53 }
0x2af5   :  { %6537 = vmatprep.subr.bf16.mxu1 %v8021_v63 }
0x2b4e   :  { %v4282_v44 = vpop.permute.xlu1 %4281 }
0x2b4f   :  { %5505 = vmatmul.mubr.msk.f32.vlgmr.msra.gmra.mrb[36].mxu0 %vm890_vm2, %v4282_v44 }
0x2b50   :  { %6491 = vmatpush1.bf16.msra.mxu0 %v8092_v16  ;;  %4359 = vmatprep.mubr.f32.mxu0 %v6896_v7 }
0x2b51   :  { %6493 = vmatprep.subr.bf16.mxu0 %v8097_v31 }
0x2b52   :  { %v4194_v37 = vpop.permute.xlu1 %4193 }
0x2b54   :  { %6495 = vmatpush1.bf16.msra.mxu0 %v8123_v4 }
0x2b55   :  { %6497 = vmatprep.subr.bf16.mxu0 %v8128_v30 }
0x2b58   :  { %6499 = vmatpush1.bf16.msra.mxu0 %v8146_v45 }
0x2b59   :  { %6501 = vmatprep.subr.bf16.mxu0 %v8149_v24 }
0x2b5c   :  { %6503 = vmatpush1.bf16.msra.mxu0 %v8160_v53 }
0x2b5d   :  { %6521 = vmatprep.subr.bf16.mxu0 %v8021_v63 }
0x2baa   :  { %v4165_v38 = vpop.f32.mrb[28].mxu1 }
0x2bab   :  { %v4166_v9 = vadd.f32 %v4165_v38, %v7842_v40  ;;  %v4167_v8 = vpop.f32.mrb[29].mxu1  ;;  %v6871_v40 = vld [vmem:[%s8487_s2 + $0x28] sm:$0x3] }
0x2bac   :  { %v4168_v20 = vadd.f32 %v4167_v8, %v7846_v47  ;;  %vm4198_vm14 = vcmp.gt.s32.totalorder %v6871_v40, 7  ;;  %v3976_v47 = vsel %vm3968_vm6, %v7988_v34, 0.0 }
0x2bad   :  { %v4171_v12 = vrot.slane %v4166_v9, 2  ;;  %v4199_v2 = vsel %vm4198_vm14, 1, %v6900_v46  ;;  %v4227_v55 = vrot.slane %v3976_v47, 6  ;;  %v8209_v46 = vrot.slane %v5504_v27, %v6996_v17 }
0x2bae   :  { %v4181_v61 = vrot.slane %v4168_v20, 2 }
0x2baf   :  { %v4173_v50 = vadd.f32 %v4171_v12, %v7834_v39 }
0x2bb1   :  { %v5503_v35 = vmul.f32 -1.442695, %v4173_v50  ;;  %v4093_v50 = vsel %vm4086_vm8, %v8095_v3, 0.0 }
0x2bb3   :  { %6817 = vpow2.f32 %v5503_v35 }
0x2bba   :  { %v4461_v59 = vpop.f32.mrb[30].mxu1 }
0x2bbb   :  { %v4463_v11 = vpop.f32.mrb[31].mxu1 }
0x2bbd   :  { %v6818_v0 = vpop.eup %6817 }
0x2bbe   :  { %v4177_v56 = vadd.f32 1.0, %v6818_v0 }
0x2bc0   :  { %6819 = vrcp.f32 %v4177_v56 }
0x2bca   :  { %v6820_v29 = vpop.eup %6819 }
0x2bcb   :  { %v4183_v23 = vmul.f32 %v6820_v29, %v4181_v61  ;;  %v4186_v52 = vsub.f32 1.0, %v6820_v29  ;;  %v4196_v38 = vmul.f32 %v6820_v29, %v4194_v37  ;;  %v3858_v61 = vsel %vm3856_vm4, %v7961_v10, 0.0 }
0x2bcd   :  { %v4184_v51 = vadd.f32 %v4183_v23, %v7836_v14  ;;  %v5507_v14 = vld [vmem:[%s8488_s3 + $0x580] ss:$8 sm:$0x3] }
0x2bce   :  { %v8206_v49 = vrot.slane %v5507_v14, %v6996_v17  ;;  %v8217_v5 = vrot.slane %v5507_v14, %v7002_v19  ;;  %v4232_v19 = vrot.slane %v4093_v50, 4 }
0x2bcf   :  { %6821 = vtanh.f32 %v4184_v51 }
0x2bd0   :  { %v4462_v34 = vadd.f32 %v4461_v59, %v8206_v49  ;;  %v4464_v17 = vadd.f32 %v4463_v11, %v8217_v5 }
0x2bd9   :  { %v6822_v39 = vpop.eup %6821 }
0x2bda   :  { %4188 = vrot.lane.b32.xlu0 %v6822_v39, %s6897_s20 }
0x2bde   :  { %4201 = vperm.xlu0 %6709, %v4199_v2  }
0x2be2   :  { %4228 = vrot.lane.b32.xlu0 %v4227_v55, %s6897_s20 }
0x2c22   :  { %v4355_v32 = vpop.f32.mrb[36].mxu0 }
0x2c23   :  { %v8213_v42 = vadd.f32 %v4355_v32, %v8209_v46  ;;  %v4357_v36 = vpop.f32.mrb[37].mxu0 }
0x2c24   :  { %v8224_v33 = vadd.f32 %v4357_v36, %v8221_v60 }
0x2c25   :  { %v4466_v22 = vadd.f32 %v4462_v34, %v8213_v42 }
0x2c27   :  { %v5509_v25 = vmul.f32 -1.442695, %v4466_v22 }
0x2c29   :  { %6823 = vpow2.f32 %v5509_v25 }
0x2c33   :  { %v6824_v13 = vpop.eup %6823 }
0x2c34   :  { %v4470_v1 = vadd.f32 1.0, %v6824_v13 }
0x2c36   :  { %6825 = vrcp.f32 %v4470_v1 }
0x2c40   :  { %v6826_v41 = vpop.eup %6825 }
0x2c41   :  { %v4473_v6 = vmul.f32 %v6826_v41, %v4464_v17  ;;  %v4476_v40 = vsub.f32 1.0, %v6826_v41 }
0x2c43   :  { %v4474_v26 = vadd.f32 %v4473_v6, %v8224_v33 }
0x2c45   :  { %6827 = vtanh.f32 %v4474_v26 }
0x2c4c   :  { %v4189_v44 = vpop.permute.xlu0 %4188 }
0x2c4d   :  { %v4191_v9 = vmul.f32 %v4189_v44, %v4186_v52 }
0x2c4f   :  { %v4197_v8 = vadd.f32 %v4196_v38, %v4191_v9  ;;  %v6828_v35 = vpop.eup %6827 }
0x2c51   :  { %v4205_v12 = vrot.slane %v4197_v8, 6 }
0x2c53   :  { %4206 = vrot.lane.b32.xlu1 %v4205_v12, %s6897_s20 }
0x2c57   :  { %4233 = vrot.lane.b32.xlu1 %v4232_v19, %s6897_s20 }
0x2c5b   :  { %4478 = vrot.lane.b32.xlu1 %v6828_v35, %s6897_s20 }
0x2c5d   :  { %v8233_v59 = vpop.permute.xlu0 %4201 }
0x2c5e   :  { %vm4203_vm1 = vcmp.eq.s32.totalorder %v8233_v59, 1  ;;  %v5278_v59 = vld [vmem:[%s8488_s3 + $0x5c0] sm:$0xff] }
0x2c61   :  { %v4229_v0 = vpop.permute.xlu0 %4228 }
0x2c62   :  { %v4247_v29 = vsel %vm4241_vm9, %v3858_v61, %v4229_v0 }
0x2cc5   :  { %v4207_v11 = vpop.permute.xlu1 %4206 }
0x2cc6   :  { %v4209_v56 = vsel %vm4203_vm1, %v4207_v11, %v8109_v48  ;;  %v4210_v3 = vsel %vm4203_vm1, %v4207_v11, 0.0  ;;  %v4482_v48 = vmul.f32 %v6826_v41, %v7852_v18 }
0x2cc7   :  { %v4237_v20 = vrot.slane %v4210_v3, 2  ;;  %5372 = vst.msk [vmem:[#allocation2] sm:$0x3] %vm5371_vm0, %v4209_v56 }
0x2cc9   :  { %v4234_v23 = vpop.permute.xlu1 %4233  ;;  %4238 = vrot.lane.b32.xlu0 %v4237_v20, %s6897_s20 }
0x2cca   :  { %v4248_v51 = vsel %vm4243_vm10, %v4247_v29, %v4234_v23 }
0x2ccd   :  { %v4479_v39 = vpop.permute.xlu1 %4478 }
0x2cce   :  { %v4481_v2 = vmul.f32 %v4479_v39, %v4476_v40 }
0x2cd0   :  { %v8249_v47 = vadd.f32 %v4482_v48, %v4481_v2 }
0x2cd2   :  { %v4484_v55 = vsel %vm3385_vm11, %v8249_v47, %v7852_v18 }
0x2cd3   :  { %4487 = vrot.lane.b32.xlu1 %v4484_v55, %s6897_s20  ;;  %v4584_v37 = vrot.slane %v4484_v55, 6 }
0x2d3b   :  { %v4239_v10 = vpop.permute.xlu0 %4238 }
0x2d3c   :  { %v4249_v14 = vsel %vm4245_vm12, %v4248_v51, %v4239_v10 }
0x2d3d   :  { %4283 = vrot.lane.b32.xlu0 %v4249_v14, %s6897_s20 }
0x2d45   :  { %v4488_v32 = vpop.permute.xlu1 %4487 }
0x2daf   :  { %v4284_v27 = vpop.permute.xlu0 %4283 }
0x2db0   :  { %5506 = vmatmul.mubr.msk.f32.gmra.mrb[38].mxu0 %vm890_vm2, %v4284_v27 }
0x2db1   :  { %4555 = vmatprep.mubr.f32.mxu0 %v6896_v7 }
0x2db4   :  { %5510 = vmatmul.mubr.msk.f32.vlgmr.msra.gmra.mrb[40].mxu0 %vm890_vm2, %v4488_v32 }
0x2db5   :  { %6523 = vmatpush1.bf16.msra.mxu0 %v8092_v16  ;;  %4772 = vmatprep.mubr.f32.mxu0 %v6896_v7 }
0x2db6   :  { %6525 = vmatprep.subr.bf16.mxu0 %v8097_v31 }
0x2db9   :  { %6527 = vmatpush1.bf16.msra.mxu0 %v8123_v4 }
0x2dba   :  { %6529 = vmatprep.subr.bf16.mxu0 %v8128_v30 }
0x2dbd   :  { %6531 = vmatpush1.bf16.msra.mxu0 %v8146_v45 }
0x2dbe   :  { %6533 = vmatprep.subr.bf16.mxu0 %v8149_v24 }
0x2dc1   :  { %6535 = vmatpush1.bf16.msra.mxu0 %v8160_v53 }
0x2dc2   :  { %6553 = vmatprep.subr.bf16.mxu0 %v8021_v63 }
0x2e83   :  { %v8270_v18 = vpop.f32.mrb[38].mxu0 }
0x2e84   :  { %v8272_v34 = vpop.f32.mrb[39].mxu0 }
0x2e87   :  { %v4557_v36 = vpop.f32.mrb[40].mxu0 }
0x2e88   :  { %v4558_v22 = vadd.f32 %v4557_v36, %v8206_v49  ;;  %v4559_v25 = vpop.f32.mrb[41].mxu0 }
0x2e89   :  { %v4560_v52 = vadd.f32 %v4559_v25, %v8217_v5 }
0x2e8a   :  { %v4563_v13 = vrot.slane %v4558_v22, 6 }
0x2e8b   :  { %v4573_v26 = vrot.slane %v4560_v52, 6 }
0x2e8c   :  { %v4565_v1 = vadd.f32 %v4563_v13, %v8213_v42 }
0x2e8e   :  { %v5511_v17 = vmul.f32 -1.442695, %v4565_v1 }
0x2e90   :  { %6829 = vpow2.f32 %v5511_v17 }
0x2e9a   :  { %v6830_v41 = vpop.eup %6829 }
0x2e9b   :  { %v4569_v6 = vadd.f32 1.0, %v6830_v41 }
0x2e9d   :  { %6831 = vrcp.f32 %v4569_v6 }
0x2ea7   :  { %v6832_v44 = vpop.eup %6831 }
0x2ea8   :  { %v4575_v38 = vmul.f32 %v6832_v44, %v4573_v26  ;;  %v4586_v9 = vmul.f32 %v6832_v44, %v4584_v37  ;;  %v4578_v50 = vsub.f32 1.0, %v6832_v44 }
0x2eaa   :  { %v4576_v8 = vadd.f32 %v4575_v38, %v8224_v33 }
0x2eac   :  { %6833 = vtanh.f32 %v4576_v8 }
0x2eb6   :  { %v6834_v12 = vpop.eup %6833 }
0x2eb7   :  { %4580 = vrot.lane.b32.xlu0 %v6834_v12, %s6897_s20 }
0x2f29   :  { %v4581_v19 = vpop.permute.xlu0 %4580 }
0x2f2a   :  { %v4583_v35 = vmul.f32 %v4581_v19, %v4578_v50 }
0x2f2c   :  { %v4587_v11 = vadd.f32 %v4586_v9, %v4583_v35 }
0x2f2e   :  { %v4589_v0 = vrot.slane %v4587_v11, 2 }
0x2f30   :  { %4590 = vrot.lane.b32.xlu1 %v4589_v0, %s6897_s20 }
0x2fa2   :  { %v8280_v56 = vpop.permute.xlu1 %4590 }
0x2fa3   :  { %v4594_v3 = vsel %vm3503_vm13, %v8280_v56, %v4488_v32 }
0x2fa4   :  { %v4692_v20 = vrot.slane %v4594_v3, 4  ;;  %5512 = vmatmul.mubr.msk.f32.vlgmr.msra.gmra.mrb[32].mxu1 %vm890_vm2, %v4594_v3 }
0x2fa5   :  { %6539 = vmatpush1.bf16.msra.mxu1 %v8092_v16  ;;  %4881 = vmatprep.mubr.f32.mxu1 %v6896_v7 }
0x2fa6   :  { %4693 = vrot.lane.b32.xlu1 %v4692_v20, %s6897_s20  ;;  %6541 = vmatprep.subr.bf16.mxu1 %v8097_v31 }
0x2fa9   :  { %6543 = vmatpush1.bf16.msra.mxu1 %v8123_v4 }
0x2faa   :  { %6545 = vmatprep.subr.bf16.mxu1 %v8128_v30 }
0x2fad   :  { %6547 = vmatpush1.bf16.msra.mxu1 %v8146_v45 }
0x2fae   :  { %6549 = vmatprep.subr.bf16.mxu1 %v8149_v24 }
0x2fb1   :  { %6551 = vmatpush1.bf16.msra.mxu1 %v8160_v53 }
0x2fb2   :  { %6569 = vmatprep.subr.bf16.mxu1 %v8021_v63 }
0x3018   :  { %v4694_v25 = vpop.permute.xlu1 %4693 }
0x3077   :  { %v4665_v61 = vpop.f32.mrb[32].mxu1 }
0x3078   :  { %v4666_v29 = vadd.f32 %v4665_v61, %v8206_v49  ;;  %v4667_v23 = vpop.f32.mrb[33].mxu1 }
0x3079   :  { %v4668_v55 = vadd.f32 %v4667_v23, %v8217_v5 }
0x307a   :  { %v4671_v51 = vrot.slane %v4666_v29, 4 }
0x307b   :  { %v4681_v10 = vrot.slane %v4668_v55, 4 }
0x307c   :  { %v4673_v40 = vadd.f32 %v4671_v51, %v8213_v42 }
0x307e   :  { %v5513_v39 = vmul.f32 -1.442695, %v4673_v40 }
0x3080   :  { %6835 = vpow2.f32 %v5513_v39 }
0x308a   :  { %v6836_v48 = vpop.eup %6835 }
0x308b   :  { %v4677_v2 = vadd.f32 1.0, %v6836_v48 }
0x308d   :  { %6837 = vrcp.f32 %v4677_v2 }
0x3097   :  { %v6838_v14 = vpop.eup %6837 }
0x3098   :  { %v4683_v27 = vmul.f32 %v6838_v14, %v4681_v10  ;;  %v4686_v22 = vsub.f32 1.0, %v6838_v14  ;;  %v4696_v1 = vmul.f32 %v6838_v14, %v4694_v25  ;;  %v8341_v10 = vadd.f32 %v8270_v18, %v8209_v46 }
0x309a   :  { %v4684_v32 = vadd.f32 %v4683_v27, %v8224_v33 }
0x309c   :  { %6839 = vtanh.f32 %v4684_v32 }
0x30a6   :  { %v6840_v36 = vpop.eup %6839 }
0x30a7   :  { %4688 = vrot.lane.b32.xlu0 %v6840_v36, %s6897_s20 }
0x3119   :  { %v4689_v13 = vpop.permute.xlu0 %4688 }
0x311a   :  { %v4691_v17 = vmul.f32 %v4689_v13, %v4686_v22 }
0x311c   :  { %v4697_v41 = vadd.f32 %v4696_v1, %v4691_v17  ;;  %v8348_v17 = vadd.f32 %v8272_v34, %v8221_v60 }
0x311e   :  { %v4699_v6 = vrot.slane %v4697_v41, 4 }
0x3120   :  { %4700 = vrot.lane.b32.xlu0 %v4699_v6, %s6897_s20 }
0x3192   :  { %v8302_v52 = vpop.permute.xlu0 %4700 }
0x3193   :  { %v4703_v37 = vsel %vm3625_vm15, %v8302_v52, %v4594_v3 }
0x3194   :  { %v4801_v26 = vrot.slane %v4703_v37, 2  ;;  %5514 = vmatmul.mubr.msk.f32.vlgmr.msra.gmra.mrb[42].mxu0 %vm890_vm2, %v4703_v37 }
0x3195   :  { %6555 = vmatpush1.bf16.msra.mxu0 %v8092_v16  ;;  %4980 = vmatprep.mubr.f32.mxu0 %v6896_v7 }
0x3196   :  { %4802 = vrot.lane.b32.xlu0 %v4801_v26, %s6897_s20  ;;  %6557 = vmatprep.subr.bf16.mxu0 %v8097_v31 }
0x3199   :  { %6559 = vmatpush1.bf16.msra.mxu0 %v8123_v4 }
0x319a   :  { %6561 = vmatprep.subr.bf16.mxu0 %v8128_v30 }
0x319d   :  { %6563 = vmatpush1.bf16.msra.mxu0 %v8146_v45 }
0x319e   :  { %6565 = vmatprep.subr.bf16.mxu0 %v8149_v24 }
0x31a1   :  { %6567 = vmatpush1.bf16.msra.mxu0 %v8160_v53 }
0x31a2   :  { %6585 = vmatprep.subr.bf16.mxu0 %v8021_v63 }
0x3208   :  { %v4803_v23 = vpop.permute.xlu0 %4802 }
0x3267   :  { %v4774_v44 = vpop.f32.mrb[42].mxu0 }
0x3268   :  { %v4775_v38 = vadd.f32 %v4774_v44, %v8206_v49  ;;  %v4776_v9 = vpop.f32.mrb[43].mxu0 }
0x3269   :  { %v4777_v11 = vadd.f32 %v4776_v9, %v8217_v5 }
0x326a   :  { %v4780_v8 = vrot.slane %v4775_v38, 2 }
0x326b   :  { %v4790_v0 = vrot.slane %v4777_v11, 2 }
0x326c   :  { %v4782_v12 = vadd.f32 %v4780_v8, %v8213_v42 }
0x326e   :  { %v5515_v50 = vmul.f32 -1.442695, %v4782_v12 }
0x3270   :  { %6841 = vpow2.f32 %v5515_v50 }
0x327a   :  { %v6842_v19 = vpop.eup %6841 }
0x327b   :  { %v4786_v35 = vadd.f32 1.0, %v6842_v19 }
0x327d   :  { %6843 = vrcp.f32 %v4786_v35 }
0x3287   :  { %v6844_v3 = vpop.eup %6843 }
0x3288   :  { %v4792_v20 = vmul.f32 %v6844_v3, %v4790_v0  ;;  %v4795_v29 = vsub.f32 1.0, %v6844_v3  ;;  %v4805_v42 = vmul.f32 %v6844_v3, %v4803_v23 }
0x328a   :  { %v4793_v61 = vadd.f32 %v4792_v20, %v8224_v33 }
0x328c   :  { %6845 = vtanh.f32 %v4793_v61 }
0x3296   :  { %v6846_v63 = vpop.eup %6845 }
0x3297   :  { %4797 = vrot.lane.b32.xlu1 %v6846_v63, %s6897_s20 }
0x3309   :  { %v4798_v51 = vpop.permute.xlu1 %4797 }
0x330a   :  { %v4800_v40 = vmul.f32 %v4798_v51, %v4795_v29 }
0x330c   :  { %v4806_v39 = vadd.f32 %v4805_v42, %v4800_v40 }
0x330e   :  { %v4808_v48 = vrot.slane %v4806_v39, 6 }
0x3310   :  { %4809 = vrot.lane.b32.xlu1 %v4808_v48, %s6897_s20 }
0x3382   :  { %v8324_v2 = vpop.permute.xlu1 %4809 }
0x3383   :  { %v4812_v55 = vsel %vm3746_vm3, %v8324_v2, %v4703_v37 }
0x3384   :  { %4904 = vrot.lane.b32.xlu1 %v4812_v55, %s6897_s20  ;;  %5516 = vmatmul.mubr.msk.f32.vlgmr.msra.gmra.mrb[34].mxu1 %vm890_vm2, %v4812_v55 }
0x3385   :  { %6571 = vmatpush1.bf16.msra.mxu1 %v8092_v16  ;;  %5088 = vmatprep.mubr.f32.mxu1 %v6896_v7 }
0x3386   :  { %6573 = vmatprep.subr.bf16.mxu1 %v8097_v31 }
0x3389   :  { %6575 = vmatpush1.bf16.msra.mxu1 %v8123_v4 }
0x338a   :  { %6577 = vmatprep.subr.bf16.mxu1 %v8128_v30 }
0x338d   :  { %6579 = vmatpush1.bf16.msra.mxu1 %v8146_v45 }
0x338e   :  { %6581 = vmatprep.subr.bf16.mxu1 %v8149_v24 }
0x3391   :  { %6583 = vmatpush1.bf16.msra.mxu1 %v8160_v53 }
0x33f6   :  { %v4905_v37 = vpop.permute.xlu1 %4904 }
0x3457   :  { %v4883_v33 = vpop.f32.mrb[34].mxu1 }
0x3458   :  { %v4884_v14 = vadd.f32 %v4883_v33, %v8206_v49  ;;  %v4885_v27 = vpop.f32.mrb[35].mxu1 }
0x3459   :  { %v4886_v13 = vadd.f32 %v4885_v27, %v8217_v5 }
0x345a   :  { %v4888_v32 = vadd.f32 %v4884_v14, %v8341_v10 }
0x345c   :  { %v5517_v36 = vmul.f32 -1.442695, %v4888_v32 }
0x345e   :  { %6847 = vpow2.f32 %v5517_v36 }
0x3468   :  { %v6848_v22 = vpop.eup %6847 }
0x3469   :  { %v4892_v25 = vadd.f32 1.0, %v6848_v22 }
0x346b   :  { %6849 = vrcp.f32 %v4892_v25 }
0x3475   :  { %v6850_v1 = vpop.eup %6849 }
0x3476   :  { %v4895_v41 = vmul.f32 %v6850_v1, %v4886_v13  ;;  %v4898_v6 = vsub.f32 1.0, %v6850_v1  ;;  %v4907_v44 = vmul.f32 %v6850_v1, %v4905_v37 }
0x3478   :  { %v4896_v46 = vadd.f32 %v4895_v41, %v8348_v17 }
0x347a   :  { %6851 = vtanh.f32 %v4896_v46 }
0x3484   :  { %v6852_v18 = vpop.eup %6851 }
0x3485   :  { %4900 = vrot.lane.b32.xlu0 %v6852_v18, %s6897_s20 }
0x34f7   :  { %v4901_v26 = vpop.permute.xlu0 %4900 }
0x34f8   :  { %v4903_v38 = vmul.f32 %v4901_v26, %v4898_v6 }
0x34fa   :  { %v8352_v9 = vadd.f32 %v4907_v44, %v4903_v38 }
0x34fc   :  { %v4909_v8 = vsel %vm3856_vm4, %v8352_v9, %v4905_v37 }
0x34fd   :  { %4912 = vrot.lane.b32.xlu0 %v4909_v8, %s6897_s20 }
0x356f   :  { %v4913_v60 = vpop.permute.xlu0 %4912 }
0x3570   :  { %5518 = vmatmul.mubr.msk.f32.vlgmr.msra.gmra.mrb[44].mxu0 %vm890_vm2, %v4913_v60 }
0x3571   :  { %6587 = vmatpush1.bf16.msra.mxu0 %v8092_v16  ;;  %5197 = vmatprep.mubr.f32.mxu0 %v6896_v7 }
0x3572   :  { %6589 = vmatprep.subr.bf16.mxu0 %v8097_v31 }
0x3575   :  { %6591 = vmatpush1.bf16.msra.mxu0 %v8123_v4 }
0x3576   :  { %6593 = vmatprep.subr.bf16.mxu0 %v8128_v30  ;;  %v5009_v30 = vrot.slane %v4909_v8, 6 }
0x3579   :  { %6595 = vmatpush1.bf16.msra.mxu0 %v8146_v45 }
0x357a   :  { %6597 = vmatprep.subr.bf16.mxu0 %v8149_v24 }
0x357d   :  { %6599 = vmatpush1.bf16.msra.mxu0 %v8160_v53 }
0x3643   :  { %v4982_v34 = vpop.f32.mrb[44].mxu0 }
0x3644   :  { %v4983_v12 = vadd.f32 %v4982_v34, %v8206_v49  ;;  %v4984_v50 = vpop.f32.mrb[45].mxu0 }
0x3645   :  { %v4985_v4 = vadd.f32 %v4984_v50, %v8217_v5  ;;  %v4595_v50 = vsel %vm3503_vm13, %v8280_v56, 0.0 }
0x3646   :  { %v4988_v19 = vrot.slane %v4983_v12, 6 }
0x3647   :  { %v4998_v45 = vrot.slane %v4985_v4, 6 }
0x3648   :  { %v4990_v16 = vadd.f32 %v4988_v19, %v8341_v10  ;;  %v5240_v19 = vrot.slane %v4595_v50, 6 }
0x364a   :  { %v5519_v7 = vmul.f32 -1.442695, %v4990_v16 }
0x364c   :  { %6853 = vpow2.f32 %v5519_v7 }
0x3656   :  { %v6854_v31 = vpop.eup %6853 }
0x3657   :  { %v4994_v35 = vadd.f32 1.0, %v6854_v31 }
0x3659   :  { %6855 = vrcp.f32 %v4994_v35 }
0x3663   :  { %v6856_v11 = vpop.eup %6855 }
0x3664   :  { %v5000_v24 = vmul.f32 %v6856_v11, %v4998_v45  ;;  %v5011_v0 = vmul.f32 %v6856_v11, %v5009_v30  ;;  %v5003_v20 = vsub.f32 1.0, %v6856_v11 }
0x3666   :  { %v5001_v53 = vadd.f32 %v5000_v24, %v8348_v17 }
0x3668   :  { %6857 = vtanh.f32 %v5001_v53 }
0x3672   :  { %v6858_v3 = vpop.eup %6857 }
0x3673   :  { %5005 = vrot.lane.b32.xlu1 %v6858_v3, %s6897_s20 }
0x36e5   :  { %v5006_v61 = vpop.permute.xlu1 %5005 }
0x36e6   :  { %v5008_v63 = vmul.f32 %v5006_v61, %v5003_v20 }
0x36e8   :  { %v5012_v29 = vadd.f32 %v5011_v0, %v5008_v63 }
0x36ea   :  { %v5014_v23 = vrot.slane %v5012_v29, 2 }
0x36ec   :  { %5015 = vrot.lane.b32.xlu0 %v5014_v23, %s6897_s20 }
0x375e   :  { %v5016_v51 = vpop.permute.xlu0 %5015 }
0x375f   :  { %v5019_v42 = vsel %vm3968_vm6, %v5016_v51, %v4913_v60  ;;  %v5020_v16 = vsel %vm3968_vm6, %v5016_v51, 0.0 }
0x3760   :  { %v5117_v40 = vrot.slane %v5019_v42, 4  ;;  %5520 = vmatmul.mubr.msk.f32.vlgmr.msra.gmra.mrb[36].mxu1 %vm890_vm2, %v5019_v42  ;;  %v5255_v7 = vrot.slane %v5020_v16, 6 }
0x3762   :  { %5118 = vrot.lane.b32.xlu0 %v5117_v40, %s6897_s20 }
0x37d4   :  { %v5119_v6 = vpop.permute.xlu0 %5118 }
0x3833   :  { %v5090_v39 = vpop.f32.mrb[36].mxu1 }
0x3834   :  { %v5091_v48 = vadd.f32 %v5090_v39, %v8206_v49  ;;  %v5092_v55 = vpop.f32.mrb[37].mxu1 }
0x3835   :  { %v5093_v22 = vadd.f32 %v5092_v55, %v8217_v5 }
0x3836   :  { %v5096_v33 = vrot.slane %v5091_v48, 4 }
0x3837   :  { %v5106_v25 = vrot.slane %v5093_v22, 4 }
0x3838   :  { %v5098_v14 = vadd.f32 %v5096_v33, %v8341_v10 }
0x383a   :  { %v5521_v27 = vmul.f32 -1.442695, %v5098_v14 }
0x383c   :  { %6859 = vpow2.f32 %v5521_v27 }
0x3846   :  { %v6860_v32 = vpop.eup %6859 }
0x3847   :  { %v5102_v36 = vadd.f32 1.0, %v6860_v32  ;;  %v5279_v32 = vld [vmem:[%s8488_s3 + $0x5d0] sm:$0xff] }
0x3849   :  { %6861 = vrcp.f32 %v5102_v36  ;;  %v5280_v36 = vld [vmem:[%s8488_s3 + $0x5e0] sm:$0xff] }
0x3853   :  { %v6862_v13 = vpop.eup %6861 }
0x3854   :  { %v5108_v1 = vmul.f32 %v6862_v13, %v5106_v25  ;;  %v5111_v18 = vsub.f32 1.0, %v6862_v13  ;;  %v5121_v26 = vmul.f32 %v6862_v13, %v5119_v6  ;;  %v4485_v13 = vsel %vm3385_vm11, %v8249_v47, 0.0 }
0x3855   :  { %vm2981_vm11 = vcmask 257026  }
0x3856   :  { %v5109_v41 = vadd.f32 %v5108_v1, %v8348_v17  ;;  %v6608_v1 = vpack.c.bf16 %v5280_v36, %v5279_v32 }
0x3858   :  { %6863 = vtanh.f32 %v5109_v41 }
0x3862   :  { %v6864_v46 = vpop.eup %6863 }
0x3863   :  { %5113 = vrot.lane.b32.xlu1 %v6864_v46, %s6897_s20  ;;  %v5281_v46 = vld [vmem:[%s8488_s3 + $0x5f0] sm:$0xff] }
0x38d5   :  { %v5114_v37 = vpop.permute.xlu1 %5113 }
0x38d6   :  { %v5116_v44 = vmul.f32 %v5114_v37, %v5111_v18  ;;  %v5282_v18 = vld [vmem:[%s8488_s3 + $0x600] sm:$0xff] }
0x38d7   :  { %v6612_v57 = vpack.c.bf16 %v5282_v18, %v5281_v46 }
0x38d8   :  { %v5122_v38 = vadd.f32 %v5121_v26, %v5116_v44 }
0x38da   :  { %v5124_v8 = vrot.slane %v5122_v38, 4  ;;  %v4910_v38 = vsel %vm3856_vm4, %v8352_v9, 0.0 }
0x38dc   :  { %5125 = vrot.lane.b32.xlu1 %v5124_v8, %s6897_s20 }
0x394e   :  { %v5126_v60 = vpop.permute.xlu1 %5125 }
0x394f   :  { %v5128_v34 = vsel %vm4086_vm8, %v5126_v60, %v5019_v42  ;;  %v5129_v31 = vsel %vm4086_vm8, %v5126_v60, 0.0 }
0x3950   :  { %v5226_v12 = vrot.slane %v5128_v34, 2  ;;  %5522 = vmatmul.mubr.msk.f32.vlgmr.msra.gmra.mrb[46].mxu0 %vm890_vm2, %v5128_v34  ;;  %v5260_v35 = vrot.slane %v5129_v31, 4 }
0x3952   :  { %5227 = vrot.lane.b32.xlu1 %v5226_v12, %s6897_s20 }
0x3956   :  { %5241 = vrot.lane.b32.xlu1 %v5240_v19, %s6897_s20 }
0x395a   :  { %5256 = vrot.lane.b32.xlu1 %v5255_v7, %s6897_s20 }
0x395e   :  { %5261 = vrot.lane.b32.xlu1 %v5260_v35, %s6897_s20 }
0x39c4   :  { %v5228_v63 = vpop.permute.xlu1 %5227 }
0x39c8   :  { %v5242_v22 = vpop.permute.xlu1 %5241 }
0x39c9   :  { %v5269_v41 = vsel %vm4241_vm9, %v4485_v13, %v5242_v22 }
0x39cc   :  { %v5257_v47 = vpop.permute.xlu1 %5256 }
0x39cd   :  { %v5272_v8 = vsel %vm4241_vm9, %v4910_v38, %v5257_v47 }
0x39d0   :  { %v5262_v44 = vpop.permute.xlu1 %5261 }
0x39d1   :  { %v5273_v60 = vsel %vm4243_vm10, %v5272_v8, %v5262_v44 }
0x3a23   :  { %v5199_v4 = vpop.f32.mrb[46].mxu0 }
0x3a24   :  { %v5200_v58 = vadd.f32 %v5199_v4, %v8206_v49  ;;  %v5201_v56 = vpop.f32.mrb[47].mxu0 }
0x3a25   :  { %v5202_v21 = vadd.f32 %v5201_v56, %v8217_v5  ;;  %v4704_v5 = vsel %vm3625_vm15, %v8302_v52, 0.0  ;;  %v5275_v52 = vld [vmem:[%s8488_s3 + $0x590] sm:$0xff] }
0x3a26   :  { %v5205_v30 = vrot.slane %v5200_v58, 2  ;;  %v5245_v40 = vrot.slane %v4704_v5, 4  ;;  %v6600_v14 = vpack.c.bf16 %v5276_v54, %v5275_v52 }
0x3a27   :  { %v5215_v0 = vrot.slane %v5202_v21, 2 }
0x3a28   :  { %v5207_v45 = vadd.f32 %v5205_v30, %v8341_v10  ;;  %6601 = vmatprep.subr.bf16.mxu1 %v6600_v14 }
0x3a29   :  { %6603 = vmatpush3.bf16.msra.mxu1 %v6600_v14 }
0x3a2a   :  { %v5523_v28 = vmul.f32 -1.442695, %v5207_v45 }
0x3a2c   :  { %6865 = vpow2.f32 %v5523_v28 }
0x3a36   :  { %v6866_v11 = vpop.eup %6865 }
0x3a37   :  { %v5211_v24 = vadd.f32 1.0, %v6866_v11 }
0x3a39   :  { %6867 = vrcp.f32 %v5211_v24 }
0x3a43   :  { %v6868_v53 = vpop.eup %6867 }
0x3a44   :  { %v5217_v3 = vmul.f32 %v6868_v53, %v5215_v0  ;;  %v5220_v49 = vsub.f32 1.0, %v6868_v53  ;;  %v5230_v10 = vmul.f32 %v6868_v53, %v5228_v63 }
0x3a46   :  { %v5218_v20 = vadd.f32 %v5217_v3, %v8348_v17  ;;  %v4813_v17 = vsel %vm3746_vm3, %v8324_v2, 0.0  ;;  %v5277_v2 = vld [vmem:[%s8488_s3 + $0x5b0] sm:$0xff] }
0x3a47   :  { %v5250_v39 = vrot.slane %v4813_v17, 2  ;;  %v6604_v27 = vpack.c.bf16 %v5278_v59, %v5277_v2 }
0x3a48   :  { %6869 = vtanh.f32 %v5218_v20 }
0x3a49   :  { %6605 = vmatprep.subr.bf16.mxu1 %v6604_v27 }
0x3a4a   :  { %6607 = vmatpush3.bf16.msra.mxu1 %v6604_v27 }
0x3a4b   :  { %6609 = vmatprep.subr.bf16.mxu1 %v6608_v1 }
0x3a4e   :  { %6611 = vmatpush3.bf16.msra.mxu1 %v6608_v1 }
0x3a4f   :  { %6613 = vmatprep.subr.bf16.mxu1 %v6612_v57 }
0x3a52   :  { %v6870_v61 = vpop.eup %6869  ;;  %6615 = vmatpush3.bf16.msra.mxu1 %v6612_v57 }
0x3a53   :  { %5222 = vrot.lane.b32.xlu0 %v6870_v61, %s6897_s20 }
0x3ac5   :  { %v5223_v29 = vpop.permute.xlu0 %5222 }
0x3ac6   :  { %v5225_v23 = vmul.f32 %v5223_v29, %v5220_v49 }
0x3ac8   :  { %v5231_v51 = vadd.f32 %v5230_v10, %v5225_v23 }
0x3aca   :  { %v5233_v42 = vrot.slane %v5231_v51, 6 }
0x3acc   :  { %5234 = vrot.lane.b32.xlu0 %v5233_v42, %s6897_s20 }
0x3ad0   :  { %5246 = vrot.lane.b32.xlu0 %v5245_v40, %s6897_s20 }
0x3ad4   :  { %5251 = vrot.lane.b32.xlu0 %v5250_v39, %s6897_s20 }
0x3b3e   :  { %v5235_v48 = vpop.permute.xlu0 %5234 }
0x3b3f   :  { %v5237_v55 = vsel %vm4203_vm1, %v5235_v48, %v5128_v34  ;;  %v5238_v43 = vsel %vm4203_vm1, %v5235_v48, 0.0 }
0x3b40   :  { %v5265_v33 = vrot.slane %v5238_v43, 2  ;;  %5374 = vst.msk [vmem:[#allocation2 + $0x2] sm:$0x3] %vm5371_vm0, %v5237_v55 }
0x3b42   :  { %5266 = vrot.lane.b32.xlu0 %v5265_v33, %s6897_s20  ;;  %v5247_v25 = vpop.permute.xlu0 %5246 }
0x3b43   :  { %v5270_v6 = vsel %vm4243_vm10, %v5269_v41, %v5247_v25 }
0x3b46   :  { %v5252_v37 = vpop.permute.xlu0 %5251 }
0x3b47   :  { %v5271_v26 = vsel %vm4245_vm12, %v5270_v6, %v5252_v37 }
0x3b48   :  { %5286 = vrot.lane.b32.xlu1 %v5271_v26, %s6897_s20 }
0x3b4c   :  { %2978 = vrot.lane.b32.xlu1 %v7708_v15, %s6898_s21 }
0x3bb4   :  { %v5267_v34 = vpop.permute.xlu0 %5266 }
0x3bb5   :  { %v5274_v12 = vsel %vm4245_vm12, %v5273_v60, %v5267_v34 }
0x3bb6   :  { %5288 = vrot.lane.b32.xlu0 %v5274_v12, %s6897_s20 }
0x3bba   :  { %v5287_v50 = vpop.permute.xlu1 %5286 }
0x3bbb   :  { %6066 = vmatprep.mubr.msk.f32.mxu1 %vm890_vm2, %v5287_v50 }
0x3bbe   :  { %v2979_v15 = vpop.permute.xlu1 %2978 }
0x3bbf   :  { %2982 = vst.msk [vmem:[%s8491_s6 - $0x2] sm:$0xc] %vm2981_vm11, %v2979_v15 }
0x3c28   :  { %v5289_v62 = vpop.permute.xlu0 %5288 }
0x3c29   :  { %6067 = vmatmul.mubr.msk.f32.vlgmr.msra.gmra.mrb[38].mxu1 %vm890_vm2, %v5289_v62 }
0x3c2a   :  { %6883 = shalt.err (!%p6880_p4)
}
0x3c2b   :  { %s6884_s15 = scalar_lea.hbm %s8490_s5, 64 }
0x3c2c   :  { %p6885_p5 = scmp.ne.s32.totalorder %s8490_s5, %s6884_s15  ;;  %p6888_p6 = scmp.lt.u32.totalorder %s6884_s15, %s8490_s5 }
0x3c2e   :  { %p6890_p7 = pnand %p6888_p6, %p6885_p5 }
0x3c30   :  { %6893 = shalt.err (!%p6890_p7)
}
0x3c31   :  { %s6904_s18 = smov 2   ;;  %v5283_v9 = vld [vmem:[%s8488_s3 + $0x610] ss:$0 sm:$0xff] }
0x3c32   :  { %5388 = dma.vmem_to_hbm [thread:$0]  %s5383_s12, 64, %s8490_s5, [#allocation3], %s6899_s22, %s6899_s22, %s6904_s18  }
0x3cfc   :  { %v6068_v19 = vpop.f32.mrb[38].mxu1 }
0x3cfd   :  { %v5366_v16 = vadd.f32 %v6068_v19, %v5283_v9  ;;  %v5360_v7 = vpop.f32.mrb[39].mxu1 }
0x3cfe   :  { %v5361_v31 = vadd.f32 %v5360_v7, %v5283_v9 }
0x3cff   :  { %5370 = vst [vmem:[%s8489_s4 + $0x8] sm:$0xff] %v5366_v16 }
0x3d00   :  { %5369 = vst [vmem:[%s8489_s4] sm:$0xff] %v5361_v31 }
0x3d01   :  { %6894 = dma.done.wait [#allocation3], 64  }
0x3d02   :  { %6895 = vsyncadd [#allocation3], 4294967232 }
0x3d03   :  { %5398 = vsyncpa [#allocation3], 1 }

</bundles_post_ra>
